<compile_context>
chip_gen: v7x
topology: tpu7x:2x2x1
jax: 0.10.0
libtpu: 0.0.40
codegen_flags: <defaults>
</compile_context>

<pallas_src>
import functools

import jax
import jax.numpy as jnp
from jax.experimental import pallas as pl
from jax.experimental.pallas import tpu as pltpu

LANES = 128      # internal channel width (one full vreg lane width)
CIN0_PAD = 8     # HBM input channel padding (real stem cin = 4)


# ---------------------------------------------------------------------------
# Fused backbone kernel: L x (3x3 conv + frozen-BN + ReLU), one image per step
# ---------------------------------------------------------------------------
def _backbone_kernel(xpad_ref, w0_ref, w_ref, b_ref, out_ref,
                     act_a, act_b, acc_ref, *, H, W, n_layers):
    """One image per grid step.

    xpad_ref : (H+2, WP, C0P) f32   spatially padded NHWC input (WP = 8-aligned)
    w0_ref   : (9, C0P, CP)   bf16  layer-0 weights, BN scale folded in
    w_ref    : (L-1, 9, CP, CP) bf16  layer 1..L-1 weights, BN scale folded in
    b_ref    : (L, 1, CP)     f32   folded BN biases
    out_ref  : (H*W, CP)      f32   final feature map (lane-dense)
    act_a/b  : (H+2, WP, CP)  f32   VMEM ping-pong padded activations
    acc_ref  : (H*W, CP)      f32   VMEM accumulator
    """
    CP = acc_ref.shape[-1]

    # Zero the padded activation scratches once per image: interiors are fully
    # overwritten every layer, the 1-pixel halo must stay zero (pad=1 conv).
    act_a[...] = jnp.zeros_like(act_a)
    act_b[...] = jnp.zeros_like(act_b)

    def conv_bn_relu(src_ref, get_w, bias, dst_ref, dst_is_padded):
        # 9-shift accumulation into the VMEM accumulator (no big live values).
        acc_ref[...] = jnp.zeros_like(acc_ref)
        for kh in range(3):                      # static unroll: static slices
            for kw in range(3):
                win = src_ref[kh:kh + H, kw:kw + W, :]          # (H, W, Cin)
                a = win.reshape(H * W, win.shape[-1]).astype(jnp.bfloat16)
                acc_ref[...] += jnp.dot(a, get_w(kh * 3 + kw),
                                        preferred_element_type=jnp.float32)
        # Epilogue in f32 (v5e-safe), bias = folded frozen-BN shift.
        y = jnp.maximum(acc_ref[...] + bias, 0.0)
        if dst_is_padded:
            # write the interior of the next layer's padded activation
            dst_ref[1:1 + H, 1:1 + W, :] = y.reshape(H, W, CP)
        else:
            dst_ref[...] = y.astype(dst_ref.dtype)

    # Layer 0 (stem): reads the small-channel padded input block.
    conv_bn_relu(xpad_ref, lambda s: w0_ref[s], b_ref[0], act_a, True)

    # Layers 1..L-1: ping-pong between the two VMEM-resident activations.
    src, dst = act_a, act_b
    for l in range(1, n_layers):
        last = (l == n_layers - 1)
        conv_bn_relu(src, lambda s, l=l: w_ref[l - 1, s], b_ref[l],
                     out_ref if last else dst, not last)
        src, dst = dst, src


def _fused_backbone_forward(x_nchw, w0, w_rest, bias, *, layer_dims):
    """Runs the whole conv/BN/ReLU stack in one pallas_call, returns NCHW."""
    N, cin, H, W = x_nchw.shape
    C0P = w0.shape[1]
    CP = w_rest.shape[-1]
    L = w_rest.shape[0] + 1
    assert L >= 2 and cin <= C0P
    assert W % 8 == 0, "W must be a multiple of 8 (layout-preserving reshapes)"
    WP = ((W + 2 + 7) // 8) * 8          # pad width to a sublane multiple (24)

    # Host-side prep: NCHW -> NHWC, +1 spatial halo, width/channel zero pad.
    x = jnp.transpose(x_nchw, (0, 2, 3, 1)).astype(jnp.float32)
    xpad = jnp.pad(x, ((0, 0), (1, 1), (1, WP - W - 1), (0, C0P - cin)))

    kernel = functools.partial(_backbone_kernel, H=H, W=W, n_layers=L)

    # Real-FLOP cost estimate (not padded 128x128 channels).
    flops = 2 * N * H * W * 9 * int(sum(ci * co for ci, co in layer_dims))
    bytes_accessed = int(xpad.size * 4 + w0.size * 2 + w_rest.size * 2
                         + bias.size * 4 + N * H * W * CP * 4)
    cost = pl.CostEstimate(flops=flops, transcendentals=0,
                           bytes_accessed=bytes_accessed)

    out = pl.pallas_call(
        kernel,
        out_shape=jax.ShapeDtypeStruct((N, H * W, CP), jnp.float32),
        grid_spec=pltpu.PrefetchScalarGridSpec(
            num_scalar_prefetch=0,
            grid=(N,),
            in_specs=[
                # one padded image per grid step (batch dim squeezed out)
                pl.BlockSpec((None, H + 2, WP, C0P), lambda n: (n, 0, 0, 0)),
                pl.BlockSpec((9, C0P, CP), lambda n: (0, 0, 0)),        # resident
                pl.BlockSpec(w_rest.shape, lambda n: (0, 0, 0, 0)),     # resident
                pl.BlockSpec((L, 1, CP), lambda n: (0, 0, 0)),          # resident
            ],
            out_specs=pl.BlockSpec((None, H * W, CP), lambda n: (n, 0, 0)),
            scratch_shapes=[
                pltpu.VMEM((H + 2, WP, CP), jnp.float32),   # act ping
                pltpu.VMEM((H + 2, WP, CP), jnp.float32),   # act pong
                pltpu.VMEM((H * W, CP), jnp.float32),       # accumulator
            ],
        ),
        compiler_params=pltpu.CompilerParams(
            dimension_semantics=("parallel",),    # megacore: shard over images
            vmem_limit_bytes=32 * 1024 * 1024,    # working set << limit on all gens
        ),
        cost_estimate=cost,
    )(xpad, w0, w_rest, bias)

    # TODO(synk): at real sizes, emit the channel slice / NCHW transpose from
    # the kernel to avoid this extra (tiny here) HBM pass.
    cout_final = layer_dims[-1][1]
    out = out.reshape(N, H, W, CP)[..., :cout_final]
    return jnp.transpose(out, (0, 3, 1, 2))                   # NHWC -> NCHW


# ---------------------------------------------------------------------------
# Host-side parameter folding / packing
# ---------------------------------------------------------------------------
def _fold_and_pack(body, cp=LANES, cin0_pad=CIN0_PAD):
    """Fold frozen-BN scale into weights, reorder OIHW -> (shift, cin, cout),
    zero-pad channels, cast weights to bf16."""
    def fold(blk):
        return blk["w"] * blk["scale"][:, None, None, None]          # OIHW

    def to_shift_major(w_oihw, cin_pad, cout_pad):
        cout, cin = w_oihw.shape[0], w_oihw.shape[1]
        assert cin <= cin_pad and cout <= cout_pad
        w = jnp.transpose(w_oihw, (2, 3, 1, 0)).reshape(9, cin, cout)
        return jnp.pad(w, ((0, 0), (0, cin_pad - cin), (0, cout_pad - cout)))

    w0 = to_shift_major(fold(body[0]), cin0_pad, cp).astype(jnp.bfloat16)
    w_rest = jnp.stack([to_shift_major(fold(b), cp, cp) for b in body[1:]]
                       ).astype(jnp.bfloat16)                        # (L-1,9,cp,cp)
    bias = jnp.stack([jnp.pad(b["bias"], (0, cp - b["bias"].shape[0]))
                      for b in body]).reshape(len(body), 1, cp).astype(jnp.float32)
    return w0, w_rest, bias


def _init_block(key, cin, cout):
    """Deterministic conv + frozen-BN params, BN folded to (scale, bias)."""
    k1, k2, k3, k4, k5 = jax.random.split(key, 5)
    w = jax.random.normal(k1, (cout, cin, 3, 3), jnp.float32) * 0.1   # OIHW
    gamma = 1.0 + 0.1 * jax.random.normal(k2, (cout,), jnp.float32)
    beta = 0.1 * jax.random.normal(k3, (cout,), jnp.float32)
    r_mean = 0.1 * jax.random.normal(k4, (cout,), jnp.float32)
    r_var = jnp.abs(jax.random.normal(k5, (cout,), jnp.float32)) + 1.0
    eps = 1e-5
    scale = gamma / jnp.sqrt(r_var + eps)          # frozen-BN fold
    bias = beta - r_mean * scale
    return {"w": w, "scale": scale, "bias": bias}


# ---------------------------------------------------------------------------
# BackboneBase wrapper (mirrors the PyTorch module)
# ---------------------------------------------------------------------------
class BackboneBase:
    """JAX/Pallas mirror of the PyTorch BackboneBase wrapper.

    Parameter freezing (`requires_grad_(False)`) and interm-layer selection
    only affect training / bookkeeping; forward is just `self.body(tensor)`.
    """

    def __init__(self, body_params, train_backbone: bool,
                 return_interm_layers: bool):
        # TODO(synk): freezing / return_interm_layers are forward-pass no-ops.
        del train_backbone, return_interm_layers
        self.body = body_params
        self._layer_dims = [(b["w"].shape[1], b["w"].shape[0]) for b in body_params]
        self._w0, self._w_rest, self._bias = _fold_and_pack(body_params)

    def __call__(self, tensor_nchw, preact=False):
        del preact   # matches the PyTorch signature; unused in forward math
        return _fused_backbone_forward(tensor_nchw, self._w0, self._w_rest,
                                       self._bias, layer_dims=self._layer_dims)


# ---------------------------------------------------------------------------
# Reference (pure JAX, f32) for correctness check
# ---------------------------------------------------------------------------
def _ref_forward(x_nchw, body):
    x = x_nchw
    for blk in body:
        y = jax.lax.conv_general_dilated(
            x, blk["w"], window_strides=(1, 1), padding=((1, 1), (1, 1)),
            dimension_numbers=("NCHW", "OIHW", "NCHW"))
        y = y * blk["scale"][None, :, None, None] + blk["bias"][None, :, None, None]
        x = jnp.maximum(y, 0.0)
    return x


if __name__ == "__main__":
    key = jax.random.PRNGKey(0)
    kx, k0, k1, k2, k3 = jax.random.split(key, 5)

    # Small shapes consistent with the module: batch=2, channels=4, spatial=16.
    x = jax.random.normal(kx, (2, 4, 16, 16), jnp.float32)       # NCHW

    body = [
        _init_block(k0, 4, 8),     # stem
        _init_block(k1, 8, 16),    # "layer2"
        _init_block(k2, 16, 16),   # "layer3"
        _init_block(k3, 16, 16),   # "layer4"
    ]

    model = BackboneBase(body, train_backbone=True, return_interm_layers=False)
    fwd = jax.jit(lambda t: model(t, preact=False))

    out = jax.block_until_ready(fwd(x))
    ref = jax.block_until_ready(_ref_forward(x, body))

    assert out.shape == ref.shape == (2, 16, 16, 16), out.shape
    max_err = float(jnp.max(jnp.abs(out - ref)))
    # bf16 MXU inputs with f32 accumulation over 4 layers -> loosened tolerance.
    assert jnp.allclose(out, ref, atol=5e-2, rtol=5e-2), max_err
    print("KERNEL_OK")
</pallas_src>

<mosaic_0001>
module attributes {stable_mosaic.version = 11 : i64} {
  func.func @_backbone_kernel(%arg0: i32, %arg1: memref<1x18x24x8xf32, #tpu.memory_space<vmem>>, %arg2: memref<9x8x128xbf16, #tpu.memory_space<vmem>>, %arg3: memref<3x9x128x128xbf16, #tpu.memory_space<vmem>>, %arg4: memref<4x1x128xf32, #tpu.memory_space<vmem>>, %arg5: memref<1x256x128xf32, #tpu.memory_space<vmem>>, %arg6: memref<18x24x128xf32, #tpu.memory_space<vmem>>, %arg7: memref<18x24x128xf32, #tpu.memory_space<vmem>>, %arg8: memref<256x128xf32, #tpu.memory_space<vmem>>) attributes {dimension_semantics = [#tpu.dimension_semantics<parallel>], iteration_bounds = array<i64: 2>, scalar_prefetch = 0 : i64, scratch_operands = 3 : i64, tpu.core_type = #tpu.core_type<tc>, window_params = [{transform_indices = @transform_0, window_bounds = array<i64: 1, 18, 24, 8>}, {pipeline_mode = #tpu.pipeline_mode<synchronous>, transform_indices = @transform_1, window_bounds = array<i64: 9, 8, 128>}, {pipeline_mode = #tpu.pipeline_mode<synchronous>, transform_indices = @transform_2, window_bounds = array<i64: 3, 9, 128, 128>}, {pipeline_mode = #tpu.pipeline_mode<synchronous>, transform_indices = @transform_3, window_bounds = array<i64: 4, 1, 128>}, {transform_indices = @transform_4, window_bounds = array<i64: 1, 256, 128>}]} {
    %cst = arith.constant 0.000000e+00 : f32
    %0 = vector.broadcast %cst : f32 to vector<18x24x128xf32>
    %c0 = arith.constant 0 : index
    %c0_0 = arith.constant 0 : index
    %c0_1 = arith.constant 0 : index
    %1 = vector.load %arg6[%c0, %c0_0, %c0_1] : memref<18x24x128xf32, #tpu.memory_space<vmem>>, vector<18x24x128xf32>
    tpu.vector_store %arg6[%c0, %c0_0, %c0_1], %0 {strides = array<i32>} : memref<18x24x128xf32, #tpu.memory_space<vmem>>, vector<18x24x128xf32>,
    %cst_2 = arith.constant 0.000000e+00 : f32
    %2 = vector.broadcast %cst_2 : f32 to vector<18x24x128xf32>
    %c0_3 = arith.constant 0 : index
    %c0_4 = arith.constant 0 : index
    %c0_5 = arith.constant 0 : index
    %3 = vector.load %arg7[%c0_3, %c0_4, %c0_5] : memref<18x24x128xf32, #tpu.memory_space<vmem>>, vector<18x24x128xf32>
    tpu.vector_store %arg7[%c0_3, %c0_4, %c0_5], %2 {strides = array<i32>} : memref<18x24x128xf32, #tpu.memory_space<vmem>>, vector<18x24x128xf32>,
    %c0_6 = arith.constant 0 : index
    %c0_7 = arith.constant 0 : index
    %c0_8 = arith.constant 0 : index
    %4 = vector.load %arg4[%c0_6, %c0_7, %c0_8] : memref<4x1x128xf32, #tpu.memory_space<vmem>>, vector<1x1x128xf32>
    %5 = vector.shape_cast %4 : vector<1x1x128xf32> to vector<1x128xf32>
    %cst_9 = arith.constant 0.000000e+00 : f32
    %6 = vector.broadcast %cst_9 : f32 to vector<256x128xf32>
    %c0_10 = arith.constant 0 : index
    %c0_11 = arith.constant 0 : index
    %7 = vector.load %arg8[%c0_10, %c0_11] : memref<256x128xf32, #tpu.memory_space<vmem>>, vector<256x128xf32>
    tpu.vector_store %arg8[%c0_10, %c0_11], %6 {strides = array<i32>} : memref<256x128xf32, #tpu.memory_space<vmem>>, vector<256x128xf32>,
    %c0_12 = arith.constant 0 : index
    %c0_13 = arith.constant 0 : index
    %c0_14 = arith.constant 0 : index
    %c0_15 = arith.constant 0 : index
    %8 = vector.load %arg1[%c0_12, %c0_13, %c0_14, %c0_15] : memref<1x18x24x8xf32, #tpu.memory_space<vmem>>, vector<1x16x16x8xf32>
    %9 = vector.shape_cast %8 : vector<1x16x16x8xf32> to vector<16x16x8xf32>
    %10 = vector.shape_cast %9 : vector<16x16x8xf32> to vector<256x8xf32>
    %11 = arith.truncf %10 : vector<256x8xf32> to vector<256x8xbf16>
    %c0_16 = arith.constant 0 : index
    %c0_17 = arith.constant 0 : index
    %12 = vector.load %arg8[%c0_16, %c0_17] : memref<256x128xf32, #tpu.memory_space<vmem>>, vector<256x128xf32>
    %c0_18 = arith.constant 0 : index
    %c0_19 = arith.constant 0 : index
    %c0_20 = arith.constant 0 : index
    %13 = vector.load %arg2[%c0_18, %c0_19, %c0_20] : memref<9x8x128xbf16, #tpu.memory_space<vmem>>, vector<1x8x128xbf16>
    %14 = vector.shape_cast %13 : vector<1x8x128xbf16> to vector<8x128xbf16>
    %cst_21 = arith.constant dense<0.000000e+00> : vector<256x128xf32>
    %15 = tpu.matmul %11, %14, %cst_21 {dimension_numbers = #tpu.dot_dimension_numbers<[1], [0], [0], [1], [0, 0, 1, 1], [], []>} : vector<256x8xbf16>, vector<8x128xbf16>, vector<256x128xf32> -> vector<256x128xf32>
    %16 = arith.addf %12, %15 : vector<256x128xf32>
    %c0_22 = arith.constant 0 : index
    %c0_23 = arith.constant 0 : index
    %17 = vector.load %arg8[%c0_22, %c0_23] : memref<256x128xf32, #tpu.memory_space<vmem>>, vector<256x128xf32>
    tpu.vector_store %arg8[%c0_22, %c0_23], %16 {strides = array<i32>} : memref<256x128xf32, #tpu.memory_space<vmem>>, vector<256x128xf32>,
    %c0_24 = arith.constant 0 : index
    %c0_25 = arith.constant 0 : index
    %c1 = arith.constant 1 : index
    %c0_26 = arith.constant 0 : index
    %18 = vector.load %arg1[%c0_24, %c0_25, %c1, %c0_26] : memref<1x18x24x8xf32, #tpu.memory_space<vmem>>, vector<1x16x16x8xf32>
    %19 = vector.shape_cast %18 : vector<1x16x16x8xf32> to vector<16x16x8xf32>
    %20 = vector.shape_cast %19 : vector<16x16x8xf32> to vector<256x8xf32>
    %21 = arith.truncf %20 : vector<256x8xf32> to vector<256x8xbf16>
    %c0_27 = arith.constant 0 : index
    %c0_28 = arith.constant 0 : index
    %22 = vector.load %arg8[%c0_27, %c0_28] : memref<256x128xf32, #tpu.memory_space<vmem>>, vector<256x128xf32>
    %c1_29 = arith.constant 1 : index
    %c0_30 = arith.constant 0 : index
    %c0_31 = arith.constant 0 : index
    %23 = vector.load %arg2[%c1_29, %c0_30, %c0_31] : memref<9x8x128xbf16, #tpu.memory_space<vmem>>, vector<1x8x128xbf16>
    %24 = vector.shape_cast %23 : vector<1x8x128xbf16> to vector<8x128xbf16>
    %cst_32 = arith.constant dense<0.000000e+00> : vector<256x128xf32>
    %25 = tpu.matmul %21, %24, %cst_32 {dimension_numbers = #tpu.dot_dimension_numbers<[1], [0], [0], [1], [0, 0, 1, 1], [], []>} : vector<256x8xbf16>, vector<8x128xbf16>, vector<256x128xf32> -> vector<256x128xf32>
    %26 = arith.addf %22, %25 : vector<256x128xf32>
    %c0_33 = arith.constant 0 : index
    %c0_34 = arith.constant 0 : index
    %27 = vector.load %arg8[%c0_33, %c0_34] : memref<256x128xf32, #tpu.memory_space<vmem>>, vector<256x128xf32>
    tpu.vector_store %arg8[%c0_33, %c0_34], %26 {strides = array<i32>} : memref<256x128xf32, #tpu.memory_space<vmem>>, vector<256x128xf32>,
    %c0_35 = arith.constant 0 : index
    %c0_36 = arith.constant 0 : index
    %c2 = arith.constant 2 : index
    %c0_37 = arith.constant 0 : index
    %28 = vector.load %arg1[%c0_35, %c0_36, %c2, %c0_37] : memref<1x18x24x8xf32, #tpu.memory_space<vmem>>, vector<1x16x16x8xf32>
    %29 = vector.shape_cast %28 : vector<1x16x16x8xf32> to vector<16x16x8xf32>
    %30 = vector.shape_cast %29 : vector<16x16x8xf32> to vector<256x8xf32>
    %31 = arith.truncf %30 : vector<256x8xf32> to vector<256x8xbf16>
    %c0_38 = arith.constant 0 : index
    %c0_39 = arith.constant 0 : index
    %32 = vector.load %arg8[%c0_38, %c0_39] : memref<256x128xf32, #tpu.memory_space<vmem>>, vector<256x128xf32>
    %c2_40 = arith.constant 2 : index
    %c0_41 = arith.constant 0 : index
    %c0_42 = arith.constant 0 : index
    %33 = vector.load %arg2[%c2_40, %c0_41, %c0_42] : memref<9x8x128xbf16, #tpu.memory_space<vmem>>, vector<1x8x128xbf16>
    %34 = vector.shape_cast %33 : vector<1x8x128xbf16> to vector<8x128xbf16>
    %cst_43 = arith.constant dense<0.000000e+00> : vector<256x128xf32>
    %35 = tpu.matmul %31, %34, %cst_43 {dimension_numbers = #tpu.dot_dimension_numbers<[1], [0], [0], [1], [0, 0, 1, 1], [], []>} : vector<256x8xbf16>, vector<8x128xbf16>, vector<256x128xf32> -> vector<256x128xf32>
    %36 = arith.addf %32, %35 : vector<256x128xf32>
    %c0_44 = arith.constant 0 : index
    %c0_45 = arith.constant 0 : index
    %37 = vector.load %arg8[%c0_44, %c0_45] : memref<256x128xf32, #tpu.memory_space<vmem>>, vector<256x128xf32>
    tpu.vector_store %arg8[%c0_44, %c0_45], %36 {strides = array<i32>} : memref<256x128xf32, #tpu.memory_space<vmem>>, vector<256x128xf32>,
    %c0_46 = arith.constant 0 : index
    %c1_47 = arith.constant 1 : index
    %c0_48 = arith.constant 0 : index
    %c0_49 = arith.constant 0 : index
    %38 = vector.load %arg1[%c0_46, %c1_47, %c0_48, %c0_49] : memref<1x18x24x8xf32, #tpu.memory_space<vmem>>, vector<1x16x16x8xf32>
    %39 = vector.shape_cast %38 : vector<1x16x16x8xf32> to vector<16x16x8xf32>
    %40 = vector.shape_cast %39 : vector<16x16x8xf32> to vector<256x8xf32>
    %41 = arith.truncf %40 : vector<256x8xf32> to vector<256x8xbf16>
    %c0_50 = arith.constant 0 : index
    %c0_51 = arith.constant 0 : index
    %42 = vector.load %arg8[%c0_50, %c0_51] : memref<256x128xf32, #tpu.memory_space<vmem>>, vector<256x128xf32>
    %c3 = arith.constant 3 : index
    %c0_52 = arith.constant 0 : index
    %c0_53 = arith.constant 0 : index
    %43 = vector.load %arg2[%c3, %c0_52, %c0_53] : memref<9x8x128xbf16, #tpu.memory_space<vmem>>, vector<1x8x128xbf16>
    %44 = vector.shape_cast %43 : vector<1x8x128xbf16> to vector<8x128xbf16>
    %cst_54 = arith.constant dense<0.000000e+00> : vector<256x128xf32>
    %45 = tpu.matmul %41, %44, %cst_54 {dimension_numbers = #tpu.dot_dimension_numbers<[1], [0], [0], [1], [0, 0, 1, 1], [], []>} : vector<256x8xbf16>, vector<8x128xbf16>, vector<256x128xf32> -> vector<256x128xf32>
    %46 = arith.addf %42, %45 : vector<256x128xf32>
    %c0_55 = arith.constant 0 : index
    %c0_56 = arith.constant 0 : index
    %47 = vector.load %arg8[%c0_55, %c0_56] : memref<256x128xf32, #tpu.memory_space<vmem>>, vector<256x128xf32>
    tpu.vector_store %arg8[%c0_55, %c0_56], %46 {strides = array<i32>} : memref<256x128xf32, #tpu.memory_space<vmem>>, vector<256x128xf32>,
    %c0_57 = arith.constant 0 : index
    %c1_58 = arith.constant 1 : index
    %c1_59 = arith.constant 1 : index
    %c0_60 = arith.constant 0 : index
    %48 = vector.load %arg1[%c0_57, %c1_58, %c1_59, %c0_60] : memref<1x18x24x8xf32, #tpu.memory_space<vmem>>, vector<1x16x16x8xf32>
    %49 = vector.shape_cast %48 : vector<1x16x16x8xf32> to vector<16x16x8xf32>
    %50 = vector.shape_cast %49 : vector<16x16x8xf32> to vector<256x8xf32>
    %51 = arith.truncf %50 : vector<256x8xf32> to vector<256x8xbf16>
    %c0_61 = arith.constant 0 : index
    %c0_62 = arith.constant 0 : index
    %52 = vector.load %arg8[%c0_61, %c0_62] : memref<256x128xf32, #tpu.memory_space<vmem>>, vector<256x128xf32>
    %c4 = arith.constant 4 : index
    %c0_63 = arith.constant 0 : index
    %c0_64 = arith.constant 0 : index
    %53 = vector.load %arg2[%c4, %c0_63, %c0_64] : memref<9x8x128xbf16, #tpu.memory_space<vmem>>, vector<1x8x128xbf16>
    %54 = vector.shape_cast %53 : vector<1x8x128xbf16> to vector<8x128xbf16>
    %cst_65 = arith.constant dense<0.000000e+00> : vector<256x128xf32>
    %55 = tpu.matmul %51, %54, %cst_65 {dimension_numbers = #tpu.dot_dimension_numbers<[1], [0], [0], [1], [0, 0, 1, 1], [], []>} : vector<256x8xbf16>, vector<8x128xbf16>, vector<256x128xf32> -> vector<256x128xf32>
    %56 = arith.addf %52, %55 : vector<256x128xf32>
    %c0_66 = arith.constant 0 : index
    %c0_67 = arith.constant 0 : index
    %57 = vector.load %arg8[%c0_66, %c0_67] : memref<256x128xf32, #tpu.memory_space<vmem>>, vector<256x128xf32>
    tpu.vector_store %arg8[%c0_66, %c0_67], %56 {strides = array<i32>} : memref<256x128xf32, #tpu.memory_space<vmem>>, vector<256x128xf32>,
    %c0_68 = arith.constant 0 : index
    %c1_69 = arith.constant 1 : index
    %c2_70 = arith.constant 2 : index
    %c0_71 = arith.constant 0 : index
    %58 = vector.load %arg1[%c0_68, %c1_69, %c2_70, %c0_71] : memref<1x18x24x8xf32, #tpu.memory_space<vmem>>, vector<1x16x16x8xf32>
    %59 = vector.shape_cast %58 : vector<1x16x16x8xf32> to vector<16x16x8xf32>
    %60 = vector.shape_cast %59 : vector<16x16x8xf32> to vector<256x8xf32>
    %61 = arith.truncf %60 : vector<256x8xf32> to vector<256x8xbf16>
    %c0_72 = arith.constant 0 : index
    %c0_73 = arith.constant 0 : index
    %62 = vector.load %arg8[%c0_72, %c0_73] : memref<256x128xf32, #tpu.memory_space<vmem>>, vector<256x128xf32>
    %c5 = arith.constant 5 : index
    %c0_74 = arith.constant 0 : index
    %c0_75 = arith.constant 0 : index
    %63 = vector.load %arg2[%c5, %c0_74, %c0_75] : memref<9x8x128xbf16, #tpu.memory_space<vmem>>, vector<1x8x128xbf16>
    %64 = vector.shape_cast %63 : vector<1x8x128xbf16> to vector<8x128xbf16>
    %cst_76 = arith.constant dense<0.000000e+00> : vector<256x128xf32>
    %65 = tpu.matmul %61, %64, %cst_76 {dimension_numbers = #tpu.dot_dimension_numbers<[1], [0], [0], [1], [0, 0, 1, 1], [], []>} : vector<256x8xbf16>, vector<8x128xbf16>, vector<256x128xf32> -> vector<256x128xf32>
    %66 = arith.addf %62, %65 : vector<256x128xf32>
    %c0_77 = arith.constant 0 : index
    %c0_78 = arith.constant 0 : index
    %67 = vector.load %arg8[%c0_77, %c0_78] : memref<256x128xf32, #tpu.memory_space<vmem>>, vector<256x128xf32>
    tpu.vector_store %arg8[%c0_77, %c0_78], %66 {strides = array<i32>} : memref<256x128xf32, #tpu.memory_space<vmem>>, vector<256x128xf32>,
    %c0_79 = arith.constant 0 : index
    %c2_80 = arith.constant 2 : index
    %c0_81 = arith.constant 0 : index
    %c0_82 = arith.constant 0 : index
    %68 = vector.load %arg1[%c0_79, %c2_80, %c0_81, %c0_82] : memref<1x18x24x8xf32, #tpu.memory_space<vmem>>, vector<1x16x16x8xf32>
    %69 = vector.shape_cast %68 : vector<1x16x16x8xf32> to vector<16x16x8xf32>
    %70 = vector.shape_cast %69 : vector<16x16x8xf32> to vector<256x8xf32>
    %71 = arith.truncf %70 : vector<256x8xf32> to vector<256x8xbf16>
    %c0_83 = arith.constant 0 : index
    %c0_84 = arith.constant 0 : index
    %72 = vector.load %arg8[%c0_83, %c0_84] : memref<256x128xf32, #tpu.memory_space<vmem>>, vector<256x128xf32>
    %c6 = arith.constant 6 : index
    %c0_85 = arith.constant 0 : index
    %c0_86 = arith.constant 0 : index
    %73 = vector.load %arg2[%c6, %c0_85, %c0_86] : memref<9x8x128xbf16, #tpu.memory_space<vmem>>, vector<1x8x128xbf16>
    %74 = vector.shape_cast %73 : vector<1x8x128xbf16> to vector<8x128xbf16>
    %cst_87 = arith.constant dense<0.000000e+00> : vector<256x128xf32>
    %75 = tpu.matmul %71, %74, %cst_87 {dimension_numbers = #tpu.dot_dimension_numbers<[1], [0], [0], [1], [0, 0, 1, 1], [], []>} : vector<256x8xbf16>, vector<8x128xbf16>, vector<256x128xf32> -> vector<256x128xf32>
    %76 = arith.addf %72, %75 : vector<256x128xf32>
    %c0_88 = arith.constant 0 : index
    %c0_89 = arith.constant 0 : index
    %77 = vector.load %arg8[%c0_88, %c0_89] : memref<256x128xf32, #tpu.memory_space<vmem>>, vector<256x128xf32>
    tpu.vector_store %arg8[%c0_88, %c0_89], %76 {strides = array<i32>} : memref<256x128xf32, #tpu.memory_space<vmem>>, vector<256x128xf32>,
    %c0_90 = arith.constant 0 : index
    %c2_91 = arith.constant 2 : index
    %c1_92 = arith.constant 1 : index
    %c0_93 = arith.constant 0 : index
    %78 = vector.load %arg1[%c0_90, %c2_91, %c1_92, %c0_93] : memref<1x18x24x8xf32, #tpu.memory_space<vmem>>, vector<1x16x16x8xf32>
    %79 = vector.shape_cast %78 : vector<1x16x16x8xf32> to vector<16x16x8xf32>
    %80 = vector.shape_cast %79 : vector<16x16x8xf32> to vector<256x8xf32>
    %81 = arith.truncf %80 : vector<256x8xf32> to vector<256x8xbf16>
    %c0_94 = arith.constant 0 : index
    %c0_95 = arith.constant 0 : index
    %82 = vector.load %arg8[%c0_94, %c0_95] : memref<256x128xf32, #tpu.memory_space<vmem>>, vector<256x128xf32>
    %c7 = arith.constant 7 : index
    %c0_96 = arith.constant 0 : index
    %c0_97 = arith.constant 0 : index
    %83 = vector.load %arg2[%c7, %c0_96, %c0_97] : memref<9x8x128xbf16, #tpu.memory_space<vmem>>, vector<1x8x128xbf16>
    %84 = vector.shape_cast %83 : vector<1x8x128xbf16> to vector<8x128xbf16>
    %cst_98 = arith.constant dense<0.000000e+00> : vector<256x128xf32>
    %85 = tpu.matmul %81, %84, %cst_98 {dimension_numbers = #tpu.dot_dimension_numbers<[1], [0], [0], [1], [0, 0, 1, 1], [], []>} : vector<256x8xbf16>, vector<8x128xbf16>, vector<256x128xf32> -> vector<256x128xf32>
    %86 = arith.addf %82, %85 : vector<256x128xf32>
    %c0_99 = arith.constant 0 : index
    %c0_100 = arith.constant 0 : index
    %87 = vector.load %arg8[%c0_99, %c0_100] : memref<256x128xf32, #tpu.memory_space<vmem>>, vector<256x128xf32>
    tpu.vector_store %arg8[%c0_99, %c0_100], %86 {strides = array<i32>} : memref<256x128xf32, #tpu.memory_space<vmem>>, vector<256x128xf32>,
    %c0_101 = arith.constant 0 : index
    %c2_102 = arith.constant 2 : index
    %c2_103 = arith.constant 2 : index
    %c0_104 = arith.constant 0 : index
    %88 = vector.load %arg1[%c0_101, %c2_102, %c2_103, %c0_104] : memref<1x18x24x8xf32, #tpu.memory_space<vmem>>, vector<1x16x16x8xf32>
    %89 = vector.shape_cast %88 : vector<1x16x16x8xf32> to vector<16x16x8xf32>
    %90 = vector.shape_cast %89 : vector<16x16x8xf32> to vector<256x8xf32>
    %91 = arith.truncf %90 : vector<256x8xf32> to vector<256x8xbf16>
    %c0_105 = arith.constant 0 : index
    %c0_106 = arith.constant 0 : index
    %92 = vector.load %arg8[%c0_105, %c0_106] : memref<256x128xf32, #tpu.memory_space<vmem>>, vector<256x128xf32>
    %c8 = arith.constant 8 : index
    %c0_107 = arith.constant 0 : index
    %c0_108 = arith.constant 0 : index
    %93 = vector.load %arg2[%c8, %c0_107, %c0_108] : memref<9x8x128xbf16, #tpu.memory_space<vmem>>, vector<1x8x128xbf16>
    %94 = vector.shape_cast %93 : vector<1x8x128xbf16> to vector<8x128xbf16>
    %cst_109 = arith.constant dense<0.000000e+00> : vector<256x128xf32>
    %95 = tpu.matmul %91, %94, %cst_109 {dimension_numbers = #tpu.dot_dimension_numbers<[1], [0], [0], [1], [0, 0, 1, 1], [], []>} : vector<256x8xbf16>, vector<8x128xbf16>, vector<256x128xf32> -> vector<256x128xf32>
    %96 = arith.addf %92, %95 : vector<256x128xf32>
    %c0_110 = arith.constant 0 : index
    %c0_111 = arith.constant 0 : index
    %97 = vector.load %arg8[%c0_110, %c0_111] : memref<256x128xf32, #tpu.memory_space<vmem>>, vector<256x128xf32>
    tpu.vector_store %arg8[%c0_110, %c0_111], %96 {strides = array<i32>} : memref<256x128xf32, #tpu.memory_space<vmem>>, vector<256x128xf32>,
    %c0_112 = arith.constant 0 : index
    %c0_113 = arith.constant 0 : index
    %98 = vector.load %arg8[%c0_112, %c0_113] : memref<256x128xf32, #tpu.memory_space<vmem>>, vector<256x128xf32>
    %99 = vector.broadcast %5 : vector<1x128xf32> to vector<256x128xf32>
    %100 = arith.addf %98, %99 : vector<256x128xf32>
    %cst_114 = arith.constant 0.000000e+00 : f32
    %101 = vector.broadcast %cst_114 : f32 to vector<256x128xf32>
    %102 = arith.maximumf %100, %101 : vector<256x128xf32>
    %103 = vector.shape_cast %102 : vector<256x128xf32> to vector<16x16x128xf32>
    %c1_115 = arith.constant 1 : index
    %c1_116 = arith.constant 1 : index
    %c0_117 = arith.constant 0 : index
    %104 = vector.load %arg6[%c1_115, %c1_116, %c0_117] : memref<18x24x128xf32, #tpu.memory_space<vmem>>, vector<16x16x128xf32>
    tpu.vector_store %arg6[%c1_115, %c1_116, %c0_117], %103 {strides = array<i32>} : memref<18x24x128xf32, #tpu.memory_space<vmem>>, vector<16x16x128xf32>,
    %c1_118 = arith.constant 1 : index
    %c0_119 = arith.constant 0 : index
    %c0_120 = arith.constant 0 : index
    %105 = vector.load %arg4[%c1_118, %c0_119, %c0_120] : memref<4x1x128xf32, #tpu.memory_space<vmem>>, vector<1x1x128xf32>
    %106 = vector.shape_cast %105 : vector<1x1x128xf32> to vector<1x128xf32>
    %cst_121 = arith.constant 0.000000e+00 : f32
    %107 = vector.broadcast %cst_121 : f32 to vector<256x128xf32>
    %c0_122 = arith.constant 0 : index
    %c0_123 = arith.constant 0 : index
    %108 = vector.load %arg8[%c0_122, %c0_123] : memref<256x128xf32, #tpu.memory_space<vmem>>, vector<256x128xf32>
    tpu.vector_store %arg8[%c0_122, %c0_123], %107 {strides = array<i32>} : memref<256x128xf32, #tpu.memory_space<vmem>>, vector<256x128xf32>,
    %c0_124 = arith.constant 0 : index
    %c0_125 = arith.constant 0 : index
    %c0_126 = arith.constant 0 : index
    %109 = vector.load %arg6[%c0_124, %c0_125, %c0_126] : memref<18x24x128xf32, #tpu.memory_space<vmem>>, vector<16x16x128xf32>
    %110 = vector.shape_cast %109 : vector<16x16x128xf32> to vector<256x128xf32>
    %111 = arith.truncf %110 : vector<256x128xf32> to vector<256x128xbf16>
    %c0_127 = arith.constant 0 : index
    %c0_128 = arith.constant 0 : index
    %112 = vector.load %arg8[%c0_127, %c0_128] : memref<256x128xf32, #tpu.memory_space<vmem>>, vector<256x128xf32>
    %c0_129 = arith.constant 0 : index
    %c0_130 = arith.constant 0 : index
    %c0_131 = arith.constant 0 : index
    %c0_132 = arith.constant 0 : index
    %113 = vector.load %arg3[%c0_129, %c0_130, %c0_131, %c0_132] : memref<3x9x128x128xbf16, #tpu.memory_space<vmem>>, vector<1x1x128x128xbf16>
    %114 = vector.shape_cast %113 : vector<1x1x128x128xbf16> to vector<128x128xbf16>
    %cst_133 = arith.constant dense<0.000000e+00> : vector<256x128xf32>
    %115 = tpu.matmul %111, %114, %cst_133 {dimension_numbers = #tpu.dot_dimension_numbers<[1], [0], [0], [1], [0, 0, 1, 1], [], []>} : vector<256x128xbf16>, vector<128x128xbf16>, vector<256x128xf32> -> vector<256x128xf32>
    %116 = arith.addf %112, %115 : vector<256x128xf32>
    %c0_134 = arith.constant 0 : index
    %c0_135 = arith.constant 0 : index
    %117 = vector.load %arg8[%c0_134, %c0_135] : memref<256x128xf32, #tpu.memory_space<vmem>>, vector<256x128xf32>
    tpu.vector_store %arg8[%c0_134, %c0_135], %116 {strides = array<i32>} : memref<256x128xf32, #tpu.memory_space<vmem>>, vector<256x128xf32>,
    %c0_136 = arith.constant 0 : index
    %c1_137 = arith.constant 1 : index
    %c0_138 = arith.constant 0 : index
    %118 = vector.load %arg6[%c0_136, %c1_137, %c0_138] : memref<18x24x128xf32, #tpu.memory_space<vmem>>, vector<16x16x128xf32>
    %119 = vector.shape_cast %118 : vector<16x16x128xf32> to vector<256x128xf32>
    %120 = arith.truncf %119 : vector<256x128xf32> to vector<256x128xbf16>
    %c0_139 = arith.constant 0 : index
    %c0_140 = arith.constant 0 : index
    %121 = vector.load %arg8[%c0_139, %c0_140] : memref<256x128xf32, #tpu.memory_space<vmem>>, vector<256x128xf32>
    %c0_141 = arith.constant 0 : index
    %c1_142 = arith.constant 1 : index
    %c0_143 = arith.constant 0 : index
    %c0_144 = arith.constant 0 : index
    %122 = vector.load %arg3[%c0_141, %c1_142, %c0_143, %c0_144] : memref<3x9x128x128xbf16, #tpu.memory_space<vmem>>, vector<1x1x128x128xbf16>
    %123 = vector.shape_cast %122 : vector<1x1x128x128xbf16> to vector<128x128xbf16>
    %cst_145 = arith.constant dense<0.000000e+00> : vector<256x128xf32>
    %124 = tpu.matmul %120, %123, %cst_145 {dimension_numbers = #tpu.dot_dimension_numbers<[1], [0], [0], [1], [0, 0, 1, 1], [], []>} : vector<256x128xbf16>, vector<128x128xbf16>, vector<256x128xf32> -> vector<256x128xf32>
    %125 = arith.addf %121, %124 : vector<256x128xf32>
    %c0_146 = arith.constant 0 : index
    %c0_147 = arith.constant 0 : index
    %126 = vector.load %arg8[%c0_146, %c0_147] : memref<256x128xf32, #tpu.memory_space<vmem>>, vector<256x128xf32>
    tpu.vector_store %arg8[%c0_146, %c0_147], %125 {strides = array<i32>} : memref<256x128xf32, #tpu.memory_space<vmem>>, vector<256x128xf32>,
    %c0_148 = arith.constant 0 : index
    %c2_149 = arith.constant 2 : index
    %c0_150 = arith.constant 0 : index
    %127 = vector.load %arg6[%c0_148, %c2_149, %c0_150] : memref<18x24x128xf32, #tpu.memory_space<vmem>>, vector<16x16x128xf32>
    %128 = vector.shape_cast %127 : vector<16x16x128xf32> to vector<256x128xf32>
    %129 = arith.truncf %128 : vector<256x128xf32> to vector<256x128xbf16>
    %c0_151 = arith.constant 0 : index
    %c0_152 = arith.constant 0 : index
    %130 = vector.load %arg8[%c0_151, %c0_152] : memref<256x128xf32, #tpu.memory_space<vmem>>, vector<256x128xf32>
    %c0_153 = arith.constant 0 : index
    %c2_154 = arith.constant 2 : index
    %c0_155 = arith.constant 0 : index
    %c0_156 = arith.constant 0 : index
    %131 = vector.load %arg3[%c0_153, %c2_154, %c0_155, %c0_156] : memref<3x9x128x128xbf16, #tpu.memory_space<vmem>>, vector<1x1x128x128xbf16>
    %132 = vector.shape_cast %131 : vector<1x1x128x128xbf16> to vector<128x128xbf16>
    %cst_157 = arith.constant dense<0.000000e+00> : vector<256x128xf32>
    %133 = tpu.matmul %129, %132, %cst_157 {dimension_numbers = #tpu.dot_dimension_numbers<[1], [0], [0], [1], [0, 0, 1, 1], [], []>} : vector<256x128xbf16>, vector<128x128xbf16>, vector<256x128xf32> -> vector<256x128xf32>
    %134 = arith.addf %130, %133 : vector<256x128xf32>
    %c0_158 = arith.constant 0 : index
    %c0_159 = arith.constant 0 : index
    %135 = vector.load %arg8[%c0_158, %c0_159] : memref<256x128xf32, #tpu.memory_space<vmem>>, vector<256x128xf32>
    tpu.vector_store %arg8[%c0_158, %c0_159], %134 {strides = array<i32>} : memref<256x128xf32, #tpu.memory_space<vmem>>, vector<256x128xf32>,
    %c1_160 = arith.constant 1 : index
    %c0_161 = arith.constant 0 : index
    %c0_162 = arith.constant 0 : index
    %136 = vector.load %arg6[%c1_160, %c0_161, %c0_162] : memref<18x24x128xf32, #tpu.memory_space<vmem>>, vector<16x16x128xf32>
    %137 = vector.shape_cast %136 : vector<16x16x128xf32> to vector<256x128xf32>
    %138 = arith.truncf %137 : vector<256x128xf32> to vector<256x128xbf16>
    %c0_163 = arith.constant 0 : index
    %c0_164 = arith.constant 0 : index
    %139 = vector.load %arg8[%c0_163, %c0_164] : memref<256x128xf32, #tpu.memory_space<vmem>>, vector<256x128xf32>
    %c0_165 = arith.constant 0 : index
    %c3_166 = arith.constant 3 : index
    %c0_167 = arith.constant 0 : index
    %c0_168 = arith.constant 0 : index
    %140 = vector.load %arg3[%c0_165, %c3_166, %c0_167, %c0_168] : memref<3x9x128x128xbf16, #tpu.memory_space<vmem>>, vector<1x1x128x128xbf16>
    %141 = vector.shape_cast %140 : vector<1x1x128x128xbf16> to vector<128x128xbf16>
    %cst_169 = arith.constant dense<0.000000e+00> : vector<256x128xf32>
    %142 = tpu.matmul %138, %141, %cst_169 {dimension_numbers = #tpu.dot_dimension_numbers<[1], [0], [0], [1], [0, 0, 1, 1], [], []>} : vector<256x128xbf16>, vector<128x128xbf16>, vector<256x128xf32> -> vector<256x128xf32>
    %143 = arith.addf %139, %142 : vector<256x128xf32>
    %c0_170 = arith.constant 0 : index
    %c0_171 = arith.constant 0 : index
    %144 = vector.load %arg8[%c0_170, %c0_171] : memref<256x128xf32, #tpu.memory_space<vmem>>, vector<256x128xf32>
    tpu.vector_store %arg8[%c0_170, %c0_171], %143 {strides = array<i32>} : memref<256x128xf32, #tpu.memory_space<vmem>>, vector<256x128xf32>,
    %c1_172 = arith.constant 1 : index
    %c1_173 = arith.constant 1 : index
    %c0_174 = arith.constant 0 : index
    %145 = vector.load %arg6[%c1_172, %c1_173, %c0_174] : memref<18x24x128xf32, #tpu.memory_space<vmem>>, vector<16x16x128xf32>
    %146 = vector.shape_cast %145 : vector<16x16x128xf32> to vector<256x128xf32>
    %147 = arith.truncf %146 : vector<256x128xf32> to vector<256x128xbf16>
    %c0_175 = arith.constant 0 : index
    %c0_176 = arith.constant 0 : index
    %148 = vector.load %arg8[%c0_175, %c0_176] : memref<256x128xf32, #tpu.memory_space<vmem>>, vector<256x128xf32>
    %c0_177 = arith.constant 0 : index
    %c4_178 = arith.constant 4 : index
    %c0_179 = arith.constant 0 : index
    %c0_180 = arith.constant 0 : index
    %149 = vector.load %arg3[%c0_177, %c4_178, %c0_179, %c0_180] : memref<3x9x128x128xbf16, #tpu.memory_space<vmem>>, vector<1x1x128x128xbf16>
    %150 = vector.shape_cast %149 : vector<1x1x128x128xbf16> to vector<128x128xbf16>
    %cst_181 = arith.constant dense<0.000000e+00> : vector<256x128xf32>
    %151 = tpu.matmul %147, %150, %cst_181 {dimension_numbers = #tpu.dot_dimension_numbers<[1], [0], [0], [1], [0, 0, 1, 1], [], []>} : vector<256x128xbf16>, vector<128x128xbf16>, vector<256x128xf32> -> vector<256x128xf32>
    %152 = arith.addf %148, %151 : vector<256x128xf32>
    %c0_182 = arith.constant 0 : index
    %c0_183 = arith.constant 0 : index
    %153 = vector.load %arg8[%c0_182, %c0_183] : memref<256x128xf32, #tpu.memory_space<vmem>>, vector<256x128xf32>
    tpu.vector_store %arg8[%c0_182, %c0_183], %152 {strides = array<i32>} : memref<256x128xf32, #tpu.memory_space<vmem>>, vector<256x128xf32>,
    %c1_184 = arith.constant 1 : index
    %c2_185 = arith.constant 2 : index
    %c0_186 = arith.constant 0 : index
    %154 = vector.load %arg6[%c1_184, %c2_185, %c0_186] : memref<18x24x128xf32, #tpu.memory_space<vmem>>, vector<16x16x128xf32>
    %155 = vector.shape_cast %154 : vector<16x16x128xf32> to vector<256x128xf32>
    %156 = arith.truncf %155 : vector<256x128xf32> to vector<256x128xbf16>
    %c0_187 = arith.constant 0 : index
    %c0_188 = arith.constant 0 : index
    %157 = vector.load %arg8[%c0_187, %c0_188] : memref<256x128xf32, #tpu.memory_space<vmem>>, vector<256x128xf32>
    %c0_189 = arith.constant 0 : index
    %c5_190 = arith.constant 5 : index
    %c0_191 = arith.constant 0 : index
    %c0_192 = arith.constant 0 : index
    %158 = vector.load %arg3[%c0_189, %c5_190, %c0_191, %c0_192] : memref<3x9x128x128xbf16, #tpu.memory_space<vmem>>, vector<1x1x128x128xbf16>
    %159 = vector.shape_cast %158 : vector<1x1x128x128xbf16> to vector<128x128xbf16>
    %cst_193 = arith.constant dense<0.000000e+00> : vector<256x128xf32>
    %160 = tpu.matmul %156, %159, %cst_193 {dimension_numbers = #tpu.dot_dimension_numbers<[1], [0], [0], [1], [0, 0, 1, 1], [], []>} : vector<256x128xbf16>, vector<128x128xbf16>, vector<256x128xf32> -> vector<256x128xf32>
    %161 = arith.addf %157, %160 : vector<256x128xf32>
    %c0_194 = arith.constant 0 : index
    %c0_195 = arith.constant 0 : index
    %162 = vector.load %arg8[%c0_194, %c0_195] : memref<256x128xf32, #tpu.memory_space<vmem>>, vector<256x128xf32>
    tpu.vector_store %arg8[%c0_194, %c0_195], %161 {strides = array<i32>} : memref<256x128xf32, #tpu.memory_space<vmem>>, vector<256x128xf32>,
    %c2_196 = arith.constant 2 : index
    %c0_197 = arith.constant 0 : index
    %c0_198 = arith.constant 0 : index
    %163 = vector.load %arg6[%c2_196, %c0_197, %c0_198] : memref<18x24x128xf32, #tpu.memory_space<vmem>>, vector<16x16x128xf32>
    %164 = vector.shape_cast %163 : vector<16x16x128xf32> to vector<256x128xf32>
    %165 = arith.truncf %164 : vector<256x128xf32> to vector<256x128xbf16>
    %c0_199 = arith.constant 0 : index
    %c0_200 = arith.constant 0 : index
    %166 = vector.load %arg8[%c0_199, %c0_200] : memref<256x128xf32, #tpu.memory_space<vmem>>, vector<256x128xf32>
    %c0_201 = arith.constant 0 : index
    %c6_202 = arith.constant 6 : index
    %c0_203 = arith.constant 0 : index
    %c0_204 = arith.constant 0 : index
    %167 = vector.load %arg3[%c0_201, %c6_202, %c0_203, %c0_204] : memref<3x9x128x128xbf16, #tpu.memory_space<vmem>>, vector<1x1x128x128xbf16>
    %168 = vector.shape_cast %167 : vector<1x1x128x128xbf16> to vector<128x128xbf16>
    %cst_205 = arith.constant dense<0.000000e+00> : vector<256x128xf32>
    %169 = tpu.matmul %165, %168, %cst_205 {dimension_numbers = #tpu.dot_dimension_numbers<[1], [0], [0], [1], [0, 0, 1, 1], [], []>} : vector<256x128xbf16>, vector<128x128xbf16>, vector<256x128xf32> -> vector<256x128xf32>
    %170 = arith.addf %166, %169 : vector<256x128xf32>
    %c0_206 = arith.constant 0 : index
    %c0_207 = arith.constant 0 : index
    %171 = vector.load %arg8[%c0_206, %c0_207] : memref<256x128xf32, #tpu.memory_space<vmem>>, vector<256x128xf32>
    tpu.vector_store %arg8[%c0_206, %c0_207], %170 {strides = array<i32>} : memref<256x128xf32, #tpu.memory_space<vmem>>, vector<256x128xf32>,
    %c2_208 = arith.constant 2 : index
    %c1_209 = arith.constant 1 : index
    %c0_210 = arith.constant 0 : index
    %172 = vector.load %arg6[%c2_208, %c1_209, %c0_210] : memref<18x24x128xf32, #tpu.memory_space<vmem>>, vector<16x16x128xf32>
    %173 = vector.shape_cast %172 : vector<16x16x128xf32> to vector<256x128xf32>
    %174 = arith.truncf %173 : vector<256x128xf32> to vector<256x128xbf16>
    %c0_211 = arith.constant 0 : index
    %c0_212 = arith.constant 0 : index
    %175 = vector.load %arg8[%c0_211, %c0_212] : memref<256x128xf32, #tpu.memory_space<vmem>>, vector<256x128xf32>
    %c0_213 = arith.constant 0 : index
    %c7_214 = arith.constant 7 : index
    %c0_215 = arith.constant 0 : index
    %c0_216 = arith.constant 0 : index
    %176 = vector.load %arg3[%c0_213, %c7_214, %c0_215, %c0_216] : memref<3x9x128x128xbf16, #tpu.memory_space<vmem>>, vector<1x1x128x128xbf16>
    %177 = vector.shape_cast %176 : vector<1x1x128x128xbf16> to vector<128x128xbf16>
    %cst_217 = arith.constant dense<0.000000e+00> : vector<256x128xf32>
    %178 = tpu.matmul %174, %177, %cst_217 {dimension_numbers = #tpu.dot_dimension_numbers<[1], [0], [0], [1], [0, 0, 1, 1], [], []>} : vector<256x128xbf16>, vector<128x128xbf16>, vector<256x128xf32> -> vector<256x128xf32>
    %179 = arith.addf %175, %178 : vector<256x128xf32>
    %c0_218 = arith.constant 0 : index
    %c0_219 = arith.constant 0 : index
    %180 = vector.load %arg8[%c0_218, %c0_219] : memref<256x128xf32, #tpu.memory_space<vmem>>, vector<256x128xf32>
    tpu.vector_store %arg8[%c0_218, %c0_219], %179 {strides = array<i32>} : memref<256x128xf32, #tpu.memory_space<vmem>>, vector<256x128xf32>,
    %c2_220 = arith.constant 2 : index
    %c2_221 = arith.constant 2 : index
    %c0_222 = arith.constant 0 : index
    %181 = vector.load %arg6[%c2_220, %c2_221, %c0_222] : memref<18x24x128xf32, #tpu.memory_space<vmem>>, vector<16x16x128xf32>
    %182 = vector.shape_cast %181 : vector<16x16x128xf32> to vector<256x128xf32>
    %183 = arith.truncf %182 : vector<256x128xf32> to vector<256x128xbf16>
    %c0_223 = arith.constant 0 : index
    %c0_224 = arith.constant 0 : index
    %184 = vector.load %arg8[%c0_223, %c0_224] : memref<256x128xf32, #tpu.memory_space<vmem>>, vector<256x128xf32>
    %c0_225 = arith.constant 0 : index
    %c8_226 = arith.constant 8 : index
    %c0_227 = arith.constant 0 : index
    %c0_228 = arith.constant 0 : index
    %185 = vector.load %arg3[%c0_225, %c8_226, %c0_227, %c0_228] : memref<3x9x128x128xbf16, #tpu.memory_space<vmem>>, vector<1x1x128x128xbf16>
    %186 = vector.shape_cast %185 : vector<1x1x128x128xbf16> to vector<128x128xbf16>
    %cst_229 = arith.constant dense<0.000000e+00> : vector<256x128xf32>
    %187 = tpu.matmul %183, %186, %cst_229 {dimension_numbers = #tpu.dot_dimension_numbers<[1], [0], [0], [1], [0, 0, 1, 1], [], []>} : vector<256x128xbf16>, vector<128x128xbf16>, vector<256x128xf32> -> vector<256x128xf32>
    %188 = arith.addf %184, %187 : vector<256x128xf32>
    %c0_230 = arith.constant 0 : index
    %c0_231 = arith.constant 0 : index
    %189 = vector.load %arg8[%c0_230, %c0_231] : memref<256x128xf32, #tpu.memory_space<vmem>>, vector<256x128xf32>
    tpu.vector_store %arg8[%c0_230, %c0_231], %188 {strides = array<i32>} : memref<256x128xf32, #tpu.memory_space<vmem>>, vector<256x128xf32>,
    %c0_232 = arith.constant 0 : index
    %c0_233 = arith.constant 0 : index
    %190 = vector.load %arg8[%c0_232, %c0_233] : memref<256x128xf32, #tpu.memory_space<vmem>>, vector<256x128xf32>
    %191 = vector.broadcast %106 : vector<1x128xf32> to vector<256x128xf32>
    %192 = arith.addf %190, %191 : vector<256x128xf32>
    %cst_234 = arith.constant 0.000000e+00 : f32
    %193 = vector.broadcast %cst_234 : f32 to vector<256x128xf32>
    %194 = arith.maximumf %192, %193 : vector<256x128xf32>
    %195 = vector.shape_cast %194 : vector<256x128xf32> to vector<16x16x128xf32>
    %c1_235 = arith.constant 1 : index
    %c1_236 = arith.constant 1 : index
    %c0_237 = arith.constant 0 : index
    %196 = vector.load %arg7[%c1_235, %c1_236, %c0_237] : memref<18x24x128xf32, #tpu.memory_space<vmem>>, vector<16x16x128xf32>
    tpu.vector_store %arg7[%c1_235, %c1_236, %c0_237], %195 {strides = array<i32>} : memref<18x24x128xf32, #tpu.memory_space<vmem>>, vector<16x16x128xf32>,
    %c2_238 = arith.constant 2 : index
    %c0_239 = arith.constant 0 : index
    %c0_240 = arith.constant 0 : index
    %197 = vector.load %arg4[%c2_238, %c0_239, %c0_240] : memref<4x1x128xf32, #tpu.memory_space<vmem>>, vector<1x1x128xf32>
    %198 = vector.shape_cast %197 : vector<1x1x128xf32> to vector<1x128xf32>
    %cst_241 = arith.constant 0.000000e+00 : f32
    %199 = vector.broadcast %cst_241 : f32 to vector<256x128xf32>
    %c0_242 = arith.constant 0 : index
    %c0_243 = arith.constant 0 : index
    %200 = vector.load %arg8[%c0_242, %c0_243] : memref<256x128xf32, #tpu.memory_space<vmem>>, vector<256x128xf32>
    tpu.vector_store %arg8[%c0_242, %c0_243], %199 {strides = array<i32>} : memref<256x128xf32, #tpu.memory_space<vmem>>, vector<256x128xf32>,
    %c0_244 = arith.constant 0 : index
    %c0_245 = arith.constant 0 : index
    %c0_246 = arith.constant 0 : index
    %201 = vector.load %arg7[%c0_244, %c0_245, %c0_246] : memref<18x24x128xf32, #tpu.memory_space<vmem>>, vector<16x16x128xf32>
    %202 = vector.shape_cast %201 : vector<16x16x128xf32> to vector<256x128xf32>
    %203 = arith.truncf %202 : vector<256x128xf32> to vector<256x128xbf16>
    %c0_247 = arith.constant 0 : index
    %c0_248 = arith.constant 0 : index
    %204 = vector.load %arg8[%c0_247, %c0_248] : memref<256x128xf32, #tpu.memory_space<vmem>>, vector<256x128xf32>
    %c1_249 = arith.constant 1 : index
    %c0_250 = arith.constant 0 : index
    %c0_251 = arith.constant 0 : index
    %c0_252 = arith.constant 0 : index
    %205 = vector.load %arg3[%c1_249, %c0_250, %c0_251, %c0_252] : memref<3x9x128x128xbf16, #tpu.memory_space<vmem>>, vector<1x1x128x128xbf16>
    %206 = vector.shape_cast %205 : vector<1x1x128x128xbf16> to vector<128x128xbf16>
    %cst_253 = arith.constant dense<0.000000e+00> : vector<256x128xf32>
    %207 = tpu.matmul %203, %206, %cst_253 {dimension_numbers = #tpu.dot_dimension_numbers<[1], [0], [0], [1], [0, 0, 1, 1], [], []>} : vector<256x128xbf16>, vector<128x128xbf16>, vector<256x128xf32> -> vector<256x128xf32>
    %208 = arith.addf %204, %207 : vector<256x128xf32>
    %c0_254 = arith.constant 0 : index
    %c0_255 = arith.constant 0 : index
    %209 = vector.load %arg8[%c0_254, %c0_255] : memref<256x128xf32, #tpu.memory_space<vmem>>, vector<256x128xf32>
    tpu.vector_store %arg8[%c0_254, %c0_255], %208 {strides = array<i32>} : memref<256x128xf32, #tpu.memory_space<vmem>>, vector<256x128xf32>,
    %c0_256 = arith.constant 0 : index
    %c1_257 = arith.constant 1 : index
    %c0_258 = arith.constant 0 : index
    %210 = vector.load %arg7[%c0_256, %c1_257, %c0_258] : memref<18x24x128xf32, #tpu.memory_space<vmem>>, vector<16x16x128xf32>
    %211 = vector.shape_cast %210 : vector<16x16x128xf32> to vector<256x128xf32>
    %212 = arith.truncf %211 : vector<256x128xf32> to vector<256x128xbf16>
    %c0_259 = arith.constant 0 : index
    %c0_260 = arith.constant 0 : index
    %213 = vector.load %arg8[%c0_259, %c0_260] : memref<256x128xf32, #tpu.memory_space<vmem>>, vector<256x128xf32>
    %c1_261 = arith.constant 1 : index
    %c1_262 = arith.constant 1 : index
    %c0_263 = arith.constant 0 : index
    %c0_264 = arith.constant 0 : index
    %214 = vector.load %arg3[%c1_261, %c1_262, %c0_263, %c0_264] : memref<3x9x128x128xbf16, #tpu.memory_space<vmem>>, vector<1x1x128x128xbf16>
    %215 = vector.shape_cast %214 : vector<1x1x128x128xbf16> to vector<128x128xbf16>
    %cst_265 = arith.constant dense<0.000000e+00> : vector<256x128xf32>
    %216 = tpu.matmul %212, %215, %cst_265 {dimension_numbers = #tpu.dot_dimension_numbers<[1], [0], [0], [1], [0, 0, 1, 1], [], []>} : vector<256x128xbf16>, vector<128x128xbf16>, vector<256x128xf32> -> vector<256x128xf32>
    %217 = arith.addf %213, %216 : vector<256x128xf32>
    %c0_266 = arith.constant 0 : index
    %c0_267 = arith.constant 0 : index
    %218 = vector.load %arg8[%c0_266, %c0_267] : memref<256x128xf32, #tpu.memory_space<vmem>>, vector<256x128xf32>
    tpu.vector_store %arg8[%c0_266, %c0_267], %217 {strides = array<i32>} : memref<256x128xf32, #tpu.memory_space<vmem>>, vector<256x128xf32>,
    %c0_268 = arith.constant 0 : index
    %c2_269 = arith.constant 2 : index
    %c0_270 = arith.constant 0 : index
    %219 = vector.load %arg7[%c0_268, %c2_269, %c0_270] : memref<18x24x128xf32, #tpu.memory_space<vmem>>, vector<16x16x128xf32>
    %220 = vector.shape_cast %219 : vector<16x16x128xf32> to vector<256x128xf32>
    %221 = arith.truncf %220 : vector<256x128xf32> to vector<256x128xbf16>
    %c0_271 = arith.constant 0 : index
    %c0_272 = arith.constant 0 : index
    %222 = vector.load %arg8[%c0_271, %c0_272] : memref<256x128xf32, #tpu.memory_space<vmem>>, vector<256x128xf32>
    %c1_273 = arith.constant 1 : index
    %c2_274 = arith.constant 2 : index
    %c0_275 = arith.constant 0 : index
    %c0_276 = arith.constant 0 : index
    %223 = vector.load %arg3[%c1_273, %c2_274, %c0_275, %c0_276] : memref<3x9x128x128xbf16, #tpu.memory_space<vmem>>, vector<1x1x128x128xbf16>
    %224 = vector.shape_cast %223 : vector<1x1x128x128xbf16> to vector<128x128xbf16>
    %cst_277 = arith.constant dense<0.000000e+00> : vector<256x128xf32>
    %225 = tpu.matmul %221, %224, %cst_277 {dimension_numbers = #tpu.dot_dimension_numbers<[1], [0], [0], [1], [0, 0, 1, 1], [], []>} : vector<256x128xbf16>, vector<128x128xbf16>, vector<256x128xf32> -> vector<256x128xf32>
    %226 = arith.addf %222, %225 : vector<256x128xf32>
    %c0_278 = arith.constant 0 : index
    %c0_279 = arith.constant 0 : index
    %227 = vector.load %arg8[%c0_278, %c0_279] : memref<256x128xf32, #tpu.memory_space<vmem>>, vector<256x128xf32>
    tpu.vector_store %arg8[%c0_278, %c0_279], %226 {strides = array<i32>} : memref<256x128xf32, #tpu.memory_space<vmem>>, vector<256x128xf32>,
    %c1_280 = arith.constant 1 : index
    %c0_281 = arith.constant 0 : index
    %c0_282 = arith.constant 0 : index
    %228 = vector.load %arg7[%c1_280, %c0_281, %c0_282] : memref<18x24x128xf32, #tpu.memory_space<vmem>>, vector<16x16x128xf32>
    %229 = vector.shape_cast %228 : vector<16x16x128xf32> to vector<256x128xf32>
    %230 = arith.truncf %229 : vector<256x128xf32> to vector<256x128xbf16>
    %c0_283 = arith.constant 0 : index
    %c0_284 = arith.constant 0 : index
    %231 = vector.load %arg8[%c0_283, %c0_284] : memref<256x128xf32, #tpu.memory_space<vmem>>, vector<256x128xf32>
    %c1_285 = arith.constant 1 : index
    %c3_286 = arith.constant 3 : index
    %c0_287 = arith.constant 0 : index
    %c0_288 = arith.constant 0 : index
    %232 = vector.load %arg3[%c1_285, %c3_286, %c0_287, %c0_288] : memref<3x9x128x128xbf16, #tpu.memory_space<vmem>>, vector<1x1x128x128xbf16>
    %233 = vector.shape_cast %232 : vector<1x1x128x128xbf16> to vector<128x128xbf16>
    %cst_289 = arith.constant dense<0.000000e+00> : vector<256x128xf32>
    %234 = tpu.matmul %230, %233, %cst_289 {dimension_numbers = #tpu.dot_dimension_numbers<[1], [0], [0], [1], [0, 0, 1, 1], [], []>} : vector<256x128xbf16>, vector<128x128xbf16>, vector<256x128xf32> -> vector<256x128xf32>
    %235 = arith.addf %231, %234 : vector<256x128xf32>
    %c0_290 = arith.constant 0 : index
    %c0_291 = arith.constant 0 : index
    %236 = vector.load %arg8[%c0_290, %c0_291] : memref<256x128xf32, #tpu.memory_space<vmem>>, vector<256x128xf32>
    tpu.vector_store %arg8[%c0_290, %c0_291], %235 {strides = array<i32>} : memref<256x128xf32, #tpu.memory_space<vmem>>, vector<256x128xf32>,
    %c1_292 = arith.constant 1 : index
    %c1_293 = arith.constant 1 : index
    %c0_294 = arith.constant 0 : index
    %237 = vector.load %arg7[%c1_292, %c1_293, %c0_294] : memref<18x24x128xf32, #tpu.memory_space<vmem>>, vector<16x16x128xf32>
    %238 = vector.shape_cast %237 : vector<16x16x128xf32> to vector<256x128xf32>
    %239 = arith.truncf %238 : vector<256x128xf32> to vector<256x128xbf16>
    %c0_295 = arith.constant 0 : index
    %c0_296 = arith.constant 0 : index
    %240 = vector.load %arg8[%c0_295, %c0_296] : memref<256x128xf32, #tpu.memory_space<vmem>>, vector<256x128xf32>
    %c1_297 = arith.constant 1 : index
    %c4_298 = arith.constant 4 : index
    %c0_299 = arith.constant 0 : index
    %c0_300 = arith.constant 0 : index
    %241 = vector.load %arg3[%c1_297, %c4_298, %c0_299, %c0_300] : memref<3x9x128x128xbf16, #tpu.memory_space<vmem>>, vector<1x1x128x128xbf16>
    %242 = vector.shape_cast %241 : vector<1x1x128x128xbf16> to vector<128x128xbf16>
    %cst_301 = arith.constant dense<0.000000e+00> : vector<256x128xf32>
    %243 = tpu.matmul %239, %242, %cst_301 {dimension_numbers = #tpu.dot_dimension_numbers<[1], [0], [0], [1], [0, 0, 1, 1], [], []>} : vector<256x128xbf16>, vector<128x128xbf16>, vector<256x128xf32> -> vector<256x128xf32>
    %244 = arith.addf %240, %243 : vector<256x128xf32>
    %c0_302 = arith.constant 0 : index
    %c0_303 = arith.constant 0 : index
    %245 = vector.load %arg8[%c0_302, %c0_303] : memref<256x128xf32, #tpu.memory_space<vmem>>, vector<256x128xf32>
    tpu.vector_store %arg8[%c0_302, %c0_303], %244 {strides = array<i32>} : memref<256x128xf32, #tpu.memory_space<vmem>>, vector<256x128xf32>,
    %c1_304 = arith.constant 1 : index
    %c2_305 = arith.constant 2 : index
    %c0_306 = arith.constant 0 : index
    %246 = vector.load %arg7[%c1_304, %c2_305, %c0_306] : memref<18x24x128xf32, #tpu.memory_space<vmem>>, vector<16x16x128xf32>
    %247 = vector.shape_cast %246 : vector<16x16x128xf32> to vector<256x128xf32>
    %248 = arith.truncf %247 : vector<256x128xf32> to vector<256x128xbf16>
    %c0_307 = arith.constant 0 : index
    %c0_308 = arith.constant 0 : index
    %249 = vector.load %arg8[%c0_307, %c0_308] : memref<256x128xf32, #tpu.memory_space<vmem>>, vector<256x128xf32>
    %c1_309 = arith.constant 1 : index
    %c5_310 = arith.constant 5 : index
    %c0_311 = arith.constant 0 : index
    %c0_312 = arith.constant 0 : index
    %250 = vector.load %arg3[%c1_309, %c5_310, %c0_311, %c0_312] : memref<3x9x128x128xbf16, #tpu.memory_space<vmem>>, vector<1x1x128x128xbf16>
    %251 = vector.shape_cast %250 : vector<1x1x128x128xbf16> to vector<128x128xbf16>
    %cst_313 = arith.constant dense<0.000000e+00> : vector<256x128xf32>
    %252 = tpu.matmul %248, %251, %cst_313 {dimension_numbers = #tpu.dot_dimension_numbers<[1], [0], [0], [1], [0, 0, 1, 1], [], []>} : vector<256x128xbf16>, vector<128x128xbf16>, vector<256x128xf32> -> vector<256x128xf32>
    %253 = arith.addf %249, %252 : vector<256x128xf32>
    %c0_314 = arith.constant 0 : index
    %c0_315 = arith.constant 0 : index
    %254 = vector.load %arg8[%c0_314, %c0_315] : memref<256x128xf32, #tpu.memory_space<vmem>>, vector<256x128xf32>
    tpu.vector_store %arg8[%c0_314, %c0_315], %253 {strides = array<i32>} : memref<256x128xf32, #tpu.memory_space<vmem>>, vector<256x128xf32>,
    %c2_316 = arith.constant 2 : index
    %c0_317 = arith.constant 0 : index
    %c0_318 = arith.constant 0 : index
    %255 = vector.load %arg7[%c2_316, %c0_317, %c0_318] : memref<18x24x128xf32, #tpu.memory_space<vmem>>, vector<16x16x128xf32>
    %256 = vector.shape_cast %255 : vector<16x16x128xf32> to vector<256x128xf32>
    %257 = arith.truncf %256 : vector<256x128xf32> to vector<256x128xbf16>
    %c0_319 = arith.constant 0 : index
    %c0_320 = arith.constant 0 : index
    %258 = vector.load %arg8[%c0_319, %c0_320] : memref<256x128xf32, #tpu.memory_space<vmem>>, vector<256x128xf32>
    %c1_321 = arith.constant 1 : index
    %c6_322 = arith.constant 6 : index
    %c0_323 = arith.constant 0 : index
    %c0_324 = arith.constant 0 : index
    %259 = vector.load %arg3[%c1_321, %c6_322, %c0_323, %c0_324] : memref<3x9x128x128xbf16, #tpu.memory_space<vmem>>, vector<1x1x128x128xbf16>
    %260 = vector.shape_cast %259 : vector<1x1x128x128xbf16> to vector<128x128xbf16>
    %cst_325 = arith.constant dense<0.000000e+00> : vector<256x128xf32>
    %261 = tpu.matmul %257, %260, %cst_325 {dimension_numbers = #tpu.dot_dimension_numbers<[1], [0], [0], [1], [0, 0, 1, 1], [], []>} : vector<256x128xbf16>, vector<128x128xbf16>, vector<256x128xf32> -> vector<256x128xf32>
    %262 = arith.addf %258, %261 : vector<256x128xf32>
    %c0_326 = arith.constant 0 : index
    %c0_327 = arith.constant 0 : index
    %263 = vector.load %arg8[%c0_326, %c0_327] : memref<256x128xf32, #tpu.memory_space<vmem>>, vector<256x128xf32>
    tpu.vector_store %arg8[%c0_326, %c0_327], %262 {strides = array<i32>} : memref<256x128xf32, #tpu.memory_space<vmem>>, vector<256x128xf32>,
    %c2_328 = arith.constant 2 : index
    %c1_329 = arith.constant 1 : index
    %c0_330 = arith.constant 0 : index
    %264 = vector.load %arg7[%c2_328, %c1_329, %c0_330] : memref<18x24x128xf32, #tpu.memory_space<vmem>>, vector<16x16x128xf32>
    %265 = vector.shape_cast %264 : vector<16x16x128xf32> to vector<256x128xf32>
    %266 = arith.truncf %265 : vector<256x128xf32> to vector<256x128xbf16>
    %c0_331 = arith.constant 0 : index
    %c0_332 = arith.constant 0 : index
    %267 = vector.load %arg8[%c0_331, %c0_332] : memref<256x128xf32, #tpu.memory_space<vmem>>, vector<256x128xf32>
    %c1_333 = arith.constant 1 : index
    %c7_334 = arith.constant 7 : index
    %c0_335 = arith.constant 0 : index
    %c0_336 = arith.constant 0 : index
    %268 = vector.load %arg3[%c1_333, %c7_334, %c0_335, %c0_336] : memref<3x9x128x128xbf16, #tpu.memory_space<vmem>>, vector<1x1x128x128xbf16>
    %269 = vector.shape_cast %268 : vector<1x1x128x128xbf16> to vector<128x128xbf16>
    %cst_337 = arith.constant dense<0.000000e+00> : vector<256x128xf32>
    %270 = tpu.matmul %266, %269, %cst_337 {dimension_numbers = #tpu.dot_dimension_numbers<[1], [0], [0], [1], [0, 0, 1, 1], [], []>} : vector<256x128xbf16>, vector<128x128xbf16>, vector<256x128xf32> -> vector<256x128xf32>
    %271 = arith.addf %267, %270 : vector<256x128xf32>
    %c0_338 = arith.constant 0 : index
    %c0_339 = arith.constant 0 : index
    %272 = vector.load %arg8[%c0_338, %c0_339] : memref<256x128xf32, #tpu.memory_space<vmem>>, vector<256x128xf32>
    tpu.vector_store %arg8[%c0_338, %c0_339], %271 {strides = array<i32>} : memref<256x128xf32, #tpu.memory_space<vmem>>, vector<256x128xf32>,
    %c2_340 = arith.constant 2 : index
    %c2_341 = arith.constant 2 : index
    %c0_342 = arith.constant 0 : index
    %273 = vector.load %arg7[%c2_340, %c2_341, %c0_342] : memref<18x24x128xf32, #tpu.memory_space<vmem>>, vector<16x16x128xf32>
    %274 = vector.shape_cast %273 : vector<16x16x128xf32> to vector<256x128xf32>
    %275 = arith.truncf %274 : vector<256x128xf32> to vector<256x128xbf16>
    %c0_343 = arith.constant 0 : index
    %c0_344 = arith.constant 0 : index
    %276 = vector.load %arg8[%c0_343, %c0_344] : memref<256x128xf32, #tpu.memory_space<vmem>>, vector<256x128xf32>
    %c1_345 = arith.constant 1 : index
    %c8_346 = arith.constant 8 : index
    %c0_347 = arith.constant 0 : index
    %c0_348 = arith.constant 0 : index
    %277 = vector.load %arg3[%c1_345, %c8_346, %c0_347, %c0_348] : memref<3x9x128x128xbf16, #tpu.memory_space<vmem>>, vector<1x1x128x128xbf16>
    %278 = vector.shape_cast %277 : vector<1x1x128x128xbf16> to vector<128x128xbf16>
    %cst_349 = arith.constant dense<0.000000e+00> : vector<256x128xf32>
    %279 = tpu.matmul %275, %278, %cst_349 {dimension_numbers = #tpu.dot_dimension_numbers<[1], [0], [0], [1], [0, 0, 1, 1], [], []>} : vector<256x128xbf16>, vector<128x128xbf16>, vector<256x128xf32> -> vector<256x128xf32>
    %280 = arith.addf %276, %279 : vector<256x128xf32>
    %c0_350 = arith.constant 0 : index
    %c0_351 = arith.constant 0 : index
    %281 = vector.load %arg8[%c0_350, %c0_351] : memref<256x128xf32, #tpu.memory_space<vmem>>, vector<256x128xf32>
    tpu.vector_store %arg8[%c0_350, %c0_351], %280 {strides = array<i32>} : memref<256x128xf32, #tpu.memory_space<vmem>>, vector<256x128xf32>,
    %c0_352 = arith.constant 0 : index
    %c0_353 = arith.constant 0 : index
    %282 = vector.load %arg8[%c0_352, %c0_353] : memref<256x128xf32, #tpu.memory_space<vmem>>, vector<256x128xf32>
    %283 = vector.broadcast %198 : vector<1x128xf32> to vector<256x128xf32>
    %284 = arith.addf %282, %283 : vector<256x128xf32>
    %cst_354 = arith.constant 0.000000e+00 : f32
    %285 = vector.broadcast %cst_354 : f32 to vector<256x128xf32>
    %286 = arith.maximumf %284, %285 : vector<256x128xf32>
    %287 = vector.shape_cast %286 : vector<256x128xf32> to vector<16x16x128xf32>
    %c1_355 = arith.constant 1 : index
    %c1_356 = arith.constant 1 : index
    %c0_357 = arith.constant 0 : index
    %288 = vector.load %arg6[%c1_355, %c1_356, %c0_357] : memref<18x24x128xf32, #tpu.memory_space<vmem>>, vector<16x16x128xf32>
    tpu.vector_store %arg6[%c1_355, %c1_356, %c0_357], %287 {strides = array<i32>} : memref<18x24x128xf32, #tpu.memory_space<vmem>>, vector<16x16x128xf32>,
    %c3_358 = arith.constant 3 : index
    %c0_359 = arith.constant 0 : index
    %c0_360 = arith.constant 0 : index
    %289 = vector.load %arg4[%c3_358, %c0_359, %c0_360] : memref<4x1x128xf32, #tpu.memory_space<vmem>>, vector<1x1x128xf32>
    %290 = vector.shape_cast %289 : vector<1x1x128xf32> to vector<1x128xf32>
    %cst_361 = arith.constant 0.000000e+00 : f32
    %291 = vector.broadcast %cst_361 : f32 to vector<256x128xf32>
    %c0_362 = arith.constant 0 : index
    %c0_363 = arith.constant 0 : index
    %292 = vector.load %arg8[%c0_362, %c0_363] : memref<256x128xf32, #tpu.memory_space<vmem>>, vector<256x128xf32>
    tpu.vector_store %arg8[%c0_362, %c0_363], %291 {strides = array<i32>} : memref<256x128xf32, #tpu.memory_space<vmem>>, vector<256x128xf32>,
    %c0_364 = arith.constant 0 : index
    %c0_365 = arith.constant 0 : index
    %c0_366 = arith.constant 0 : index
    %293 = vector.load %arg6[%c0_364, %c0_365, %c0_366] : memref<18x24x128xf32, #tpu.memory_space<vmem>>, vector<16x16x128xf32>
    %294 = vector.shape_cast %293 : vector<16x16x128xf32> to vector<256x128xf32>
    %295 = arith.truncf %294 : vector<256x128xf32> to vector<256x128xbf16>
    %c0_367 = arith.constant 0 : index
    %c0_368 = arith.constant 0 : index
    %296 = vector.load %arg8[%c0_367, %c0_368] : memref<256x128xf32, #tpu.memory_space<vmem>>, vector<256x128xf32>
    %c2_369 = arith.constant 2 : index
    %c0_370 = arith.constant 0 : index
    %c0_371 = arith.constant 0 : index
    %c0_372 = arith.constant 0 : index
    %297 = vector.load %arg3[%c2_369, %c0_370, %c0_371, %c0_372] : memref<3x9x128x128xbf16, #tpu.memory_space<vmem>>, vector<1x1x128x128xbf16>
    %298 = vector.shape_cast %297 : vector<1x1x128x128xbf16> to vector<128x128xbf16>
    %cst_373 = arith.constant dense<0.000000e+00> : vector<256x128xf32>
    %299 = tpu.matmul %295, %298, %cst_373 {dimension_numbers = #tpu.dot_dimension_numbers<[1], [0], [0], [1], [0, 0, 1, 1], [], []>} : vector<256x128xbf16>, vector<128x128xbf16>, vector<256x128xf32> -> vector<256x128xf32>
    %300 = arith.addf %296, %299 : vector<256x128xf32>
    %c0_374 = arith.constant 0 : index
    %c0_375 = arith.constant 0 : index
    %301 = vector.load %arg8[%c0_374, %c0_375] : memref<256x128xf32, #tpu.memory_space<vmem>>, vector<256x128xf32>
    tpu.vector_store %arg8[%c0_374, %c0_375], %300 {strides = array<i32>} : memref<256x128xf32, #tpu.memory_space<vmem>>, vector<256x128xf32>,
    %c0_376 = arith.constant 0 : index
    %c1_377 = arith.constant 1 : index
    %c0_378 = arith.constant 0 : index
    %302 = vector.load %arg6[%c0_376, %c1_377, %c0_378] : memref<18x24x128xf32, #tpu.memory_space<vmem>>, vector<16x16x128xf32>
    %303 = vector.shape_cast %302 : vector<16x16x128xf32> to vector<256x128xf32>
    %304 = arith.truncf %303 : vector<256x128xf32> to vector<256x128xbf16>
    %c0_379 = arith.constant 0 : index
    %c0_380 = arith.constant 0 : index
    %305 = vector.load %arg8[%c0_379, %c0_380] : memref<256x128xf32, #tpu.memory_space<vmem>>, vector<256x128xf32>
    %c2_381 = arith.constant 2 : index
    %c1_382 = arith.constant 1 : index
    %c0_383 = arith.constant 0 : index
    %c0_384 = arith.constant 0 : index
    %306 = vector.load %arg3[%c2_381, %c1_382, %c0_383, %c0_384] : memref<3x9x128x128xbf16, #tpu.memory_space<vmem>>, vector<1x1x128x128xbf16>
    %307 = vector.shape_cast %306 : vector<1x1x128x128xbf16> to vector<128x128xbf16>
    %cst_385 = arith.constant dense<0.000000e+00> : vector<256x128xf32>
    %308 = tpu.matmul %304, %307, %cst_385 {dimension_numbers = #tpu.dot_dimension_numbers<[1], [0], [0], [1], [0, 0, 1, 1], [], []>} : vector<256x128xbf16>, vector<128x128xbf16>, vector<256x128xf32> -> vector<256x128xf32>
    %309 = arith.addf %305, %308 : vector<256x128xf32>
    %c0_386 = arith.constant 0 : index
    %c0_387 = arith.constant 0 : index
    %310 = vector.load %arg8[%c0_386, %c0_387] : memref<256x128xf32, #tpu.memory_space<vmem>>, vector<256x128xf32>
    tpu.vector_store %arg8[%c0_386, %c0_387], %309 {strides = array<i32>} : memref<256x128xf32, #tpu.memory_space<vmem>>, vector<256x128xf32>,
    %c0_388 = arith.constant 0 : index
    %c2_389 = arith.constant 2 : index
    %c0_390 = arith.constant 0 : index
    %311 = vector.load %arg6[%c0_388, %c2_389, %c0_390] : memref<18x24x128xf32, #tpu.memory_space<vmem>>, vector<16x16x128xf32>
    %312 = vector.shape_cast %311 : vector<16x16x128xf32> to vector<256x128xf32>
    %313 = arith.truncf %312 : vector<256x128xf32> to vector<256x128xbf16>
    %c0_391 = arith.constant 0 : index
    %c0_392 = arith.constant 0 : index
    %314 = vector.load %arg8[%c0_391, %c0_392] : memref<256x128xf32, #tpu.memory_space<vmem>>, vector<256x128xf32>
    %c2_393 = arith.constant 2 : index
    %c2_394 = arith.constant 2 : index
    %c0_395 = arith.constant 0 : index
    %c0_396 = arith.constant 0 : index
    %315 = vector.load %arg3[%c2_393, %c2_394, %c0_395, %c0_396] : memref<3x9x128x128xbf16, #tpu.memory_space<vmem>>, vector<1x1x128x128xbf16>
    %316 = vector.shape_cast %315 : vector<1x1x128x128xbf16> to vector<128x128xbf16>
    %cst_397 = arith.constant dense<0.000000e+00> : vector<256x128xf32>
    %317 = tpu.matmul %313, %316, %cst_397 {dimension_numbers = #tpu.dot_dimension_numbers<[1], [0], [0], [1], [0, 0, 1, 1], [], []>} : vector<256x128xbf16>, vector<128x128xbf16>, vector<256x128xf32> -> vector<256x128xf32>
    %318 = arith.addf %314, %317 : vector<256x128xf32>
    %c0_398 = arith.constant 0 : index
    %c0_399 = arith.constant 0 : index
    %319 = vector.load %arg8[%c0_398, %c0_399] : memref<256x128xf32, #tpu.memory_space<vmem>>, vector<256x128xf32>
    tpu.vector_store %arg8[%c0_398, %c0_399], %318 {strides = array<i32>} : memref<256x128xf32, #tpu.memory_space<vmem>>, vector<256x128xf32>,
    %c1_400 = arith.constant 1 : index
    %c0_401 = arith.constant 0 : index
    %c0_402 = arith.constant 0 : index
    %320 = vector.load %arg6[%c1_400, %c0_401, %c0_402] : memref<18x24x128xf32, #tpu.memory_space<vmem>>, vector<16x16x128xf32>
    %321 = vector.shape_cast %320 : vector<16x16x128xf32> to vector<256x128xf32>
    %322 = arith.truncf %321 : vector<256x128xf32> to vector<256x128xbf16>
    %c0_403 = arith.constant 0 : index
    %c0_404 = arith.constant 0 : index
    %323 = vector.load %arg8[%c0_403, %c0_404] : memref<256x128xf32, #tpu.memory_space<vmem>>, vector<256x128xf32>
    %c2_405 = arith.constant 2 : index
    %c3_406 = arith.constant 3 : index
    %c0_407 = arith.constant 0 : index
    %c0_408 = arith.constant 0 : index
    %324 = vector.load %arg3[%c2_405, %c3_406, %c0_407, %c0_408] : memref<3x9x128x128xbf16, #tpu.memory_space<vmem>>, vector<1x1x128x128xbf16>
    %325 = vector.shape_cast %324 : vector<1x1x128x128xbf16> to vector<128x128xbf16>
    %cst_409 = arith.constant dense<0.000000e+00> : vector<256x128xf32>
    %326 = tpu.matmul %322, %325, %cst_409 {dimension_numbers = #tpu.dot_dimension_numbers<[1], [0], [0], [1], [0, 0, 1, 1], [], []>} : vector<256x128xbf16>, vector<128x128xbf16>, vector<256x128xf32> -> vector<256x128xf32>
    %327 = arith.addf %323, %326 : vector<256x128xf32>
    %c0_410 = arith.constant 0 : index
    %c0_411 = arith.constant 0 : index
    %328 = vector.load %arg8[%c0_410, %c0_411] : memref<256x128xf32, #tpu.memory_space<vmem>>, vector<256x128xf32>
    tpu.vector_store %arg8[%c0_410, %c0_411], %327 {strides = array<i32>} : memref<256x128xf32, #tpu.memory_space<vmem>>, vector<256x128xf32>,
    %c1_412 = arith.constant 1 : index
    %c1_413 = arith.constant 1 : index
    %c0_414 = arith.constant 0 : index
    %329 = vector.load %arg6[%c1_412, %c1_413, %c0_414] : memref<18x24x128xf32, #tpu.memory_space<vmem>>, vector<16x16x128xf32>
    %330 = vector.shape_cast %329 : vector<16x16x128xf32> to vector<256x128xf32>
    %331 = arith.truncf %330 : vector<256x128xf32> to vector<256x128xbf16>
    %c0_415 = arith.constant 0 : index
    %c0_416 = arith.constant 0 : index
    %332 = vector.load %arg8[%c0_415, %c0_416] : memref<256x128xf32, #tpu.memory_space<vmem>>, vector<256x128xf32>
    %c2_417 = arith.constant 2 : index
    %c4_418 = arith.constant 4 : index
    %c0_419 = arith.constant 0 : index
    %c0_420 = arith.constant 0 : index
    %333 = vector.load %arg3[%c2_417, %c4_418, %c0_419, %c0_420] : memref<3x9x128x128xbf16, #tpu.memory_space<vmem>>, vector<1x1x128x128xbf16>
    %334 = vector.shape_cast %333 : vector<1x1x128x128xbf16> to vector<128x128xbf16>
    %cst_421 = arith.constant dense<0.000000e+00> : vector<256x128xf32>
    %335 = tpu.matmul %331, %334, %cst_421 {dimension_numbers = #tpu.dot_dimension_numbers<[1], [0], [0], [1], [0, 0, 1, 1], [], []>} : vector<256x128xbf16>, vector<128x128xbf16>, vector<256x128xf32> -> vector<256x128xf32>
    %336 = arith.addf %332, %335 : vector<256x128xf32>
    %c0_422 = arith.constant 0 : index
    %c0_423 = arith.constant 0 : index
    %337 = vector.load %arg8[%c0_422, %c0_423] : memref<256x128xf32, #tpu.memory_space<vmem>>, vector<256x128xf32>
    tpu.vector_store %arg8[%c0_422, %c0_423], %336 {strides = array<i32>} : memref<256x128xf32, #tpu.memory_space<vmem>>, vector<256x128xf32>,
    %c1_424 = arith.constant 1 : index
    %c2_425 = arith.constant 2 : index
    %c0_426 = arith.constant 0 : index
    %338 = vector.load %arg6[%c1_424, %c2_425, %c0_426] : memref<18x24x128xf32, #tpu.memory_space<vmem>>, vector<16x16x128xf32>
    %339 = vector.shape_cast %338 : vector<16x16x128xf32> to vector<256x128xf32>
    %340 = arith.truncf %339 : vector<256x128xf32> to vector<256x128xbf16>
    %c0_427 = arith.constant 0 : index
    %c0_428 = arith.constant 0 : index
    %341 = vector.load %arg8[%c0_427, %c0_428] : memref<256x128xf32, #tpu.memory_space<vmem>>, vector<256x128xf32>
    %c2_429 = arith.constant 2 : index
    %c5_430 = arith.constant 5 : index
    %c0_431 = arith.constant 0 : index
    %c0_432 = arith.constant 0 : index
    %342 = vector.load %arg3[%c2_429, %c5_430, %c0_431, %c0_432] : memref<3x9x128x128xbf16, #tpu.memory_space<vmem>>, vector<1x1x128x128xbf16>
    %343 = vector.shape_cast %342 : vector<1x1x128x128xbf16> to vector<128x128xbf16>
    %cst_433 = arith.constant dense<0.000000e+00> : vector<256x128xf32>
    %344 = tpu.matmul %340, %343, %cst_433 {dimension_numbers = #tpu.dot_dimension_numbers<[1], [0], [0], [1], [0, 0, 1, 1], [], []>} : vector<256x128xbf16>, vector<128x128xbf16>, vector<256x128xf32> -> vector<256x128xf32>
    %345 = arith.addf %341, %344 : vector<256x128xf32>
    %c0_434 = arith.constant 0 : index
    %c0_435 = arith.constant 0 : index
    %346 = vector.load %arg8[%c0_434, %c0_435] : memref<256x128xf32, #tpu.memory_space<vmem>>, vector<256x128xf32>
    tpu.vector_store %arg8[%c0_434, %c0_435], %345 {strides = array<i32>} : memref<256x128xf32, #tpu.memory_space<vmem>>, vector<256x128xf32>,
    %c2_436 = arith.constant 2 : index
    %c0_437 = arith.constant 0 : index
    %c0_438 = arith.constant 0 : index
    %347 = vector.load %arg6[%c2_436, %c0_437, %c0_438] : memref<18x24x128xf32, #tpu.memory_space<vmem>>, vector<16x16x128xf32>
    %348 = vector.shape_cast %347 : vector<16x16x128xf32> to vector<256x128xf32>
    %349 = arith.truncf %348 : vector<256x128xf32> to vector<256x128xbf16>
    %c0_439 = arith.constant 0 : index
    %c0_440 = arith.constant 0 : index
    %350 = vector.load %arg8[%c0_439, %c0_440] : memref<256x128xf32, #tpu.memory_space<vmem>>, vector<256x128xf32>
    %c2_441 = arith.constant 2 : index
    %c6_442 = arith.constant 6 : index
    %c0_443 = arith.constant 0 : index
    %c0_444 = arith.constant 0 : index
    %351 = vector.load %arg3[%c2_441, %c6_442, %c0_443, %c0_444] : memref<3x9x128x128xbf16, #tpu.memory_space<vmem>>, vector<1x1x128x128xbf16>
    %352 = vector.shape_cast %351 : vector<1x1x128x128xbf16> to vector<128x128xbf16>
    %cst_445 = arith.constant dense<0.000000e+00> : vector<256x128xf32>
    %353 = tpu.matmul %349, %352, %cst_445 {dimension_numbers = #tpu.dot_dimension_numbers<[1], [0], [0], [1], [0, 0, 1, 1], [], []>} : vector<256x128xbf16>, vector<128x128xbf16>, vector<256x128xf32> -> vector<256x128xf32>
    %354 = arith.addf %350, %353 : vector<256x128xf32>
    %c0_446 = arith.constant 0 : index
    %c0_447 = arith.constant 0 : index
    %355 = vector.load %arg8[%c0_446, %c0_447] : memref<256x128xf32, #tpu.memory_space<vmem>>, vector<256x128xf32>
    tpu.vector_store %arg8[%c0_446, %c0_447], %354 {strides = array<i32>} : memref<256x128xf32, #tpu.memory_space<vmem>>, vector<256x128xf32>,
    %c2_448 = arith.constant 2 : index
    %c1_449 = arith.constant 1 : index
    %c0_450 = arith.constant 0 : index
    %356 = vector.load %arg6[%c2_448, %c1_449, %c0_450] : memref<18x24x128xf32, #tpu.memory_space<vmem>>, vector<16x16x128xf32>
    %357 = vector.shape_cast %356 : vector<16x16x128xf32> to vector<256x128xf32>
    %358 = arith.truncf %357 : vector<256x128xf32> to vector<256x128xbf16>
    %c0_451 = arith.constant 0 : index
    %c0_452 = arith.constant 0 : index
    %359 = vector.load %arg8[%c0_451, %c0_452] : memref<256x128xf32, #tpu.memory_space<vmem>>, vector<256x128xf32>
    %c2_453 = arith.constant 2 : index
    %c7_454 = arith.constant 7 : index
    %c0_455 = arith.constant 0 : index
    %c0_456 = arith.constant 0 : index
    %360 = vector.load %arg3[%c2_453, %c7_454, %c0_455, %c0_456] : memref<3x9x128x128xbf16, #tpu.memory_space<vmem>>, vector<1x1x128x128xbf16>
    %361 = vector.shape_cast %360 : vector<1x1x128x128xbf16> to vector<128x128xbf16>
    %cst_457 = arith.constant dense<0.000000e+00> : vector<256x128xf32>
    %362 = tpu.matmul %358, %361, %cst_457 {dimension_numbers = #tpu.dot_dimension_numbers<[1], [0], [0], [1], [0, 0, 1, 1], [], []>} : vector<256x128xbf16>, vector<128x128xbf16>, vector<256x128xf32> -> vector<256x128xf32>
    %363 = arith.addf %359, %362 : vector<256x128xf32>
    %c0_458 = arith.constant 0 : index
    %c0_459 = arith.constant 0 : index
    %364 = vector.load %arg8[%c0_458, %c0_459] : memref<256x128xf32, #tpu.memory_space<vmem>>, vector<256x128xf32>
    tpu.vector_store %arg8[%c0_458, %c0_459], %363 {strides = array<i32>} : memref<256x128xf32, #tpu.memory_space<vmem>>, vector<256x128xf32>,
    %c2_460 = arith.constant 2 : index
    %c2_461 = arith.constant 2 : index
    %c0_462 = arith.constant 0 : index
    %365 = vector.load %arg6[%c2_460, %c2_461, %c0_462] : memref<18x24x128xf32, #tpu.memory_space<vmem>>, vector<16x16x128xf32>
    %366 = vector.shape_cast %365 : vector<16x16x128xf32> to vector<256x128xf32>
    %367 = arith.truncf %366 : vector<256x128xf32> to vector<256x128xbf16>
    %c0_463 = arith.constant 0 : index
    %c0_464 = arith.constant 0 : index
    %368 = vector.load %arg8[%c0_463, %c0_464] : memref<256x128xf32, #tpu.memory_space<vmem>>, vector<256x128xf32>
    %c2_465 = arith.constant 2 : index
    %c8_466 = arith.constant 8 : index
    %c0_467 = arith.constant 0 : index
    %c0_468 = arith.constant 0 : index
    %369 = vector.load %arg3[%c2_465, %c8_466, %c0_467, %c0_468] : memref<3x9x128x128xbf16, #tpu.memory_space<vmem>>, vector<1x1x128x128xbf16>
    %370 = vector.shape_cast %369 : vector<1x1x128x128xbf16> to vector<128x128xbf16>
    %cst_469 = arith.constant dense<0.000000e+00> : vector<256x128xf32>
    %371 = tpu.matmul %367, %370, %cst_469 {dimension_numbers = #tpu.dot_dimension_numbers<[1], [0], [0], [1], [0, 0, 1, 1], [], []>} : vector<256x128xbf16>, vector<128x128xbf16>, vector<256x128xf32> -> vector<256x128xf32>
    %372 = arith.addf %368, %371 : vector<256x128xf32>
    %c0_470 = arith.constant 0 : index
    %c0_471 = arith.constant 0 : index
    %373 = vector.load %arg8[%c0_470, %c0_471] : memref<256x128xf32, #tpu.memory_space<vmem>>, vector<256x128xf32>
    tpu.vector_store %arg8[%c0_470, %c0_471], %372 {strides = array<i32>} : memref<256x128xf32, #tpu.memory_space<vmem>>, vector<256x128xf32>,
    %c0_472 = arith.constant 0 : index
    %c0_473 = arith.constant 0 : index
    %374 = vector.load %arg8[%c0_472, %c0_473] : memref<256x128xf32, #tpu.memory_space<vmem>>, vector<256x128xf32>
    %375 = vector.broadcast %290 : vector<1x128xf32> to vector<256x128xf32>
    %376 = arith.addf %374, %375 : vector<256x128xf32>
    %cst_474 = arith.constant 0.000000e+00 : f32
    %377 = vector.broadcast %cst_474 : f32 to vector<256x128xf32>
    %378 = arith.maximumf %376, %377 : vector<256x128xf32>
    %c0_475 = arith.constant 0 : index
    %c0_476 = arith.constant 0 : index
    %c0_477 = arith.constant 0 : index
    %379 = vector.load %arg5[%c0_475, %c0_476, %c0_477] : memref<1x256x128xf32, #tpu.memory_space<vmem>>, vector<1x256x128xf32>
    %380 = vector.shape_cast %379 : vector<1x256x128xf32> to vector<256x128xf32>
    %381 = vector.shape_cast %378 : vector<256x128xf32> to vector<1x256x128xf32>
    tpu.vector_store %arg5[%c0_475, %c0_476, %c0_477], %381 {strides = array<i32>} : memref<1x256x128xf32, #tpu.memory_space<vmem>>, vector<1x256x128xf32>,
    return
  }
  func.func @transform_0(%arg0: i32) -> (i32, i32, i32, i32) {
    %c0_i32 = arith.constant 0 : i32
    %c0_i32_0 = arith.constant 0 : i32
    %c0_i32_1 = arith.constant 0 : i32
    %c0_i32_2 = arith.constant 0 : i32
    return %arg0, %c0_i32, %c0_i32_0, %c0_i32_1 : i32, i32, i32, i32
  }
  func.func @transform_1(%arg0: i32) -> (i32, i32, i32) {
    %c0_i32 = arith.constant 0 : i32
    %c0_i32_0 = arith.constant 0 : i32
    %c0_i32_1 = arith.constant 0 : i32
    %c0_i32_2 = arith.constant 0 : i32
    return %c0_i32, %c0_i32_0, %c0_i32_1 : i32, i32, i32
  }
  func.func @transform_2(%arg0: i32) -> (i32, i32, i32, i32) {
    %c0_i32 = arith.constant 0 : i32
    %c0_i32_0 = arith.constant 0 : i32
    %c0_i32_1 = arith.constant 0 : i32
    %c0_i32_2 = arith.constant 0 : i32
    %c0_i32_3 = arith.constant 0 : i32
    return %c0_i32, %c0_i32_0, %c0_i32_1, %c0_i32_2 : i32, i32, i32, i32
  }
  func.func @transform_3(%arg0: i32) -> (i32, i32, i32) {
    %c0_i32 = arith.constant 0 : i32
    %c0_i32_0 = arith.constant 0 : i32
    %c0_i32_1 = arith.constant 0 : i32
    %c0_i32_2 = arith.constant 0 : i32
    return %c0_i32, %c0_i32_0, %c0_i32_1 : i32, i32, i32
  }
  func.func @transform_4(%arg0: i32) -> (i32, i32, i32) {
    %c0_i32 = arith.constant 0 : i32
    %c0_i32_0 = arith.constant 0 : i32
    %c0_i32_1 = arith.constant 0 : i32
    return %arg0, %c0_i32, %c0_i32_0 : i32, i32, i32
  }
}

</mosaic_0001>

<bundles_post_ra>
// kernel: _lambda_.1
= control target key start
LH: loop header
LB: loop body
LE: loop exit
PB: predicated region body
PF: predicated region fallthrough
CT: control target
= control target key end

     0   :  { %s18961_s15 = smov 0   ;;  %s21195_s0 = inlined_call_operand.vmem [shape: f32[2,18,24,8], index: 0, kind: input, shape index: {}]   ;;  %s21196_s1 = inlined_call_operand.vmem [shape: bf16[9,8,128], index: 1, kind: input, shape index: {}]   ;;  %s21197_s2 = inlined_call_operand.vmem [shape: bf16[3,9,128,128], index: 2, kind: input, shape index: {}]   ;;  %s21198_s3 = inlined_call_operand.vmem [shape: f32[4,1,128], index: 3, kind: input, shape index: {}]   ;;  %s21199_s4 = inlined_call_operand.vmem [shape: f32[2,256,128], index: 4, kind: output, shape index: {}]  }
   0x1 LB: > { %s14251_s16 = sadd.s32 4294967295, %s18932_s15   ;;  %p14255_p0 = scmp.ge.s32.totalorder %s18932_s15, 1  ;;  %s18932_s15 = sphi %s18961_s15, %s14_s15  }
   0x2   : > { %p162_p1 = scmp.lt.s32.totalorder %s18932_s15, 3 }
   0x4   : > { %p163_p2 = pnand %p14255_p0, %p162_p1 }
   0x5   : > { %v420_v0 = vld [vmem:[%s21196_s1] sm:$0xf] (!%p163_p2)  ;;  %vm470_vm0 = vcmask (!%p163_p2), 1043456   ;;  %p188_p3 = scmp.lt.s32.totalorder (!%p163_p2), %s14251_s16, 1  ;;  %v14275_v2 = vld [vmem:[%s21196_s1 + $0x4] sm:$0xf] (!%p163_p2) }
   0x6   : > { %166 = sbr.rel (%p163_p2) target bundleno = 3032 (0xbd8), region = 36  ;;  %18688 = vmatprep.subr.msk.bf16.mxu0 (!%p163_p2), %vm470_vm0, %v420_v0  ;;  %v472_v1 = vsel (!%p163_p2), %vm470_vm0, %v420_v0, 0  ;;  %vm421_vm1 = vcmask (!%p163_p2), 64512   ;;  %v830_v11 = vsel (!%p163_p2), %vm470_vm0, %v14275_v2, 0  ;;  %v19001_v13 = vld [vmem:[%s21196_s1 + $0x8] sm:$0xf] (!%p163_p2) }
   0x7   : > { %16047 = vmatpush3.bf16.msra.mxu0 (!%p163_p2), %v472_v1  ;;  %v1188_v59 = vsel (!%p163_p2), %vm470_vm0, %v19001_v13, 0  ;;  %v19103_v63 = vld [vmem:[%s21196_s1 + $0xc] sm:$0xf] (!%p163_p2) }
   0x8   : > { %18689 = vmatprep.subr.msk.bf16.mxu0 (!%p163_p2), %vm470_vm0, %v14275_v2 }
   0xd   : > { %s21201_s16 = smov (!%p188_p3, %s14251_s16), 1 }
   0xe   : > { %s18697_s21 = smul.u32 432, %s21201_s16  ;;  %s15244_s23 = sshll.u32 %s21201_s16, 8 }
   0xf   : > { %s21126_s27 = scalar_lea.vmem %s21199_s4, %s15244_s23 }
  0x10   : > { %s18984_s24 = scalar_lea.vmem %s21195_s0, %s18697_s21 }
  0x11   : > { %v340_v3 = vld [vmem:[%s18984_s24] sm:$0xff]  ;;  %v341_v4 = vld [vmem:[%s18984_s24 + $0x8] sm:$0xff]  ;;  %v342_v5 = vld [vmem:[%s18984_s24 + $0x18] sm:$0xff] }
  0x12   : > { %v372_v6 = vpack.c.bf16 %v341_v4, %v340_v3  ;;  %v343_v7 = vld [vmem:[%s18984_s24 + $0x20] sm:$0xff]  ;;  %v344_v8 = vld [vmem:[%s18984_s24 + $0x30] sm:$0xff]  ;;  %v345_v9 = vld [vmem:[%s18984_s24 + $0x38] sm:$0xff] }
  0x13   : > { %v18992_v10 = vpack.c.bf16 %v343_v7, %v342_v5  ;;  %v18995_v12 = vpack.c.bf16 %v345_v9, %v344_v8  ;;  %v346_v14 = vld [vmem:[%s18984_s24 + $0x48] sm:$0xff]  ;;  %v347_v15 = vld [vmem:[%s18984_s24 + $0x50] sm:$0xff]  ;;  %v348_v16 = vld [vmem:[%s18984_s24 + $0x60] sm:$0xff] }
  0x14   : > { %16048 = vmatprep.mubr.msk.bf16.mxu0 %vm421_vm1, %v372_v6  ;;  %v349_v17 = vld [vmem:[%s18984_s24 + $0x68] sm:$0xff]  ;;  %v19013_v18 = vpack.c.bf16 %v347_v15, %v346_v14  ;;  %v350_v20 = vld [vmem:[%s18984_s24 + $0x78] sm:$0xff]  ;;  %v351_v21 = vld [vmem:[%s18984_s24 + $0x80] sm:$0xff] }
  0x15   : > { %16049 = vmatmul.mubr.msk.bf16.vlgmr.msra.gmra.mrb[0].mxu0 %vm421_vm1, %v18992_v10  ;;  %v19015_v19 = vpack.c.bf16 %v349_v17, %v348_v16  ;;  %v352_v22 = vld [vmem:[%s18984_s24 + $0x90] sm:$0xff]  ;;  %v353_v23 = vld [vmem:[%s18984_s24 + $0x98] sm:$0xff]  ;;  %v19025_v24 = vpack.c.bf16 %v351_v21, %v350_v20  ;;  %v354_v26 = vld [vmem:[%s18984_s24 + $0xa8] sm:$0xff] }
  0x16   : > { %16081 = vmatpush3.bf16.msra.mxu0 %v830_v11  ;;  %16052 = vmatprep.mubr.msk.bf16.mxu0 %vm421_vm1, %v18995_v12  ;;  %v19027_v25 = vpack.c.bf16 %v353_v23, %v352_v22  ;;  %v355_v27 = vld [vmem:[%s18984_s24 + $0xb0] sm:$0xff]  ;;  %v356_v28 = vld [vmem:[%s18984_s24 + $0xc0] sm:$0xff]  ;;  %v357_v29 = vld [vmem:[%s18984_s24 + $0xc8] sm:$0xff] }
  0x17   : > { %18690 = vmatprep.subr.msk.bf16.mxu0 %vm470_vm0, %v19001_v13  ;;  %v19037_v30 = vpack.c.bf16 %v355_v27, %v354_v26  ;;  %v19039_v31 = vpack.c.bf16 %v357_v29, %v356_v28  ;;  %v358_v32 = vld [vmem:[%s18984_s24 + $0xd8] sm:$0xff]  ;;  %v359_v33 = vld [vmem:[%s18984_s24 + $0xe0] sm:$0xff]  ;;  %v360_v34 = vld [vmem:[%s18984_s24 + $0xf0] sm:$0xff] }
  0x18   : > { %v361_v35 = vld [vmem:[%s18984_s24 + $0xf8] sm:$0xff]  ;;  %v19049_v36 = vpack.c.bf16 %v359_v33, %v358_v32  ;;  %v362_v38 = vld [vmem:[%s18984_s24 + $0x108] sm:$0xff]  ;;  %v363_v39 = vld [vmem:[%s18984_s24 + $0x110] sm:$0xff] }
  0x19   : > { %v19051_v37 = vpack.c.bf16 %v361_v35, %v360_v34  ;;  %v364_v40 = vld [vmem:[%s18984_s24 + $0x120] sm:$0xff]  ;;  %v365_v41 = vld [vmem:[%s18984_s24 + $0x128] sm:$0xff]  ;;  %v19061_v42 = vpack.c.bf16 %v363_v39, %v362_v38  ;;  %v366_v44 = vld [vmem:[%s18984_s24 + $0x138] sm:$0xff] }
  0x1a   : > { %v19063_v43 = vpack.c.bf16 %v365_v41, %v364_v40  ;;  %v367_v45 = vld [vmem:[%s18984_s24 + $0x140] sm:$0xff]  ;;  %v368_v46 = vld [vmem:[%s18984_s24 + $0x150] sm:$0xff]  ;;  %v369_v47 = vld [vmem:[%s18984_s24 + $0x158] sm:$0xff] }
  0x1b   : > { %v19073_v48 = vpack.c.bf16 %v367_v45, %v366_v44  ;;  %v19075_v49 = vpack.c.bf16 %v369_v47, %v368_v46  ;;  %v370_v50 = vld [vmem:[%s18984_s24 + $0x168] sm:$0xff]  ;;  %v371_v51 = vld [vmem:[%s18984_s24 + $0x170] sm:$0xff]  ;;  %v701_v56 = vld [vmem:[%s18984_s24 + $0x19] sm:$0xff] }
  0x1c   : > { %v699_v52 = vld [vmem:[%s18984_s24 + $0x1] sm:$0xff]  ;;  %v700_v53 = vld [vmem:[%s18984_s24 + $0x9] sm:$0xff]  ;;  %v19085_v54 = vpack.c.bf16 %v371_v51, %v370_v50  ;;  %v703_v58 = vld [vmem:[%s18984_s24 + $0x31] sm:$0xff] }
  0x1d   : > { %16053 = vmatmul.mubr.msk.bf16.gmra.mrb[4].mxu0 %vm421_vm1, %v19013_v18  ;;  %v731_v55 = vpack.c.bf16 %v700_v53, %v699_v52  ;;  %v702_v57 = vld [vmem:[%s18984_s24 + $0x21] sm:$0xff]  ;;  %v704_v60 = vld [vmem:[%s18984_s24 + $0x39] sm:$0xff]  ;;  %v705_v0 = vld [vmem:[%s18984_s24 + $0x49] sm:$0xff] }
  0x1e   : > { %16056 = vmatprep.mubr.msk.bf16.mxu0 %vm421_vm1, %v19015_v19  ;;  %v19096_v61 = vpack.c.bf16 %v702_v57, %v701_v56  ;;  %v19098_v62 = vpack.c.bf16 %v704_v60, %v703_v58  ;;  %v706_v1 = vld [vmem:[%s18984_s24 + $0x51] sm:$0xff]  ;;  %v707_v2 = vld [vmem:[%s18984_s24 + $0x61] sm:$0xff]  ;;  %v708_v3 = vld [vmem:[%s18984_s24 + $0x69] sm:$0xff]  ;;  %v1547_v60 = vsel %vm470_vm0, %v19103_v63, 0 }
  0x1f   : > { %v19115_v4 = vpack.c.bf16 %v706_v1, %v705_v0  ;;  %v19117_v5 = vpack.c.bf16 %v708_v3, %v707_v2  ;;  %v709_v6 = vld [vmem:[%s18984_s24 + $0x79] sm:$0xff]  ;;  %v710_v7 = vld [vmem:[%s18984_s24 + $0x81] sm:$0xff]  ;;  %v711_v8 = vld [vmem:[%s18984_s24 + $0x91] sm:$0xff] }
  0x20   : > { %v712_v9 = vld [vmem:[%s18984_s24 + $0x99] sm:$0xff]  ;;  %v19127_v11 = vpack.c.bf16 %v710_v7, %v709_v6  ;;  %v713_v14 = vld [vmem:[%s18984_s24 + $0xa9] sm:$0xff]  ;;  %v714_v15 = vld [vmem:[%s18984_s24 + $0xb1] sm:$0xff] }
  0x21   : > { %v19129_v13 = vpack.c.bf16 %v712_v9, %v711_v8  ;;  %v715_v16 = vld [vmem:[%s18984_s24 + $0xc1] sm:$0xff]  ;;  %v716_v17 = vld [vmem:[%s18984_s24 + $0xc9] sm:$0xff]  ;;  %v19139_v20 = vpack.c.bf16 %v714_v15, %v713_v14  ;;  %v717_v22 = vld [vmem:[%s18984_s24 + $0xd9] sm:$0xff] }
  0x22   : > { %v19141_v21 = vpack.c.bf16 %v716_v17, %v715_v16  ;;  %v718_v23 = vld [vmem:[%s18984_s24 + $0xe1] sm:$0xff]  ;;  %v719_v26 = vld [vmem:[%s18984_s24 + $0xf1] sm:$0xff]  ;;  %v720_v27 = vld [vmem:[%s18984_s24 + $0xf9] sm:$0xff] }
  0x23   : > { %v19151_v28 = vpack.c.bf16 %v718_v23, %v717_v22  ;;  %v19153_v29 = vpack.c.bf16 %v720_v27, %v719_v26  ;;  %v721_v32 = vld [vmem:[%s18984_s24 + $0x109] sm:$0xff]  ;;  %v722_v33 = vld [vmem:[%s18984_s24 + $0x111] sm:$0xff]  ;;  %v723_v34 = vld [vmem:[%s18984_s24 + $0x121] sm:$0xff] }
  0x24   : > { %v724_v35 = vld [vmem:[%s18984_s24 + $0x129] sm:$0xff]  ;;  %v19163_v38 = vpack.c.bf16 %v722_v33, %v721_v32  ;;  %v725_v40 = vld [vmem:[%s18984_s24 + $0x139] sm:$0xff]  ;;  %v726_v41 = vld [vmem:[%s18984_s24 + $0x141] sm:$0xff] }
  0x25   : > { %16057 = vmatmul.mubr.msk.bf16.gmra.mrb[8].mxu0 %vm421_vm1, %v19025_v24  ;;  %v19165_v39 = vpack.c.bf16 %v724_v35, %v723_v34  ;;  %v727_v44 = vld [vmem:[%s18984_s24 + $0x151] sm:$0xff]  ;;  %v728_v45 = vld [vmem:[%s18984_s24 + $0x159] sm:$0xff]  ;;  %v19175_v46 = vpack.c.bf16 %v726_v41, %v725_v40  ;;  %v729_v50 = vld [vmem:[%s18984_s24 + $0x169] sm:$0xff] }
  0x26   : > { %16060 = vmatprep.mubr.msk.bf16.mxu0 %vm421_vm1, %v19027_v25  ;;  %v19177_v47 = vpack.c.bf16 %v728_v45, %v727_v44  ;;  %v730_v51 = vld [vmem:[%s18984_s24 + $0x171] sm:$0xff]  ;;  %v1057_v52 = vld [vmem:[%s18984_s24 + $0x2] sm:$0xff]  ;;  %v1059_v57 = vld [vmem:[%s18984_s24 + $0x1a] sm:$0xff] }
  0x27   : > { %v1058_v53 = vld [vmem:[%s18984_s24 + $0xa] sm:$0xff]  ;;  %v1060_v58 = vld [vmem:[%s18984_s24 + $0x22] sm:$0xff]  ;;  %v1062_v0 = vld [vmem:[%s18984_s24 + $0x3a] sm:$0xff] }
  0x28   : > { %v1089_v56 = vpack.c.bf16 %v1058_v53, %v1057_v52  ;;  %v19198_v1 = vpack.c.bf16 %v1060_v58, %v1059_v57  ;;  %v14390_v3 = vld [vmem:[%s21196_s1 + $0x10] sm:$0xf]  ;;  %v1065_v8 = vld [vmem:[%s18984_s24 + $0x62] sm:$0xff]  ;;  %v1067_v15 = vld [vmem:[%s18984_s24 + $0x7a] sm:$0xff] }
  0x29   : > { %v1063_v6 = vld [vmem:[%s18984_s24 + $0x4a] sm:$0xff]  ;;  %v1064_v7 = vld [vmem:[%s18984_s24 + $0x52] sm:$0xff]  ;;  %v1068_v16 = vld [vmem:[%s18984_s24 + $0x82] sm:$0xff] }
  0x2a   : > { %v19214_v9 = vpack.c.bf16 %v1064_v7, %v1063_v6  ;;  %v1069_v17 = vld [vmem:[%s18984_s24 + $0x92] sm:$0xff]  ;;  %v1070_v22 = vld [vmem:[%s18984_s24 + $0x9a] sm:$0xff]  ;;  %v19226_v23 = vpack.c.bf16 %v1068_v16, %v1067_v15  ;;  %v1071_v27 = vld [vmem:[%s18984_s24 + $0xaa] sm:$0xff] }
  0x2b   : > { %v19228_v26 = vpack.c.bf16 %v1070_v22, %v1069_v17  ;;  %v1072_v32 = vld [vmem:[%s18984_s24 + $0xb2] sm:$0xff]  ;;  %v1073_v33 = vld [vmem:[%s18984_s24 + $0xc2] sm:$0xff]  ;;  %v1074_v34 = vld [vmem:[%s18984_s24 + $0xca] sm:$0xff] }
  0x2c   : > { %v19238_v35 = vpack.c.bf16 %v1072_v32, %v1071_v27  ;;  %v19240_v40 = vpack.c.bf16 %v1074_v34, %v1073_v33  ;;  %v1075_v41 = vld [vmem:[%s18984_s24 + $0xda] sm:$0xff]  ;;  %v1076_v44 = vld [vmem:[%s18984_s24 + $0xe2] sm:$0xff]  ;;  %v1077_v45 = vld [vmem:[%s18984_s24 + $0xf2] sm:$0xff]  ;;  %v1905_v27 = vsel %vm470_vm0, %v14390_v3, 0 }
  0x2d   : > { %16061 = vmatmul.mubr.msk.bf16.gmra.mrb[12].mxu0 %vm421_vm1, %v19037_v30  ;;  %v1079_v53 = vld [vmem:[%s18984_s24 + $0x10a] sm:$0xff]  ;;  %v1081_v57 = vld [vmem:[%s18984_s24 + $0x122] sm:$0xff]  ;;  %v1085_v7 = vld [vmem:[%s18984_s24 + $0x152] sm:$0xff] }
  0x2e   : > { %16064 = vmatprep.mubr.msk.bf16.mxu0 %vm421_vm1, %v19039_v31  ;;  %v1082_v58 = vld [vmem:[%s18984_s24 + $0x12a] sm:$0xff]  ;;  %v1084_v6 = vld [vmem:[%s18984_s24 + $0x142] sm:$0xff]  ;;  %v1088_v17 = vld [vmem:[%s18984_s24 + $0x172] sm:$0xff] }
  0x2f   : > { %v1087_v16 = vld [vmem:[%s18984_s24 + $0x16a] sm:$0xff]  ;;  %v14439_v32 = vld [vmem:[%s21196_s1 + $0x14] sm:$0xf] }
  0x30   : > { %v19284_v22 = vpack.c.bf16 %v1088_v17, %v1087_v16  ;;  %v2263_v34 = vsel %vm470_vm0, %v14439_v32, 0 }
  0x35   : > { %16065 = vmatmul.mubr.msk.bf16.gmra.mrb[16].mxu0 %vm421_vm1, %v19049_v36 }
  0x36   : > { %16068 = vmatprep.mubr.msk.bf16.mxu0 %vm421_vm1, %v19051_v37 }
  0x3d   : > { %16069 = vmatmul.mubr.msk.bf16.gmra.mrb[20].mxu0 %vm421_vm1, %v19061_v42 }
  0x3e   : > { %16072 = vmatprep.mubr.msk.bf16.mxu0 %vm421_vm1, %v19063_v43 }
  0x45   : > { %16073 = vmatmul.mubr.msk.bf16.gmra.mrb[24].mxu0 %vm421_vm1, %v19073_v48 }
  0x46   : > { %16076 = vmatprep.mubr.msk.bf16.mxu0 %vm421_vm1, %v19075_v49 }
  0x4d   : > { %16077 = vmatmul.mubr.msk.bf16.gmra.mrb[28].mxu0 %vm421_vm1, %v19085_v54 }
  0x4e   : > { %16082 = vmatprep.mubr.msk.bf16.mxu0 %vm421_vm1, %v731_v55  ;;  %v19187_v55 = vpack.c.bf16 %v730_v51, %v729_v50  ;;  %v1078_v50 = vld [vmem:[%s18984_s24 + $0xfa] sm:$0xff]  ;;  %v19250_v51 = vpack.c.bf16 %v1076_v44, %v1075_v41  ;;  %v14389_v44 = vld [vmem:[%s18984_s24 + $0x189] sm:$0xff] }
  0x4f   : > { %v19252_v52 = vpack.c.bf16 %v1078_v50, %v1077_v45  ;;  %v14488_v41 = vld [vmem:[%s21196_s1 + $0x18] sm:$0xf] }
  0x50   : > { %v2622_v50 = vsel %vm470_vm0, %v14488_v41, 0 }
  0x55   : > { %16083 = vmatmul.mubr.msk.bf16.vlgmr.msra.gmra.mrb[0].mxu0 %vm421_vm1, %v19096_v61 }
  0x56   : > { %16115 = vmatpush3.bf16.msra.mxu0 %v1188_v59  ;;  %16086 = vmatprep.mubr.msk.bf16.mxu0 %vm421_vm1, %v19098_v62  ;;  %v1061_v59 = vld [vmem:[%s18984_s24 + $0x32] sm:$0xff] }
  0x57   : > { %18691 = vmatprep.subr.msk.bf16.mxu0 %vm470_vm0, %v19103_v63  ;;  %v19200_v2 = vpack.c.bf16 %v1062_v0, %v1061_v59  ;;  %v1066_v63 = vld [vmem:[%s18984_s24 + $0x6a] sm:$0xff]  ;;  %v1083_v0 = vld [vmem:[%s18984_s24 + $0x13a] sm:$0xff] }
  0x58   : > { %v19216_v14 = vpack.c.bf16 %v1066_v63, %v1065_v8  ;;  %v1086_v8 = vld [vmem:[%s18984_s24 + $0x15a] sm:$0xff]  ;;  %v19274_v63 = vpack.c.bf16 %v1084_v6, %v1083_v0 }
  0x59   : > { %v19276_v15 = vpack.c.bf16 %v1086_v8, %v1085_v7  ;;  %v19417_v0 = vld [vmem:[%s21196_s1 + $0x20] sm:$0xf] }
  0x5d   : > { %16087 = vmatmul.mubr.msk.bf16.gmra.mrb[4].mxu0 %vm421_vm1, %v19115_v4 }
  0x5e   : > { %16090 = vmatprep.mubr.msk.bf16.mxu0 %vm421_vm1, %v19117_v5 }
  0x65   : > { %16091 = vmatmul.mubr.msk.bf16.gmra.mrb[8].mxu0 %vm421_vm1, %v19127_v11 }
  0x66   : > { %16094 = vmatprep.mubr.msk.bf16.mxu0 %vm421_vm1, %v19129_v13 }
  0x6d   : > { %16095 = vmatmul.mubr.msk.bf16.gmra.mrb[12].mxu0 %vm421_vm1, %v19139_v20 }
  0x6e   : > { %16098 = vmatprep.mubr.msk.bf16.mxu0 %vm421_vm1, %v19141_v21 }
  0x75   : > { %16099 = vmatmul.mubr.msk.bf16.gmra.mrb[16].mxu0 %vm421_vm1, %v19151_v28 }
  0x76   : > { %16102 = vmatprep.mubr.msk.bf16.mxu0 %vm421_vm1, %v19153_v29 }
  0x7d   : > { %16103 = vmatmul.mubr.msk.bf16.gmra.mrb[20].mxu0 %vm421_vm1, %v19163_v38 }
  0x7e   : > { %16106 = vmatprep.mubr.msk.bf16.mxu0 %vm421_vm1, %v19165_v39 }
  0x85   : > { %16107 = vmatmul.mubr.msk.bf16.gmra.mrb[24].mxu0 %vm421_vm1, %v19175_v46 }
  0x86   : > { %16110 = vmatprep.mubr.msk.bf16.mxu0 %vm421_vm1, %v19177_v47 }
  0x8d   : > { %16111 = vmatmul.mubr.msk.bf16.gmra.mrb[28].mxu0 %vm421_vm1, %v19187_v55 }
  0x8e   : > { %16116 = vmatprep.mubr.msk.bf16.mxu0 %vm421_vm1, %v1089_v56  ;;  %v1080_v56 = vld [vmem:[%s18984_s24 + $0x112] sm:$0xff] }
  0x8f   : > { %v19262_v59 = vpack.c.bf16 %v1080_v56, %v1079_v53  ;;  %v14537_v53 = vld [vmem:[%s21196_s1 + $0x1c] sm:$0xf]  ;;  %v14438_v56 = vld [vmem:[%s18984_s24 + $0x18a] sm:$0xff] }
  0x95   : > { %16117 = vmatmul.mubr.msk.bf16.vlgmr.msra.gmra.mrb[0].mxu0 %vm421_vm1, %v19198_v1 }
  0x96   : > { %16149 = vmatpush3.bf16.msra.mxu0 %v1547_v60  ;;  %16120 = vmatprep.mubr.msk.bf16.mxu0 %vm421_vm1, %v19200_v2  ;;  %v19264_v60 = vpack.c.bf16 %v1082_v58, %v1081_v57  ;;  %v2980_v58 = vsel %vm470_vm0, %v14537_v53, 0 }
  0x97   : > { %18692 = vmatprep.subr.msk.bf16.mxu0 %vm470_vm0, %v14390_v3  ;;  %v14340_v3 = vld [vmem:[%s18984_s24 + $0x188] sm:$0xff] }
  0x9d   : > { %16121 = vmatmul.mubr.msk.bf16.gmra.mrb[4].mxu0 %vm421_vm1, %v19214_v9 }
  0x9e   : > { %16124 = vmatprep.mubr.msk.bf16.mxu0 %vm421_vm1, %v19216_v14 }
  0xa5   : > { %16125 = vmatmul.mubr.msk.bf16.gmra.mrb[8].mxu0 %vm421_vm1, %v19226_v23 }
  0xa6   : > { %16128 = vmatprep.mubr.msk.bf16.mxu0 %vm421_vm1, %v19228_v26 }
  0xad   : > { %16129 = vmatmul.mubr.msk.bf16.gmra.mrb[12].mxu0 %vm421_vm1, %v19238_v35 }
  0xae   : > { %16132 = vmatprep.mubr.msk.bf16.mxu0 %vm421_vm1, %v19240_v40 }
  0xb5   : > { %16133 = vmatmul.mubr.msk.bf16.gmra.mrb[16].mxu0 %vm421_vm1, %v19250_v51 }
  0xb6   : > { %16136 = vmatprep.mubr.msk.bf16.mxu0 %vm421_vm1, %v19252_v52 }
  0xbd   : > { %16137 = vmatmul.mubr.msk.bf16.gmra.mrb[20].mxu0 %vm421_vm1, %v19262_v59 }
  0xbe   : > { %16140 = vmatprep.mubr.msk.bf16.mxu0 %vm421_vm1, %v19264_v60 }
  0xc5   : > { %16141 = vmatmul.mubr.msk.bf16.gmra.mrb[24].mxu0 %vm421_vm1, %v19274_v63 }
  0xc6   : > { %16144 = vmatprep.mubr.msk.bf16.mxu0 %vm421_vm1, %v19276_v15 }
  0xcd   : > { %16145 = vmatmul.mubr.msk.bf16.gmra.mrb[28].mxu0 %vm421_vm1, %v19284_v22 }
  0xce   : > { %16150 = vmatprep.mubr.msk.bf16.mxu0 %vm421_vm1, %v18992_v10  ;;  %v14339_v10 = vld [vmem:[%s18984_s24 + $0x180] sm:$0xff] }
  0xcf   : > { %v19325_v33 = vpack.c.bf16 %v14340_v3, %v14339_v10 }
  0xd5   : > { %16151 = vmatmul.mubr.msk.bf16.vlgmr.msra.gmra.mrb[0].mxu0 %vm421_vm1, %v18995_v12 }
  0xd6   : > { %16183 = vmatpush3.bf16.msra.mxu0 %v1905_v27  ;;  %16154 = vmatprep.mubr.msk.bf16.mxu0 %vm421_vm1, %v19013_v18 }
  0xd7   : > { %18693 = vmatprep.subr.msk.bf16.mxu0 %vm470_vm0, %v14439_v32 }
  0xdd   : > { %16155 = vmatmul.mubr.msk.bf16.gmra.mrb[4].mxu0 %vm421_vm1, %v19015_v19 }
  0xde   : > { %16158 = vmatprep.mubr.msk.bf16.mxu0 %vm421_vm1, %v19025_v24 }
  0xe5   : > { %16159 = vmatmul.mubr.msk.bf16.gmra.mrb[8].mxu0 %vm421_vm1, %v19027_v25 }
  0xe6   : > { %16162 = vmatprep.mubr.msk.bf16.mxu0 %vm421_vm1, %v19037_v30 }
  0xed   : > { %16163 = vmatmul.mubr.msk.bf16.gmra.mrb[12].mxu0 %vm421_vm1, %v19039_v31 }
  0xee   : > { %16166 = vmatprep.mubr.msk.bf16.mxu0 %vm421_vm1, %v19049_v36 }
  0xf5   : > { %16167 = vmatmul.mubr.msk.bf16.gmra.mrb[16].mxu0 %vm421_vm1, %v19051_v37 }
  0xf6   : > { %16170 = vmatprep.mubr.msk.bf16.mxu0 %vm421_vm1, %v19061_v42 }
  0xfd   : > { %16171 = vmatmul.mubr.msk.bf16.gmra.mrb[20].mxu0 %vm421_vm1, %v19063_v43 }
  0xfe   : > { %16174 = vmatprep.mubr.msk.bf16.mxu0 %vm421_vm1, %v19073_v48 }
 0x105   : > { %16175 = vmatmul.mubr.msk.bf16.gmra.mrb[24].mxu0 %vm421_vm1, %v19075_v49 }
 0x106   : > { %16178 = vmatprep.mubr.msk.bf16.mxu0 %vm421_vm1, %v19085_v54 }
 0x10d   : > { %16179 = vmatmul.mubr.msk.bf16.gmra.mrb[28].mxu0 %vm421_vm1, %v19325_v33 }
 0x10e   : > { %16184 = vmatprep.mubr.msk.bf16.mxu0 %vm421_vm1, %v19096_v61  ;;  %v14388_v61 = vld [vmem:[%s18984_s24 + $0x181] sm:$0xff] }
 0x10f   : > { %v19366_v45 = vpack.c.bf16 %v14389_v44, %v14388_v61  ;;  %v18716_v44 = vld [vmem:[%s21197_s2 + $0x48] sm:$0xff]  }
 0x115   : > { %16185 = vmatmul.mubr.msk.bf16.vlgmr.msra.gmra.mrb[0].mxu0 %vm421_vm1, %v19098_v62 }
 0x116   : > { %16217 = vmatpush3.bf16.msra.mxu0 %v2263_v34  ;;  %16188 = vmatprep.mubr.msk.bf16.mxu0 %vm421_vm1, %v19115_v4 }
 0x117   : > { %18694 = vmatprep.subr.msk.bf16.mxu0 %vm470_vm0, %v14488_v41 }
 0x11d   : > { %16189 = vmatmul.mubr.msk.bf16.gmra.mrb[4].mxu0 %vm421_vm1, %v19117_v5 }
 0x11e   : > { %16192 = vmatprep.mubr.msk.bf16.mxu0 %vm421_vm1, %v19127_v11 }
 0x125   : > { %16193 = vmatmul.mubr.msk.bf16.gmra.mrb[8].mxu0 %vm421_vm1, %v19129_v13 }
 0x126   : > { %16196 = vmatprep.mubr.msk.bf16.mxu0 %vm421_vm1, %v19139_v20 }
 0x12d   : > { %16197 = vmatmul.mubr.msk.bf16.gmra.mrb[12].mxu0 %vm421_vm1, %v19141_v21 }
 0x12e   : > { %16200 = vmatprep.mubr.msk.bf16.mxu0 %vm421_vm1, %v19151_v28 }
 0x135   : > { %16201 = vmatmul.mubr.msk.bf16.gmra.mrb[16].mxu0 %vm421_vm1, %v19153_v29 }
 0x136   : > { %16204 = vmatprep.mubr.msk.bf16.mxu0 %vm421_vm1, %v19163_v38 }
 0x13d   : > { %16205 = vmatmul.mubr.msk.bf16.gmra.mrb[20].mxu0 %vm421_vm1, %v19165_v39 }
 0x13e   : > { %16208 = vmatprep.mubr.msk.bf16.mxu0 %vm421_vm1, %v19175_v46 }
 0x145   : > { %16209 = vmatmul.mubr.msk.bf16.gmra.mrb[24].mxu0 %vm421_vm1, %v19177_v47 }
 0x146   : > { %16212 = vmatprep.mubr.msk.bf16.mxu0 %vm421_vm1, %v19187_v55 }
 0x14d   : > { %16213 = vmatmul.mubr.msk.bf16.gmra.mrb[28].mxu0 %vm421_vm1, %v19366_v45 }
 0x14e   : > { %16218 = vmatprep.mubr.msk.bf16.mxu0 %vm421_vm1, %v19198_v1  ;;  %v14437_v1 = vld [vmem:[%s18984_s24 + $0x182] sm:$0xff] }
 0x14f   : > { %v19407_v57 = vpack.c.bf16 %v14438_v56, %v14437_v1 }
 0x155   : > { %16219 = vmatmul.mubr.msk.bf16.vlgmr.msra.gmra.mrb[0].mxu0 %vm421_vm1, %v19200_v2 }
 0x156   : > { %16251 = vmatpush3.bf16.msra.mxu0 %v2622_v50  ;;  %16222 = vmatprep.mubr.msk.bf16.mxu0 %vm421_vm1, %v19214_v9 }
 0x157   : > { %18695 = vmatprep.subr.msk.bf16.mxu0 %vm470_vm0, %v14537_v53 }
 0x15d   : > { %16223 = vmatmul.mubr.msk.bf16.gmra.mrb[4].mxu0 %vm421_vm1, %v19216_v14 }
 0x15e   : > { %16226 = vmatprep.mubr.msk.bf16.mxu0 %vm421_vm1, %v19226_v23 }
 0x165   : > { %16227 = vmatmul.mubr.msk.bf16.gmra.mrb[8].mxu0 %vm421_vm1, %v19228_v26 }
 0x166   : > { %16230 = vmatprep.mubr.msk.bf16.mxu0 %vm421_vm1, %v19238_v35 }
 0x16d   : > { %16231 = vmatmul.mubr.msk.bf16.gmra.mrb[12].mxu0 %vm421_vm1, %v19240_v40 }
 0x16e   : > { %16234 = vmatprep.mubr.msk.bf16.mxu0 %vm421_vm1, %v19250_v51 }
 0x175   : > { %16235 = vmatmul.mubr.msk.bf16.gmra.mrb[16].mxu0 %vm421_vm1, %v19252_v52 }
 0x176   : > { %16238 = vmatprep.mubr.msk.bf16.mxu0 %vm421_vm1, %v19262_v59 }
 0x17d   : > { %16239 = vmatmul.mubr.msk.bf16.gmra.mrb[20].mxu0 %vm421_vm1, %v19264_v60 }
 0x17e   : > { %16242 = vmatprep.mubr.msk.bf16.mxu0 %vm421_vm1, %v19274_v63 }
 0x185   : > { %16243 = vmatmul.mubr.msk.bf16.gmra.mrb[24].mxu0 %vm421_vm1, %v19276_v15 }
 0x186   : > { %16246 = vmatprep.mubr.msk.bf16.mxu0 %vm421_vm1, %v19284_v22 }
 0x18d   : > { %16247 = vmatmul.mubr.msk.bf16.gmra.mrb[28].mxu0 %vm421_vm1, %v19407_v57 }
 0x18e   : > { %16252 = vmatprep.mubr.msk.bf16.mxu0 %vm421_vm1, %v18995_v12  ;;  %v14486_v12 = vld [vmem:[%s18984_s24 + $0x198] sm:$0xff] }
 0x195   : > { %16253 = vmatmul.mubr.msk.bf16.vlgmr.msra.gmra.mrb[0].mxu0 %vm421_vm1, %v19013_v18  ;;  %v14487_v18 = vld [vmem:[%s18984_s24 + $0x1a0] sm:$0xff] }
 0x196   : > { %16285 = vmatpush3.bf16.msra.mxu0 %v2980_v58  ;;  %16256 = vmatprep.mubr.msk.bf16.mxu0 %vm421_vm1, %v19015_v19  ;;  %v2538_v19 = vpack.c.bf16 %v14487_v18, %v14486_v12 }
 0x197   : > { %18696 = vmatprep.subr.msk.bf16.mxu0 %vm470_vm0, %v19417_v0 }
 0x19d   : > { %16257 = vmatmul.mubr.msk.bf16.gmra.mrb[4].mxu0 %vm421_vm1, %v19025_v24  ;;  %v19455_v24 = vld [vmem:[%s21197_s2] sm:$0xff]  }
 0x19e   : > { %16260 = vmatprep.mubr.msk.bf16.mxu0 %vm421_vm1, %v19027_v25  ;;  %v19460_v25 = vld [vmem:[%s21197_s2 + $0x8] sm:$0xff]   ;;  %16352 = vmatprep.subr.bf16.mxu1 %v19455_v24 }
 0x19f   : > { %16353 = vmatpush3.bf16.msra.mxu1 %v19455_v24  ;;  %v18717_v24 = vld [vmem:[%s21197_s2 + $0x50] sm:$0xff]  }
 0x1a0   : > { %16354 = vmatprep.subr.bf16.mxu1 %v19460_v25 }
 0x1a3   : > { %16355 = vmatpush3.bf16.msra.mxu1 %v19460_v25 }
 0x1a5   : > { %16261 = vmatmul.mubr.msk.bf16.gmra.mrb[8].mxu0 %vm421_vm1, %v19037_v30  ;;  %v18934_v30 = vmov 0.0  }
 0x1a6   : > { %16264 = vmatprep.mubr.msk.bf16.mxu0 %vm421_vm1, %v19039_v31  ;;  %205 = vst [vmem:[#allocation2 + $0x30] sm:$0xff] %v18934_v30  ;;  %206 = vst [vmem:[#allocation2 + $0x38] sm:$0xff] %v18934_v30  ;;  %v18709_v31 = vld [vmem:[%s21197_s2 + $0x10] sm:$0xff]  }
 0x1a7   : > { %199 = vst [vmem:[#allocation2] sm:$0xff] %v18934_v30  ;;  %200 = vst [vmem:[#allocation2 + $0x8] sm:$0xff] %v18934_v30  ;;  %16356 = vmatprep.subr.bf16.mxu1 %v18709_v31 }
 0x1a8   : > { %201 = vst [vmem:[#allocation2 + $0x10] sm:$0xff] %v18934_v30  ;;  %202 = vst [vmem:[#allocation2 + $0x18] sm:$0xff] %v18934_v30  ;;  %16357 = vmatpush3.bf16.msra.mxu1 %v18709_v31 }
 0x1a9   : > { %203 = vst [vmem:[#allocation2 + $0x20] sm:$0xff] %v18934_v30  ;;  %204 = vst [vmem:[#allocation2 + $0x28] sm:$0xff] %v18934_v30 }
 0x1aa   : > { %207 = vst [vmem:[#allocation2 + $0x40] sm:$0xff] %v18934_v30  ;;  %208 = vst [vmem:[#allocation2 + $0x48] sm:$0xff] %v18934_v30 }
 0x1ab   : > { %209 = vst [vmem:[#allocation2 + $0x50] sm:$0xff] %v18934_v30  ;;  %210 = vst [vmem:[#allocation2 + $0x58] sm:$0xff] %v18934_v30 }
 0x1ac   : > { %211 = vst [vmem:[#allocation2 + $0x60] sm:$0xff] %v18934_v30  ;;  %212 = vst [vmem:[#allocation2 + $0x68] sm:$0xff] %v18934_v30 }
 0x1ad   : > { %16265 = vmatmul.mubr.msk.bf16.gmra.mrb[12].mxu0 %vm421_vm1, %v19049_v36  ;;  %213 = vst [vmem:[#allocation2 + $0x70] sm:$0xff] %v18934_v30  ;;  %214 = vst [vmem:[#allocation2 + $0x78] sm:$0xff] %v18934_v30  ;;  %v3338_v36 = vsel %vm470_vm0, %v19417_v0, 0 }
 0x1ae   : > { %16268 = vmatprep.mubr.msk.bf16.mxu0 %vm421_vm1, %v19051_v37  ;;  %215 = vst [vmem:[#allocation2 + $0x80] sm:$0xff] %v18934_v30  ;;  %216 = vst [vmem:[#allocation2 + $0x88] sm:$0xff] %v18934_v30  ;;  %v18710_v37 = vld [vmem:[%s21197_s2 + $0x18] sm:$0xff]  }
 0x1af   : > { %217 = vst [vmem:[#allocation2 + $0x90] sm:$0xff] %v18934_v30  ;;  %218 = vst [vmem:[#allocation2 + $0x98] sm:$0xff] %v18934_v30  ;;  %16358 = vmatprep.subr.bf16.mxu1 %v18710_v37 }
 0x1b0   : > { %219 = vst [vmem:[#allocation2 + $0xa0] sm:$0xff] %v18934_v30  ;;  %220 = vst [vmem:[#allocation2 + $0xa8] sm:$0xff] %v18934_v30  ;;  %16359 = vmatpush3.bf16.msra.mxu1 %v18710_v37 }
 0x1b1   : > { %221 = vst [vmem:[#allocation2 + $0xb0] sm:$0xff] %v18934_v30  ;;  %222 = vst [vmem:[#allocation2 + $0xb8] sm:$0xff] %v18934_v30 }
 0x1b2   : > { %223 = vst [vmem:[#allocation2 + $0xc0] sm:$0xff] %v18934_v30  ;;  %224 = vst [vmem:[#allocation2 + $0xc8] sm:$0xff] %v18934_v30 }
 0x1b3   : > { %225 = vst [vmem:[#allocation2 + $0xd0] sm:$0xff] %v18934_v30  ;;  %226 = vst [vmem:[#allocation2 + $0xd8] sm:$0xff] %v18934_v30 }
 0x1b4   : > { %227 = vst [vmem:[#allocation2 + $0xe0] sm:$0xff] %v18934_v30  ;;  %228 = vst [vmem:[#allocation2 + $0xe8] sm:$0xff] %v18934_v30 }
 0x1b5   : > { %16269 = vmatmul.mubr.msk.bf16.gmra.mrb[16].mxu0 %vm421_vm1, %v19061_v42  ;;  %229 = vst [vmem:[#allocation2 + $0xf0] sm:$0xff] %v18934_v30  ;;  %230 = vst [vmem:[#allocation2 + $0xf8] sm:$0xff] %v18934_v30  ;;  %v14535_v42 = vld [vmem:[%s18984_s24 + $0x199] sm:$0xff] }
 0x1b6   : > { %16272 = vmatprep.mubr.msk.bf16.mxu0 %vm421_vm1, %v19063_v43  ;;  %231 = vst [vmem:[#allocation2 + $0x100] sm:$0xff] %v18934_v30  ;;  %232 = vst [vmem:[#allocation2 + $0x108] sm:$0xff] %v18934_v30  ;;  %v14536_v43 = vld [vmem:[%s18984_s24 + $0x1a1] sm:$0xff] }
 0x1b7   : > { %233 = vst [vmem:[#allocation2 + $0x110] sm:$0xff] %v18934_v30  ;;  %234 = vst [vmem:[#allocation2 + $0x118] sm:$0xff] %v18934_v30 }
 0x1b8   : > { %235 = vst [vmem:[#allocation2 + $0x120] sm:$0xff] %v18934_v30  ;;  %236 = vst [vmem:[#allocation2 + $0x128] sm:$0xff] %v18934_v30 }
 0x1b9   : > { %237 = vst [vmem:[#allocation2 + $0x130] sm:$0xff] %v18934_v30  ;;  %238 = vst [vmem:[#allocation2 + $0x138] sm:$0xff] %v18934_v30 }
 0x1ba   : > { %239 = vst [vmem:[#allocation2 + $0x140] sm:$0xff] %v18934_v30  ;;  %240 = vst [vmem:[#allocation2 + $0x148] sm:$0xff] %v18934_v30 }
 0x1bb   : > { %241 = vst [vmem:[#allocation2 + $0x150] sm:$0xff] %v18934_v30  ;;  %242 = vst [vmem:[#allocation2 + $0x158] sm:$0xff] %v18934_v30 }
 0x1bc   : > { %243 = vst [vmem:[#allocation2 + $0x160] sm:$0xff] %v18934_v30  ;;  %244 = vst [vmem:[#allocation2 + $0x168] sm:$0xff] %v18934_v30 }
 0x1bd   : > { %16273 = vmatmul.mubr.msk.bf16.gmra.mrb[20].mxu0 %vm421_vm1, %v19073_v48  ;;  %245 = vst [vmem:[#allocation2 + $0x170] sm:$0xff] %v18934_v30  ;;  %246 = vst [vmem:[#allocation2 + $0x178] sm:$0xff] %v18934_v30  ;;  %v2896_v48 = vpack.c.bf16 %v14536_v43, %v14535_v42 }
 0x1be   : > { %16276 = vmatprep.mubr.msk.bf16.mxu0 %vm421_vm1, %v19075_v49  ;;  %247 = vst [vmem:[#allocation2 + $0x180] sm:$0xff] %v18934_v30  ;;  %248 = vst [vmem:[#allocation2 + $0x188] sm:$0xff] %v18934_v30  ;;  %v14584_v49 = vld [vmem:[%s18984_s24 + $0x19a] sm:$0xff] }
 0x1bf   : > { %249 = vst [vmem:[#allocation2 + $0x190] sm:$0xff] %v18934_v30  ;;  %250 = vst [vmem:[#allocation2 + $0x198] sm:$0xff] %v18934_v30 }
 0x1c0   : > { %251 = vst [vmem:[#allocation2 + $0x1a0] sm:$0xff] %v18934_v30  ;;  %252 = vst [vmem:[#allocation2 + $0x1a8] sm:$0xff] %v18934_v30 }
 0x1c1   : > { %253 = vst [vmem:[#allocation3] sm:$0xff] %v18934_v30  ;;  %254 = vst [vmem:[#allocation3 + $0x8] sm:$0xff] %v18934_v30 }
 0x1c2   : > { %255 = vst [vmem:[#allocation3 + $0x10] sm:$0xff] %v18934_v30  ;;  %256 = vst [vmem:[#allocation3 + $0x18] sm:$0xff] %v18934_v30 }
 0x1c3   : > { %257 = vst [vmem:[#allocation3 + $0x20] sm:$0xff] %v18934_v30  ;;  %258 = vst [vmem:[#allocation3 + $0x28] sm:$0xff] %v18934_v30 }
 0x1c4   : > { %259 = vst [vmem:[#allocation3 + $0x30] sm:$0xff] %v18934_v30  ;;  %260 = vst [vmem:[#allocation3 + $0x38] sm:$0xff] %v18934_v30 }
 0x1c5   : > { %16277 = vmatmul.mubr.msk.bf16.gmra.mrb[24].mxu0 %vm421_vm1, %v19085_v54  ;;  %261 = vst [vmem:[#allocation3 + $0x40] sm:$0xff] %v18934_v30  ;;  %262 = vst [vmem:[#allocation3 + $0x48] sm:$0xff] %v18934_v30  ;;  %v14585_v54 = vld [vmem:[%s18984_s24 + $0x1a2] sm:$0xff] }
 0x1c6   : > { %16280 = vmatprep.mubr.msk.bf16.mxu0 %vm421_vm1, %v19325_v33  ;;  %263 = vst [vmem:[#allocation3 + $0x50] sm:$0xff] %v18934_v30  ;;  %264 = vst [vmem:[#allocation3 + $0x58] sm:$0xff] %v18934_v30 }
 0x1c7   : > { %265 = vst [vmem:[#allocation3 + $0x60] sm:$0xff] %v18934_v30  ;;  %266 = vst [vmem:[#allocation3 + $0x68] sm:$0xff] %v18934_v30 }
 0x1c8   : > { %267 = vst [vmem:[#allocation3 + $0x70] sm:$0xff] %v18934_v30  ;;  %268 = vst [vmem:[#allocation3 + $0x78] sm:$0xff] %v18934_v30 }
 0x1c9   : > { %269 = vst [vmem:[#allocation3 + $0x80] sm:$0xff] %v18934_v30  ;;  %270 = vst [vmem:[#allocation3 + $0x88] sm:$0xff] %v18934_v30 }
 0x1ca   : > { %271 = vst [vmem:[#allocation3 + $0x90] sm:$0xff] %v18934_v30  ;;  %272 = vst [vmem:[#allocation3 + $0x98] sm:$0xff] %v18934_v30 }
 0x1cb   : > { %273 = vst [vmem:[#allocation3 + $0xa0] sm:$0xff] %v18934_v30  ;;  %274 = vst [vmem:[#allocation3 + $0xa8] sm:$0xff] %v18934_v30 }
 0x1cc   : > { %275 = vst [vmem:[#allocation3 + $0xb0] sm:$0xff] %v18934_v30  ;;  %276 = vst [vmem:[#allocation3 + $0xb8] sm:$0xff] %v18934_v30 }
 0x1cd   : > { %16281 = vmatmul.mubr.msk.bf16.gmra.mrb[28].mxu0 %vm421_vm1, %v2538_v19  ;;  %277 = vst [vmem:[#allocation3 + $0xc0] sm:$0xff] %v18934_v30  ;;  %278 = vst [vmem:[#allocation3 + $0xc8] sm:$0xff] %v18934_v30 }
 0x1ce   : > { %16286 = vmatprep.mubr.msk.bf16.mxu0 %vm421_vm1, %v19098_v62  ;;  %279 = vst [vmem:[#allocation3 + $0xd0] sm:$0xff] %v18934_v30  ;;  %280 = vst [vmem:[#allocation3 + $0xd8] sm:$0xff] %v18934_v30  ;;  %v3254_v62 = vpack.c.bf16 %v14585_v54, %v14584_v49  ;;  %v18718_v54 = vld [vmem:[%s21197_s2 + $0x58] sm:$0xff]  }
 0x1cf   : > { %281 = vst [vmem:[#allocation3 + $0xe0] sm:$0xff] %v18934_v30  ;;  %282 = vst [vmem:[#allocation3 + $0xe8] sm:$0xff] %v18934_v30 }
 0x1d0   : > { %283 = vst [vmem:[#allocation3 + $0xf0] sm:$0xff] %v18934_v30  ;;  %284 = vst [vmem:[#allocation3 + $0xf8] sm:$0xff] %v18934_v30 }
 0x1d1   : > { %285 = vst [vmem:[#allocation3 + $0x100] sm:$0xff] %v18934_v30  ;;  %286 = vst [vmem:[#allocation3 + $0x108] sm:$0xff] %v18934_v30 }
 0x1d2   : > { %287 = vst [vmem:[#allocation3 + $0x110] sm:$0xff] %v18934_v30  ;;  %288 = vst [vmem:[#allocation3 + $0x118] sm:$0xff] %v18934_v30 }
 0x1d3   : > { %289 = vst [vmem:[#allocation3 + $0x120] sm:$0xff] %v18934_v30  ;;  %290 = vst [vmem:[#allocation3 + $0x128] sm:$0xff] %v18934_v30 }
 0x1d4   : > { %291 = vst [vmem:[#allocation3 + $0x130] sm:$0xff] %v18934_v30  ;;  %292 = vst [vmem:[#allocation3 + $0x138] sm:$0xff] %v18934_v30 }
 0x1d5   : > { %293 = vst [vmem:[#allocation3 + $0x140] sm:$0xff] %v18934_v30  ;;  %294 = vst [vmem:[#allocation3 + $0x148] sm:$0xff] %v18934_v30  ;;  %16287 = vmatmul.mubr.msk.bf16.vlgmr.msra.gmra.mrb[0].mxu0 %vm421_vm1, %v19115_v4  ;;  %v18711_v4 = vld [vmem:[%s21197_s2 + $0x20] sm:$0xff]  }
 0x1d6   : > { %295 = vst [vmem:[#allocation3 + $0x150] sm:$0xff] %v18934_v30  ;;  %296 = vst [vmem:[#allocation3 + $0x158] sm:$0xff] %v18934_v30  ;;  %16319 = vmatpush3.bf16.msra.mxu0 %v3338_v36  ;;  %16290 = vmatprep.mubr.msk.bf16.mxu0 %vm421_vm1, %v19117_v5  ;;  %v18712_v5 = vld [vmem:[%s21197_s2 + $0x28] sm:$0xff]  }
 0x1d7   : > { %297 = vst [vmem:[#allocation3 + $0x160] sm:$0xff] %v18934_v30  ;;  %298 = vst [vmem:[#allocation3 + $0x168] sm:$0xff] %v18934_v30  ;;  %16360 = vmatprep.subr.bf16.mxu1 %v18711_v4 }
 0x1d8   : > { %299 = vst [vmem:[#allocation3 + $0x170] sm:$0xff] %v18934_v30  ;;  %300 = vst [vmem:[#allocation3 + $0x178] sm:$0xff] %v18934_v30  ;;  %16361 = vmatpush3.bf16.msra.mxu1 %v18711_v4 }
 0x1d9   : > { %301 = vst [vmem:[#allocation3 + $0x180] sm:$0xff] %v18934_v30  ;;  %302 = vst [vmem:[#allocation3 + $0x188] sm:$0xff] %v18934_v30  ;;  %16362 = vmatprep.subr.bf16.mxu1 %v18712_v5 }
 0x1da   : > { %303 = vst [vmem:[#allocation3 + $0x190] sm:$0xff] %v18934_v30  ;;  %304 = vst [vmem:[#allocation3 + $0x198] sm:$0xff] %v18934_v30 }
 0x1db   : > { %305 = vst [vmem:[#allocation3 + $0x1a0] sm:$0xff] %v18934_v30  ;;  %306 = vst [vmem:[#allocation3 + $0x1a8] sm:$0xff] %v18934_v30 }
 0x1dc   : > { %16363 = vmatpush3.bf16.msra.mxu1 %v18712_v5 }
 0x1dd   : > { %16291 = vmatmul.mubr.msk.bf16.gmra.mrb[4].mxu0 %vm421_vm1, %v19127_v11  ;;  %v18713_v11 = vld [vmem:[%s21197_s2 + $0x30] sm:$0xff]  }
 0x1de   : > { %16294 = vmatprep.mubr.msk.bf16.mxu0 %vm421_vm1, %v19129_v13  ;;  %16364 = vmatprep.subr.bf16.mxu1 %v18713_v11  ;;  %v18714_v13 = vld [vmem:[%s21197_s2 + $0x38] sm:$0xff]  }
 0x1e0   : > { %16365 = vmatpush3.bf16.msra.mxu1 %v18713_v11 }
 0x1e1   : > { %16366 = vmatprep.subr.bf16.mxu1 %v18714_v13 }
 0x1e4   : > { %16367 = vmatpush3.bf16.msra.mxu1 %v18714_v13 }
 0x1e5   : > { %16295 = vmatmul.mubr.msk.bf16.gmra.mrb[8].mxu0 %vm421_vm1, %v19139_v20  ;;  %v18935_v20 = vmov 0.0|0.0  }
 0x1e6   : > { %16298 = vmatprep.mubr.msk.bf16.mxu0 %vm421_vm1, %v19141_v21  ;;  %16368 = vmatprep.mubr.bf16.mxu1 %v18935_v20  ;;  %v18715_v21 = vld [vmem:[%s21197_s2 + $0x40] sm:$0xff]  }
 0x1e7   : > { %16400 = vmatprep.subr.bf16.mxu1 %v18715_v21 }
 0x1ed   : > { %16299 = vmatmul.mubr.msk.bf16.gmra.mrb[12].mxu0 %vm421_vm1, %v19151_v28  ;;  %v19666_v28 = vld [vmem:[%s21198_s3] ss:$0 sm:$0xff] }
 0x1ee   : > { %16302 = vmatprep.mubr.msk.bf16.mxu0 %vm421_vm1, %v19153_v29 }
 0x1f5   : > { %16303 = vmatmul.mubr.msk.bf16.gmra.mrb[16].mxu0 %vm421_vm1, %v19163_v38 }
 0x1f6   : > { %16306 = vmatprep.mubr.msk.bf16.mxu0 %vm421_vm1, %v19165_v39 }
 0x1fd   : > { %16307 = vmatmul.mubr.msk.bf16.gmra.mrb[20].mxu0 %vm421_vm1, %v19175_v46 }
 0x1fe   : > { %16310 = vmatprep.mubr.msk.bf16.mxu0 %vm421_vm1, %v19177_v47 }
 0x205   : > { %16311 = vmatmul.mubr.msk.bf16.gmra.mrb[24].mxu0 %vm421_vm1, %v19187_v55 }
 0x206   : > { %16314 = vmatprep.mubr.msk.bf16.mxu0 %vm421_vm1, %v19366_v45 }
 0x20d   : > { %16315 = vmatmul.mubr.msk.bf16.gmra.mrb[28].mxu0 %vm421_vm1, %v2896_v48 }
 0x20e   : > { %16320 = vmatprep.mubr.msk.bf16.mxu0 %vm421_vm1, %v19200_v2 }
 0x215   : > { %16321 = vmatmul.mubr.msk.bf16.vlgmr.msra.gmra.mrb[0].mxu0 %vm421_vm1, %v19214_v9 }
 0x216   : > { %16324 = vmatprep.mubr.msk.bf16.mxu0 %vm421_vm1, %v19216_v14 }
 0x21d   : > { %16325 = vmatmul.mubr.msk.bf16.gmra.mrb[4].mxu0 %vm421_vm1, %v19226_v23 }
 0x21e   : > { %16328 = vmatprep.mubr.msk.bf16.mxu0 %vm421_vm1, %v19228_v26 }
 0x225   : > { %16329 = vmatmul.mubr.msk.bf16.gmra.mrb[8].mxu0 %vm421_vm1, %v19238_v35 }
 0x226   : > { %16332 = vmatprep.mubr.msk.bf16.mxu0 %vm421_vm1, %v19240_v40 }
 0x22d   : > { %16333 = vmatmul.mubr.msk.bf16.gmra.mrb[12].mxu0 %vm421_vm1, %v19250_v51 }
 0x22e   : > { %16336 = vmatprep.mubr.msk.bf16.mxu0 %vm421_vm1, %v19252_v52 }
 0x235   : > { %16337 = vmatmul.mubr.msk.bf16.gmra.mrb[16].mxu0 %vm421_vm1, %v19262_v59 }
 0x236   : > { %16340 = vmatprep.mubr.msk.bf16.mxu0 %vm421_vm1, %v19264_v60 }
 0x23d   : > { %16341 = vmatmul.mubr.msk.bf16.gmra.mrb[20].mxu0 %vm421_vm1, %v19274_v63 }
 0x23e   : > { %16344 = vmatprep.mubr.msk.bf16.mxu0 %vm421_vm1, %v19276_v15 }
 0x245   : > { %16345 = vmatmul.mubr.msk.bf16.gmra.mrb[24].mxu0 %vm421_vm1, %v19284_v22 }
 0x246   : > { %16348 = vmatprep.mubr.msk.bf16.mxu0 %vm421_vm1, %v19407_v57 }
 0x24d   : > { %16349 = vmatmul.mubr.msk.bf16.gmra.mrb[28].mxu0 %vm421_vm1, %v3254_v62 }
 0x2e8   : > { %v16322_v29 = vpop.f32.mrb[0].mxu0 }
 0x2e9   : > { %v3605_v38 = vadd.f32 %v16322_v29, %v19666_v28  ;;  %v3374_v39 = vpop.f32.mrb[1].mxu0 }
 0x2ea   : > { %v3603_v46 = vadd.f32 %v19666_v28, %v3374_v39  ;;  %v16323_v47 = vpop.f32.mrb[2].mxu0 }
 0x2eb   : > { %v3637_v55 = vmax.f32 %v3605_v38, 0.0  ;;  %v3606_v2 = vadd.f32 %v16323_v47, %v19666_v28  ;;  %v3377_v9 = vpop.f32.mrb[3].mxu0  ;;  %v18719_v47 = vld [vmem:[%s21197_s2 + $0x60] sm:$0xff]  }
 0x2ec   : > { %v3635_v14 = vmax.f32 %v3603_v46, 0.0  ;;  %v3604_v23 = vadd.f32 %v19666_v28, %v3377_v9 }
 0x2ed   : > { %3670 = vst [vmem:[#allocation2 + $0x31] sm:$0xff] %v3637_v55  ;;  %v3638_v26 = vmax.f32 %v3606_v2, 0.0 }
 0x2ee   : > { %3668 = vst [vmem:[#allocation2 + $0x19] sm:$0xff] %v3635_v14  ;;  %v3636_v35 = vmax.f32 %v3604_v23, 0.0 }
 0x2ef   : > { %3671 = vst [vmem:[#allocation2 + $0x39] sm:$0xff] %v3638_v26  ;;  %v19672_v40 = vpack.c.bf16 %v3638_v26, %v3637_v55 }
 0x2f0   : > { %3669 = vst [vmem:[#allocation2 + $0x21] sm:$0xff] %v3636_v35  ;;  %v16326_v51 = vpop.f32.mrb[4].mxu0  ;;  %v19674_v52 = vpack.c.bf16 %v3636_v35, %v3635_v14 }
 0x2f1   : > { %v3609_v59 = vadd.f32 %v16326_v51, %v19666_v28  ;;  %v3390_v60 = vpop.f32.mrb[5].mxu0 }
 0x2f2   : > { %v3607_v6 = vadd.f32 %v19666_v28, %v3390_v60  ;;  %v16327_v7 = vpop.f32.mrb[6].mxu0  ;;  %v18720_v60 = vld [vmem:[%s21197_s2 + $0x68] sm:$0xff]  }
 0x2f3   : > { %v3641_v8 = vmax.f32 %v3609_v59, 0.0  ;;  %v3610_v63 = vadd.f32 %v16327_v7, %v19666_v28  ;;  %v3393_v15 = vpop.f32.mrb[7].mxu0 }
 0x2f4   : > { %v3639_v16 = vmax.f32 %v3607_v6, 0.0  ;;  %v3608_v17 = vadd.f32 %v19666_v28, %v3393_v15  ;;  %v3738_v61 = vld [vmem:[#allocation2 + $0x30] sm:$0xff] }
 0x2f5   : > { %3674 = vst [vmem:[#allocation2 + $0x61] sm:$0xff] %v3641_v8  ;;  %v3642_v22 = vmax.f32 %v3610_v63, 0.0  ;;  %v3736_v10 = vld [vmem:[#allocation2 + $0x18] sm:$0xff] }
 0x2f6   : > { %3672 = vst [vmem:[#allocation2 + $0x49] sm:$0xff] %v3639_v16  ;;  %v3640_v27 = vmax.f32 %v3608_v17, 0.0  ;;  %v3739_v32 = vld [vmem:[#allocation2 + $0x38] sm:$0xff] }
 0x2f7   : > { %3675 = vst [vmem:[#allocation2 + $0x69] sm:$0xff] %v3642_v22  ;;  %v3737_v3 = vld [vmem:[#allocation2 + $0x20] sm:$0xff]  ;;  %v19680_v33 = vpack.c.bf16 %v3642_v22, %v3641_v8  ;;  %v19690_v1 = vpack.c.bf16 %v3739_v32, %v3738_v61 }
 0x2f8   : > { %3673 = vst [vmem:[#allocation2 + $0x51] sm:$0xff] %v3640_v27  ;;  %v16330_v34 = vpop.f32.mrb[8].mxu0  ;;  %v19682_v41 = vpack.c.bf16 %v3737_v3, %v3736_v10  ;;  %v19687_v45 = vpack.c.bf16 %v3640_v27, %v3639_v16  ;;  %v18721_v3 = vld [vmem:[%s21197_s2 + $0x70] sm:$0xff]  }
 0x2f9   : > { %v3613_v50 = vadd.f32 %v16330_v34, %v19666_v28  ;;  %v3406_v53 = vpop.f32.mrb[9].mxu0 }
 0x2fa   : > { %v3611_v56 = vadd.f32 %v19666_v28, %v3406_v53  ;;  %v16331_v57 = vpop.f32.mrb[10].mxu0  ;;  %16369 = vmatmul.mubr.bf16.vlgmr.msra.gmra.mrb[0].mxu1 %v19682_v41 }
 0x2fb   : > { %v3645_v58 = vmax.f32 %v3613_v50, 0.0  ;;  %v3614_v0 = vadd.f32 %v16331_v57, %v19666_v28  ;;  %16401 = vmatpush3.bf16.msra.mxu1 %v18715_v21  ;;  %v3409_v12 = vpop.f32.mrb[11].mxu0  ;;  %16372 = vmatprep.mubr.bf16.mxu1 %v19690_v1 }
 0x2fc   : > { %v3643_v18 = vmax.f32 %v3611_v56, 0.0  ;;  %v3612_v19 = vadd.f32 %v19666_v28, %v3409_v12  ;;  %16402 = vmatprep.subr.bf16.mxu1 %v18716_v44  ;;  %v3742_v49 = vld [vmem:[#allocation2 + $0x60] sm:$0xff]  ;;  %v18722_v12 = vld [vmem:[%s21197_s2 + $0x78] sm:$0xff]  }
 0x2fd   : > { %3678 = vst [vmem:[#allocation2 + $0x91] sm:$0xff] %v3645_v58  ;;  %v3646_v25 = vmax.f32 %v3614_v0, 0.0  ;;  %v3740_v36 = vld [vmem:[#allocation2 + $0x48] sm:$0xff] }
 0x2fe   : > { %3676 = vst [vmem:[#allocation2 + $0x79] sm:$0xff] %v3643_v18  ;;  %v19700_v30 = vmax.f32 %v3612_v19, 0.0  ;;  %v3743_v31 = vld [vmem:[#allocation2 + $0x68] sm:$0xff] }
 0x2ff   : > { %3679 = vst [vmem:[#allocation2 + $0x99] sm:$0xff] %v3646_v25  ;;  %v3741_v37 = vld [vmem:[#allocation2 + $0x50] sm:$0xff]  ;;  %16403 = vmatpush3.bf16.msra.mxu1 %v18716_v44  ;;  %v19702_v42 = vpack.c.bf16 %v3646_v25, %v3645_v58  ;;  %v19714_v11 = vpack.c.bf16 %v3743_v31, %v3742_v49 }
 0x300   : > { %3677 = vst [vmem:[#allocation2 + $0x81] sm:$0xff] %v19700_v30  ;;  %v16334_v43 = vpop.f32.mrb[12].mxu0  ;;  %v19705_v48 = vpack.c.bf16 %v3741_v37, %v3740_v36  ;;  %16404 = vmatprep.subr.bf16.mxu1 %v18717_v24  ;;  %v19711_v62 = vpack.c.bf16 %v19700_v30, %v3643_v18 }
 0x301   : > { %v3617_v4 = vadd.f32 %v16334_v43, %v19666_v28  ;;  %v3422_v5 = vpop.f32.mrb[13].mxu0 }
 0x302   : > { %v3615_v13 = vadd.f32 %v19666_v28, %v3422_v5  ;;  %v16335_v20 = vpop.f32.mrb[14].mxu0  ;;  %16373 = vmatmul.mubr.bf16.gmra.mrb[4].mxu1 %v19705_v48  ;;  %v19768_v5 = vld [vmem:[%s21197_s2 + $0x80] sm:$0xff]  }
 0x303   : > { %v3649_v21 = vmax.f32 %v3617_v4, 0.0  ;;  %v3618_v29 = vadd.f32 %v16335_v20, %v19666_v28  ;;  %v3425_v38 = vpop.f32.mrb[15].mxu0  ;;  %16376 = vmatprep.mubr.bf16.mxu1 %v19714_v11  ;;  %16405 = vmatpush3.bf16.msra.mxu1 %v18717_v24 }
 0x304   : > { %v3647_v39 = vmax.f32 %v3615_v13, 0.0  ;;  %v3616_v46 = vadd.f32 %v19666_v28, %v3425_v38  ;;  %16406 = vmatprep.subr.bf16.mxu1 %v18718_v54  ;;  %v3746_v59 = vld [vmem:[#allocation2 + $0x90] sm:$0xff] }
 0x305   : > { %3682 = vst [vmem:[#allocation2 + $0xc1] sm:$0xff] %v3649_v21  ;;  %v19724_v55 = vmax.f32 %v3618_v29, 0.0  ;;  %v3744_v14 = vld [vmem:[#allocation2 + $0x78] sm:$0xff] }
 0x306   : > { %3680 = vst [vmem:[#allocation2 + $0xa9] sm:$0xff] %v3647_v39  ;;  %v3648_v2 = vmax.f32 %v3616_v46, 0.0  ;;  %v3747_v9 = vld [vmem:[#allocation2 + $0x98] sm:$0xff] }
 0x307   : > { %3683 = vst [vmem:[#allocation2 + $0xc9] sm:$0xff] %v19724_v55  ;;  %v3745_v23 = vld [vmem:[#allocation2 + $0x80] sm:$0xff]  ;;  %16407 = vmatpush3.bf16.msra.mxu1 %v18718_v54  ;;  %v19728_v26 = vpack.c.bf16 %v19724_v55, %v3649_v21  ;;  %v19738_v63 = vpack.c.bf16 %v3747_v9, %v3746_v59 }
 0x308   : > { %3681 = vst [vmem:[#allocation2 + $0xb1] sm:$0xff] %v3648_v2  ;;  %v16338_v35 = vpop.f32.mrb[16].mxu0  ;;  %v19730_v51 = vpack.c.bf16 %v3745_v23, %v3744_v14  ;;  %16408 = vmatprep.subr.bf16.mxu1 %v18719_v47  ;;  %v19735_v6 = vpack.c.bf16 %v3648_v2, %v3647_v39 }
 0x309   : > { %v3621_v7 = vadd.f32 %v16338_v35, %v19666_v28  ;;  %v3438_v8 = vpop.f32.mrb[17].mxu0 }
 0x30a   : > { %v3619_v15 = vadd.f32 %v19666_v28, %v3438_v8  ;;  %v16339_v16 = vpop.f32.mrb[18].mxu0  ;;  %16377 = vmatmul.mubr.bf16.gmra.mrb[8].mxu1 %v19730_v51 }
 0x30b   : > { %v3653_v17 = vmax.f32 %v3621_v7, 0.0  ;;  %v3622_v22 = vadd.f32 %v16339_v16, %v19666_v28  ;;  %v3441_v27 = vpop.f32.mrb[19].mxu0  ;;  %16380 = vmatprep.mubr.bf16.mxu1 %v19738_v63  ;;  %16409 = vmatpush3.bf16.msra.mxu1 %v18719_v47 }
 0x30c   : > { %v3651_v32 = vmax.f32 %v3619_v15, 0.0  ;;  %v3620_v10 = vadd.f32 %v19666_v28, %v3441_v27  ;;  %16410 = vmatprep.subr.bf16.mxu1 %v18720_v60  ;;  %v3750_v0 = vld [vmem:[#allocation2 + $0xc0] sm:$0xff] }
 0x30d   : > { %3686 = vst [vmem:[#allocation2 + $0xf1] sm:$0xff] %v3653_v17  ;;  %v3654_v34 = vmax.f32 %v3622_v22, 0.0  ;;  %v3748_v50 = vld [vmem:[#allocation2 + $0xa8] sm:$0xff] }
 0x30e   : > { %3684 = vst [vmem:[#allocation2 + $0xd9] sm:$0xff] %v3651_v32  ;;  %v3652_v61 = vmax.f32 %v3620_v10, 0.0  ;;  %v3751_v44 = vld [vmem:[#allocation2 + $0xc8] sm:$0xff] }
 0x30f   : > { %3687 = vst [vmem:[#allocation2 + $0xf9] sm:$0xff] %v3654_v34  ;;  %v3749_v53 = vld [vmem:[#allocation2 + $0xb0] sm:$0xff]  ;;  %16411 = vmatpush3.bf16.msra.mxu1 %v18720_v60  ;;  %v19748_v56 = vpack.c.bf16 %v3654_v34, %v3653_v17  ;;  %v19758_v25 = vpack.c.bf16 %v3751_v44, %v3750_v0 }
 0x310   : > { %3685 = vst [vmem:[#allocation2 + $0xe1] sm:$0xff] %v3652_v61  ;;  %v16342_v57 = vpop.f32.mrb[20].mxu0  ;;  %v19750_v58 = vpack.c.bf16 %v3749_v53, %v3748_v50  ;;  %16412 = vmatprep.subr.bf16.mxu1 %v18721_v3  ;;  %v19755_v18 = vpack.c.bf16 %v3652_v61, %v3651_v32 }
 0x311   : > { %v3625_v19 = vadd.f32 %v16342_v57, %v19666_v28  ;;  %v3454_v24 = vpop.f32.mrb[21].mxu0 }
 0x312   : > { %v3623_v31 = vadd.f32 %v19666_v28, %v3454_v24  ;;  %v16343_v36 = vpop.f32.mrb[22].mxu0  ;;  %16381 = vmatmul.mubr.bf16.gmra.mrb[12].mxu1 %v19750_v58 }
 0x313   : > { %v3657_v37 = vmax.f32 %v3625_v19, 0.0  ;;  %v3626_v43 = vadd.f32 %v16343_v36, %v19666_v28  ;;  %v3457_v49 = vpop.f32.mrb[23].mxu0  ;;  %16384 = vmatprep.mubr.bf16.mxu1 %v19758_v25  ;;  %16413 = vmatpush3.bf16.msra.mxu1 %v18721_v3 }
 0x314   : > { %v3655_v54 = vmax.f32 %v3623_v31, 0.0  ;;  %v3624_v4 = vadd.f32 %v19666_v28, %v3457_v49  ;;  %16414 = vmatprep.subr.bf16.mxu1 %v18722_v12  ;;  %v3754_v2 = vld [vmem:[#allocation2 + $0xf0] sm:$0xff] }
 0x315   : > { %3690 = vst [vmem:[#allocation2 + $0x121] sm:$0xff] %v3657_v37  ;;  %v3658_v13 = vmax.f32 %v3626_v43, 0.0  ;;  %v3752_v29 = vld [vmem:[#allocation2 + $0xd8] sm:$0xff] }
 0x316   : > { %3688 = vst [vmem:[#allocation2 + $0x109] sm:$0xff] %v3655_v54  ;;  %v3656_v20 = vmax.f32 %v3624_v4, 0.0  ;;  %v3755_v21 = vld [vmem:[#allocation2 + $0xf8] sm:$0xff] }
 0x317   : > { %3691 = vst [vmem:[#allocation2 + $0x129] sm:$0xff] %v3658_v13  ;;  %v3753_v38 = vld [vmem:[#allocation2 + $0xe0] sm:$0xff]  ;;  %16415 = vmatpush3.bf16.msra.mxu1 %v18722_v12  ;;  %v19770_v39 = vpack.c.bf16 %v3658_v13, %v3657_v37  ;;  %v19778_v35 = vpack.c.bf16 %v3755_v21, %v3754_v2 }
 0x318   : > { %3689 = vst [vmem:[#allocation2 + $0x111] sm:$0xff] %v3656_v20  ;;  %v16346_v46 = vpop.f32.mrb[24].mxu0  ;;  %v19772_v47 = vpack.c.bf16 %v3753_v38, %v3752_v29  ;;  %16448 = vmatprep.subr.bf16.mxu1 %v19768_v5  ;;  %v19775_v9 = vpack.c.bf16 %v3656_v20, %v3655_v54 }
 0x319   : > { %v3629_v14 = vadd.f32 %v16346_v46, %v19666_v28  ;;  %v3470_v23 = vpop.f32.mrb[25].mxu0 }
 0x31a   : > { %v3627_v59 = vadd.f32 %v19666_v28, %v3470_v23  ;;  %v16347_v60 = vpop.f32.mrb[26].mxu0  ;;  %16385 = vmatmul.mubr.bf16.gmra.mrb[16].mxu1 %v19772_v47  ;;  %v4104_v23 = vld [vmem:[#allocation2 + $0x9] sm:$0xff] }
 0x31b   : > { %v3661_v7 = vmax.f32 %v3629_v14, 0.0  ;;  %v3630_v8 = vadd.f32 %v16347_v60, %v19666_v28  ;;  %v3473_v15 = vpop.f32.mrb[27].mxu0  ;;  %16388 = vmatprep.mubr.bf16.mxu1 %v19778_v35 }
 0x31c   : > { %v3659_v16 = vmax.f32 %v3627_v59, 0.0  ;;  %v3628_v17 = vadd.f32 %v19666_v28, %v3473_v15  ;;  %v3758_v50 = vld [vmem:[#allocation2 + $0x120] sm:$0xff]  ;;  %v18724_v15 = vld [vmem:[%s21197_s2 + $0x88] sm:$0xff]  }
 0x31d   : > { %3694 = vst [vmem:[#allocation2 + $0x151] sm:$0xff] %v3661_v7  ;;  %v3662_v22 = vmax.f32 %v3630_v8, 0.0  ;;  %v3756_v10 = vld [vmem:[#allocation2 + $0x108] sm:$0xff] }
 0x31e   : > { %3692 = vst [vmem:[#allocation2 + $0x139] sm:$0xff] %v3659_v16  ;;  %v3660_v27 = vmax.f32 %v3628_v17, 0.0  ;;  %v3759_v32 = vld [vmem:[#allocation2 + $0x128] sm:$0xff]  ;;  %v18726_v17 = vld [vmem:[%s21197_s2 + $0x98] sm:$0xff]  }
 0x31f   : > { %3695 = vst [vmem:[#allocation2 + $0x159] sm:$0xff] %v3662_v22  ;;  %v3757_v3 = vld [vmem:[#allocation2 + $0x110] sm:$0xff]  ;;  %v19785_v34 = vpack.c.bf16 %v3662_v22, %v3661_v7  ;;  %v19792_v12 = vpack.c.bf16 %v3759_v32, %v3758_v50  ;;  %v4475_v22 = vld [vmem:[#allocation2 + $0x1a] sm:$0xff] }
 0x320   : > { %3693 = vst [vmem:[#allocation2 + $0x141] sm:$0xff] %v3660_v27  ;;  %v16350_v61 = vpop.f32.mrb[28].mxu0  ;;  %v19787_v44 = vpack.c.bf16 %v3757_v3, %v3756_v10  ;;  %v19789_v53 = vpack.c.bf16 %v3660_v27, %v3659_v16  ;;  %v18725_v16 = vld [vmem:[%s21197_s2 + $0x90] sm:$0xff]   ;;  %v4476_v27 = vld [vmem:[#allocation2 + $0x22] sm:$0xff]  ;;  %v4478_v10 = vld [vmem:[#allocation2 + $0x3a] sm:$0xff] }
 0x321   : > { %v3633_v57 = vadd.f32 %v16350_v61, %v19666_v28  ;;  %v3486_v0 = vpop.f32.mrb[29].mxu0  ;;  %v4477_v32 = vld [vmem:[#allocation2 + $0x32] sm:$0xff]  ;;  %v19852_v3 = vpack.c.bf16 %v4476_v27, %v4475_v22  ;;  %v18732_v61 = vld [vmem:[%s21197_s2 + $0xc8] sm:$0xff]  }
 0x322   : > { %v3631_v19 = vadd.f32 %v19666_v28, %v3486_v0  ;;  %v16351_v24 = vpop.f32.mrb[30].mxu0  ;;  %16389 = vmatmul.mubr.bf16.gmra.mrb[20].mxu1 %v19787_v44  ;;  %v19857_v50 = vpack.c.bf16 %v4478_v10, %v4477_v32  ;;  %v4479_v0 = vld [vmem:[#allocation2 + $0x4a] sm:$0xff]  ;;  %v4496_v27 = vld [vmem:[#allocation2 + $0x112] sm:$0xff]  ;;  %v4497_v32 = vld [vmem:[#allocation2 + $0x122] sm:$0xff] }
 0x323   : > { %v3665_v31 = vmax.f32 %v3633_v57, 0.0  ;;  %v3634_v36 = vadd.f32 %v16351_v24, %v19666_v28  ;;  %v3489_v37 = vpop.f32.mrb[31].mxu0  ;;  %16392 = vmatprep.mubr.bf16.mxu1 %v19792_v12  ;;  %v18733_v57 = vld [vmem:[%s21197_s2 + $0xd0] sm:$0xff]   ;;  %v4481_v24 = vld [vmem:[#allocation2 + $0x62] sm:$0xff] }
 0x324   : > { %v3663_v43 = vmax.f32 %v3631_v19, 0.0  ;;  %v3632_v49 = vadd.f32 %v19666_v28, %v3489_v37  ;;  %v3762_v46 = vld [vmem:[#allocation2 + $0x150] sm:$0xff]  ;;  %v4103_v28 = vld [vmem:[#allocation2 + $0x1] sm:$0xff]  ;;  %v18734_v37 = vld [vmem:[%s21197_s2 + $0xd8] sm:$0xff]  }
 0x325   : > { %3698 = vst [vmem:[#allocation2 + $0x181] sm:$0xff] %v3665_v31  ;;  %v3666_v54 = vmax.f32 %v3634_v36, 0.0  ;;  %v3760_v20 = vld [vmem:[#allocation2 + $0x138] sm:$0xff]  ;;  %v4135_v7 = vpack.c.bf16 %v4104_v23, %v4103_v28  ;;  %v18737_v23 = vld [vmem:[%s21197_s2 + $0xf0] sm:$0xff]  }
 0x326   : > { %3696 = vst [vmem:[#allocation2 + $0x169] sm:$0xff] %v3663_v43  ;;  %v3664_v4 = vmax.f32 %v3632_v49, 0.0  ;;  %v3763_v13 = vld [vmem:[#allocation2 + $0x158] sm:$0xff]  ;;  %v18735_v49 = vld [vmem:[%s21197_s2 + $0xe0] sm:$0xff]   ;;  %v4495_v22 = vld [vmem:[#allocation2 + $0x10a] sm:$0xff] }
 0x327   : > { %3699 = vst [vmem:[#allocation2 + $0x189] sm:$0xff] %v3666_v54  ;;  %v3761_v21 = vld [vmem:[#allocation2 + $0x140] sm:$0xff]  ;;  %v19799_v29 = vpack.c.bf16 %v3666_v54, %v3665_v31  ;;  %v19805_v14 = vpack.c.bf16 %v3763_v13, %v3762_v46  ;;  %v4480_v19 = vld [vmem:[#allocation2 + $0x52] sm:$0xff]  ;;  %v4482_v31 = vld [vmem:[#allocation2 + $0x6a] sm:$0xff] }
 0x328   : > { %3697 = vst [vmem:[#allocation2 + $0x171] sm:$0xff] %v3664_v4  ;;  %v19801_v38 = vpack.c.bf16 %v3761_v21, %v3760_v20  ;;  %v19803_v2 = vpack.c.bf16 %v3664_v4, %v3663_v43  ;;  %v19864_v36 = vpack.c.bf16 %v4480_v19, %v4479_v0  ;;  %v19869_v43 = vpack.c.bf16 %v4482_v31, %v4481_v24  ;;  %v4483_v54 = vld [vmem:[#allocation2 + $0x7a] sm:$0xff]  ;;  %v4484_v4 = vld [vmem:[#allocation2 + $0x82] sm:$0xff]  ;;  %v4485_v13 = vld [vmem:[#allocation2 + $0x92] sm:$0xff] }
 0x329   : > { %v4486_v20 = vld [vmem:[#allocation2 + $0x9a] sm:$0xff]  ;;  %v19876_v21 = vpack.c.bf16 %v4484_v4, %v4483_v54  ;;  %v18736_v46 = vld [vmem:[%s21197_s2 + $0xe8] sm:$0xff]   ;;  %v4501_v24 = vld [vmem:[#allocation2 + $0x152] sm:$0xff] }
 0x32a   : > { %16393 = vmatmul.mubr.bf16.gmra.mrb[24].mxu1 %v19801_v38  ;;  %v19881_v28 = vpack.c.bf16 %v4486_v20, %v4485_v13  ;;  %v4498_v10 = vld [vmem:[#allocation2 + $0x12a] sm:$0xff]  ;;  %v4499_v0 = vld [vmem:[#allocation2 + $0x13a] sm:$0xff]  ;;  %v4500_v19 = vld [vmem:[#allocation2 + $0x142] sm:$0xff] }
 0x32b   : > { %16396 = vmatprep.mubr.bf16.mxu1 %v19805_v14  ;;  %v4502_v31 = vld [vmem:[#allocation2 + $0x15a] sm:$0xff]  ;;  %v18740_v20 = vld [vmem:[%s21197_s2 + $0x108] sm:$0xff]  }
 0x32d   : > { %v3764_v59 = vld [vmem:[#allocation2 + $0x168] sm:$0xff] }
 0x32f   : > { %v3765_v60 = vld [vmem:[#allocation2 + $0x170] sm:$0xff] }
 0x330   : > { %v19809_v8 = vpack.c.bf16 %v3765_v60, %v3764_v59  ;;  %v4487_v59 = vld [vmem:[#allocation2 + $0xaa] sm:$0xff]  ;;  %v4488_v60 = vld [vmem:[#allocation2 + $0xb2] sm:$0xff] }
 0x331   : > { %v4503_v54 = vld [vmem:[#allocation2 + $0x16a] sm:$0xff]  ;;  %v4504_v4 = vld [vmem:[#allocation2 + $0x172] sm:$0xff] }
 0x332   : > { %16397 = vmatmul.mubr.bf16.gmra.mrb[28].mxu1 %v19809_v8  ;;  %v19918_v13 = vpack.c.bf16 %v4504_v4, %v4503_v54  ;;  %v18765_v54 = vld [vmem:[%s21197_s2 + $0x1d0] sm:$0xff]   ;;  %v5961_v4 = vld [vmem:[#allocation2 + $0x80] sm:$0xff] }
 0x333   : > { %16416 = vmatprep.mubr.bf16.mxu1 %v4135_v7  ;;  %v4489_v7 = vld [vmem:[#allocation2 + $0xc2] sm:$0xff] }
 0x33a   : > { %16417 = vmatmul.mubr.bf16.vlgmr.msra.gmra.mrb[0].mxu1 %v19674_v52  ;;  %v18728_v52 = vld [vmem:[%s21197_s2 + $0xa8] sm:$0xff]  }
 0x33b   : > { %16449 = vmatpush3.bf16.msra.mxu1 %v19768_v5  ;;  %16420 = vmatprep.mubr.bf16.mxu1 %v19672_v40  ;;  %v18727_v40 = vld [vmem:[%s21197_s2 + $0xa0] sm:$0xff]  }
 0x33c   : > { %16450 = vmatprep.subr.bf16.mxu1 %v18724_v15 }
 0x33f   : > { %16451 = vmatpush3.bf16.msra.mxu1 %v18724_v15  ;;  %v4490_v15 = vld [vmem:[#allocation2 + $0xca] sm:$0xff] }
 0x340   : > { %16452 = vmatprep.subr.bf16.mxu1 %v18725_v16 }
 0x342   : > { %16421 = vmatmul.mubr.bf16.gmra.mrb[4].mxu1 %v19687_v45  ;;  %v18730_v45 = vld [vmem:[%s21197_s2 + $0xb8] sm:$0xff]  }
 0x343   : > { %16424 = vmatprep.mubr.bf16.mxu1 %v19680_v33  ;;  %16453 = vmatpush3.bf16.msra.mxu1 %v18725_v16  ;;  %v18729_v33 = vld [vmem:[%s21197_s2 + $0xb0] sm:$0xff]   ;;  %v19888_v16 = vpack.c.bf16 %v4488_v60, %v4487_v59  ;;  %v5213_v59 = vld [vmem:[#allocation2 + $0x19] sm:$0xff] }
 0x344   : > { %16454 = vmatprep.subr.bf16.mxu1 %v18726_v17 }
 0x347   : > { %16455 = vmatpush3.bf16.msra.mxu1 %v18726_v17  ;;  %v18738_v17 = vld [vmem:[%s21197_s2 + $0xf8] sm:$0xff]  }
 0x348   : > { %16456 = vmatprep.subr.bf16.mxu1 %v18727_v40 }
 0x34a   : > { %16425 = vmatmul.mubr.bf16.gmra.mrb[8].mxu1 %v19711_v62  ;;  %v4473_v62 = vld [vmem:[#allocation2 + $0x2] sm:$0xff] }
 0x34b   : > { %16428 = vmatprep.mubr.bf16.mxu1 %v19702_v42  ;;  %16457 = vmatpush3.bf16.msra.mxu1 %v18727_v40  ;;  %v18731_v42 = vld [vmem:[%s21197_s2 + $0xc0] sm:$0xff]   ;;  %v19893_v40 = vpack.c.bf16 %v4490_v15, %v4489_v7  ;;  %v5215_v7 = vld [vmem:[#allocation2 + $0x31] sm:$0xff] }
 0x34c   : > { %16458 = vmatprep.subr.bf16.mxu1 %v18728_v52  ;;  %v18749_v15 = vld [vmem:[%s21197_s2 + $0x150] sm:$0xff]  }
 0x34f   : > { %16459 = vmatpush3.bf16.msra.mxu1 %v18728_v52  ;;  %v18739_v52 = vld [vmem:[%s21197_s2 + $0x100] sm:$0xff]  }
 0x350   : > { %16460 = vmatprep.subr.bf16.mxu1 %v18729_v33 }
 0x352   : > { %16429 = vmatmul.mubr.bf16.gmra.mrb[12].mxu1 %v19735_v6 }
 0x353   : > { %16432 = vmatprep.mubr.bf16.mxu1 %v19728_v26  ;;  %16461 = vmatpush3.bf16.msra.mxu1 %v18729_v33  ;;  %v4474_v26 = vld [vmem:[#allocation2 + $0xa] sm:$0xff]  ;;  %v4491_v33 = vld [vmem:[#allocation2 + $0xda] sm:$0xff] }
 0x354   : > { %16462 = vmatprep.subr.bf16.mxu1 %v18730_v45  ;;  %v4505_v5 = vpack.c.bf16 %v4474_v26, %v4473_v62  ;;  %v4494_v62 = vld [vmem:[#allocation2 + $0xfa] sm:$0xff] }
 0x357   : > { %16463 = vmatpush3.bf16.msra.mxu1 %v18730_v45  ;;  %v4492_v45 = vld [vmem:[#allocation2 + $0xe2] sm:$0xff] }
 0x358   : > { %16496 = vmatprep.subr.bf16.mxu1 %v18731_v42  ;;  %v19900_v26 = vpack.c.bf16 %v4492_v45, %v4491_v33  ;;  %v5219_v33 = vld [vmem:[#allocation2 + $0x61] sm:$0xff] }
 0x35a   : > { %16433 = vmatmul.mubr.bf16.gmra.mrb[16].mxu1 %v19755_v18 }
 0x35b   : > { %16436 = vmatprep.mubr.bf16.mxu1 %v19748_v56 }
 0x362   : > { %16437 = vmatmul.mubr.bf16.gmra.mrb[20].mxu1 %v19775_v9 }
 0x363   : > { %16440 = vmatprep.mubr.bf16.mxu1 %v19770_v39 }
 0x36a   : > { %16441 = vmatmul.mubr.bf16.gmra.mrb[24].mxu1 %v19789_v53 }
 0x36b   : > { %16444 = vmatprep.mubr.bf16.mxu1 %v19785_v34 }
 0x372   : > { %16445 = vmatmul.mubr.bf16.gmra.mrb[28].mxu1 %v19803_v2 }
 0x373   : > { %16464 = vmatprep.mubr.bf16.mxu1 %v4505_v5 }
 0x37a   : > { %16465 = vmatmul.mubr.bf16.vlgmr.msra.gmra.mrb[0].mxu1 %v19852_v3 }
 0x37b   : > { %16497 = vmatpush3.bf16.msra.mxu1 %v18731_v42  ;;  %16468 = vmatprep.mubr.bf16.mxu1 %v19857_v50  ;;  %v4493_v42 = vld [vmem:[#allocation2 + $0xf2] sm:$0xff] }
 0x37c   : > { %16498 = vmatprep.subr.bf16.mxu1 %v18732_v61  ;;  %v19902_v5 = vpack.c.bf16 %v4494_v62, %v4493_v42  ;;  %v18750_v42 = vld [vmem:[%s21197_s2 + $0x158] sm:$0xff]  }
 0x37f   : > { %16499 = vmatpush3.bf16.msra.mxu1 %v18732_v61  ;;  %v19906_v61 = vpack.c.bf16 %v4496_v27, %v4495_v22  ;;  %v18751_v22 = vld [vmem:[%s21197_s2 + $0x160] sm:$0xff]  }
 0x380   : > { %16500 = vmatprep.subr.bf16.mxu1 %v18733_v57  ;;  %v5224_v27 = vld [vmem:[#allocation2 + $0x99] sm:$0xff] }
 0x382   : > { %16469 = vmatmul.mubr.bf16.gmra.mrb[4].mxu1 %v19864_v36 }
 0x383   : > { %16472 = vmatprep.mubr.bf16.mxu1 %v19869_v43  ;;  %16501 = vmatpush3.bf16.msra.mxu1 %v18733_v57  ;;  %v19908_v57 = vpack.c.bf16 %v4498_v10, %v4497_v32  ;;  %v5223_v32 = vld [vmem:[#allocation2 + $0x91] sm:$0xff] }
 0x384   : > { %16502 = vmatprep.subr.bf16.mxu1 %v18734_v37  ;;  %v19988_v10 = vpack.c.bf16 %v5224_v27, %v5223_v32  ;;  %v5972_v27 = vld [vmem:[#allocation2 + $0x108] sm:$0xff] }
 0x387   : > { %16503 = vmatpush3.bf16.msra.mxu1 %v18734_v37  ;;  %v19912_v37 = vpack.c.bf16 %v4500_v19, %v4499_v0  ;;  %v18752_v0 = vld [vmem:[%s21197_s2 + $0x168] sm:$0xff]  }
 0x388   : > { %16504 = vmatprep.subr.bf16.mxu1 %v18735_v49  ;;  %v19998_v19 = vld [vmem:[#allocation2 + $0xc1] sm:$0xff] }
 0x38a   : > { %16473 = vmatmul.mubr.bf16.gmra.mrb[8].mxu1 %v19876_v21 }
 0x38b   : > { %16476 = vmatprep.mubr.bf16.mxu1 %v19881_v28  ;;  %16505 = vmatpush3.bf16.msra.mxu1 %v18735_v49  ;;  %v19914_v49 = vpack.c.bf16 %v4502_v31, %v4501_v24  ;;  %v5252_v24 = vpack.c.bf16 %v19724_v55, %v19998_v19  ;;  %v18754_v31 = vld [vmem:[%s21197_s2 + $0x178] sm:$0xff]   ;;  %v18923_v55 = vld [vmem:[#allocation2] sm:$0xff] }
 0x38c   : > { %16506 = vmatprep.subr.bf16.mxu1 %v18736_v46 }
 0x38f   : > { %16507 = vmatpush3.bf16.msra.mxu1 %v18736_v46  ;;  %v18741_v46 = vld [vmem:[%s21197_s2 + $0x110] sm:$0xff]  }
 0x390   : > { %16508 = vmatprep.subr.bf16.mxu1 %v18737_v23 }
 0x392   : > { %16477 = vmatmul.mubr.bf16.gmra.mrb[12].mxu1 %v19888_v16 }
 0x393   : > { %16480 = vmatprep.mubr.bf16.mxu1 %v19893_v40  ;;  %16509 = vmatpush3.bf16.msra.mxu1 %v18737_v23 }
 0x394   : > { %16510 = vmatprep.subr.bf16.mxu1 %v18738_v17 }
 0x397   : > { %16511 = vmatpush3.bf16.msra.mxu1 %v18738_v17  ;;  %v5220_v17 = vld [vmem:[#allocation2 + $0x69] sm:$0xff] }
 0x398   : > { %16544 = vmatprep.subr.bf16.mxu1 %v18739_v52  ;;  %v19977_v45 = vpack.c.bf16 %v5220_v17, %v5219_v33  ;;  %v18770_v17 = vld [vmem:[%s21197_s2 + $0x1f8] sm:$0xff]  }
 0x39a   : > { %16481 = vmatmul.mubr.bf16.gmra.mrb[16].mxu1 %v19900_v26 }
 0x39b   : > { %16484 = vmatprep.mubr.bf16.mxu1 %v19902_v5 }
 0x3a2   : > { %16485 = vmatmul.mubr.bf16.gmra.mrb[20].mxu1 %v19906_v61 }
 0x3a3   : > { %16488 = vmatprep.mubr.bf16.mxu1 %v19908_v57 }
 0x3aa   : > { %16489 = vmatmul.mubr.bf16.gmra.mrb[24].mxu1 %v19912_v37 }
 0x3ab   : > { %16492 = vmatprep.mubr.bf16.mxu1 %v19914_v49 }
 0x3b2   : > { %16493 = vmatmul.mubr.bf16.gmra.mrb[28].mxu1 %v19918_v13 }
 0x3b3   : > { %16512 = vmatprep.mubr.bf16.mxu1 %v19682_v41  ;;  %v18742_v41 = vld [vmem:[%s21197_s2 + $0x118] sm:$0xff]  }
 0x3ba   : > { %16513 = vmatmul.mubr.bf16.vlgmr.msra.gmra.mrb[0].mxu1 %v19690_v1  ;;  %v18743_v1 = vld [vmem:[%s21197_s2 + $0x120] sm:$0xff]  }
 0x3bb   : > { %16545 = vmatpush3.bf16.msra.mxu1 %v18739_v52  ;;  %16516 = vmatprep.mubr.bf16.mxu1 %v19705_v48  ;;  %v18744_v48 = vld [vmem:[%s21197_s2 + $0x128] sm:$0xff]   ;;  %v19975_v52 = vld [vmem:[#allocation2 + $0x79] sm:$0xff] }
 0x3bc   : > { %16546 = vmatprep.subr.bf16.mxu1 %v18740_v20  ;;  %v5249_v62 = vpack.c.bf16 %v19700_v30, %v19975_v52  ;;  %v18753_v30 = vld [vmem:[%s21197_s2 + $0x170] sm:$0xff]  }
 0x3bf   : > { %16547 = vmatpush3.bf16.msra.mxu1 %v18740_v20  ;;  %v5960_v20 = vld [vmem:[#allocation2 + $0x78] sm:$0xff] }
 0x3c0   : > { %16548 = vmatprep.subr.bf16.mxu1 %v18741_v46 }
 0x3c2   : > { %16517 = vmatmul.mubr.bf16.gmra.mrb[4].mxu1 %v19714_v11  ;;  %v18745_v11 = vld [vmem:[%s21197_s2 + $0x130] sm:$0xff]  }
 0x3c3   : > { %16520 = vmatprep.mubr.bf16.mxu1 %v19730_v51  ;;  %16549 = vmatpush3.bf16.msra.mxu1 %v18741_v46  ;;  %v18746_v51 = vld [vmem:[%s21197_s2 + $0x138] sm:$0xff]   ;;  %v5989_v46 = vpack.c.bf16 %v5961_v4, %v5960_v20 }
 0x3c4   : > { %16550 = vmatprep.subr.bf16.mxu1 %v18742_v41  ;;  %v6340_v4 = vld [vmem:[#allocation2 + $0xf1] sm:$0xff] }
 0x3c5   : > { %v6343_v20 = vld [vmem:[#allocation2 + $0x111] sm:$0xff] }
 0x3c7   : > { %16551 = vmatpush3.bf16.msra.mxu1 %v18742_v41  ;;  %v5962_v41 = vld [vmem:[#allocation2 + $0x90] sm:$0xff] }
 0x3c8   : > { %16552 = vmatprep.subr.bf16.mxu1 %v18743_v1 }
 0x3ca   : > { %16521 = vmatmul.mubr.bf16.gmra.mrb[8].mxu1 %v19738_v63  ;;  %v18747_v63 = vld [vmem:[%s21197_s2 + $0x140] sm:$0xff]  }
 0x3cb   : > { %16524 = vmatprep.mubr.bf16.mxu1 %v19750_v58  ;;  %16553 = vmatpush3.bf16.msra.mxu1 %v18743_v1  ;;  %v4874_v58 = vld [vmem:[#allocation2 + $0x188] sm:$0xff]  ;;  %v18766_v1 = vld [vmem:[%s21197_s2 + $0x1d8] sm:$0xff]  }
 0x3cc   : > { %16554 = vmatprep.subr.bf16.mxu1 %v18744_v48 }
 0x3cf   : > { %16555 = vmatpush3.bf16.msra.mxu1 %v18744_v48 }
 0x3d0   : > { %16556 = vmatprep.subr.bf16.mxu1 %v18745_v11 }
 0x3d2   : > { %16525 = vmatmul.mubr.bf16.gmra.mrb[12].mxu1 %v19758_v25  ;;  %v5214_v25 = vld [vmem:[#allocation2 + $0x21] sm:$0xff] }
 0x3d3   : > { %16528 = vmatprep.mubr.bf16.mxu1 %v19772_v47  ;;  %16557 = vmatpush3.bf16.msra.mxu1 %v18745_v11  ;;  %v4873_v47 = vld [vmem:[#allocation2 + $0x180] sm:$0xff]  ;;  %v5245_v60 = vpack.c.bf16 %v5214_v25, %v5213_v59  ;;  %v18768_v59 = vld [vmem:[%s21197_s2 + $0x1e8] sm:$0xff]  }
 0x3d4   : > { %16558 = vmatprep.subr.bf16.mxu1 %v18746_v51  ;;  %v19960_v23 = vpack.c.bf16 %v4874_v58, %v4873_v47  ;;  %v18767_v11 = vld [vmem:[%s21197_s2 + $0x1e0] sm:$0xff]   ;;  %v5964_v58 = vld [vmem:[#allocation2 + $0xa8] sm:$0xff] }
 0x3d5   : > { %v5966_v47 = vld [vmem:[#allocation2 + $0xc0] sm:$0xff] }
 0x3d7   : > { %16559 = vmatpush3.bf16.msra.mxu1 %v18746_v51  ;;  %v5965_v51 = vld [vmem:[#allocation2 + $0xb0] sm:$0xff] }
 0x3d8   : > { %16592 = vmatprep.subr.bf16.mxu1 %v18747_v63  ;;  %v5991_v25 = vpack.c.bf16 %v5965_v51, %v5964_v58  ;;  %v6347_v51 = vld [vmem:[#allocation2 + $0x141] sm:$0xff]  ;;  %v6346_v58 = vld [vmem:[#allocation2 + $0x139] sm:$0xff] }
 0x3da   : > { %16529 = vmatmul.mubr.bf16.gmra.mrb[16].mxu1 %v19778_v35  ;;  %v5216_v35 = vld [vmem:[#allocation2 + $0x39] sm:$0xff] }
 0x3db   : > { %16532 = vmatprep.mubr.bf16.mxu1 %v19787_v44  ;;  %v5218_v44 = vld [vmem:[#allocation2 + $0x51] sm:$0xff] }
 0x3e2   : > { %16533 = vmatmul.mubr.bf16.gmra.mrb[20].mxu1 %v19792_v12  ;;  %v19963_v12 = vpack.c.bf16 %v5216_v35, %v5215_v7  ;;  %v18769_v35 = vld [vmem:[%s21197_s2 + $0x1f0] sm:$0xff]   ;;  %v5971_v7 = vld [vmem:[#allocation2 + $0xf8] sm:$0xff] }
 0x3e3   : > { %16536 = vmatprep.mubr.bf16.mxu1 %v19801_v38  ;;  %v5217_v38 = vld [vmem:[#allocation2 + $0x49] sm:$0xff] }
 0x3ea   : > { %16537 = vmatmul.mubr.bf16.gmra.mrb[24].mxu1 %v19805_v14  ;;  %v18748_v14 = vld [vmem:[%s21197_s2 + $0x148] sm:$0xff]  }
 0x3eb   : > { %16540 = vmatprep.mubr.bf16.mxu1 %v19809_v8  ;;  %v19968_v8 = vpack.c.bf16 %v5218_v44, %v5217_v38  ;;  %v5969_v44 = vld [vmem:[#allocation2 + $0xe0] sm:$0xff]  ;;  %v5968_v38 = vld [vmem:[#allocation2 + $0xd8] sm:$0xff] }
 0x3f2   : > { %16541 = vmatmul.mubr.bf16.gmra.mrb[28].mxu1 %v19960_v23 }
 0x3f3   : > { %16560 = vmatprep.mubr.bf16.mxu1 %v5245_v60 }
 0x3fa   : > { %16561 = vmatmul.mubr.bf16.vlgmr.msra.gmra.mrb[0].mxu1 %v19963_v12 }
 0x3fb   : > { %16593 = vmatpush3.bf16.msra.mxu1 %v18747_v63  ;;  %16564 = vmatprep.mubr.bf16.mxu1 %v19968_v8  ;;  %v5967_v63 = vld [vmem:[#allocation2 + $0xc8] sm:$0xff] }
 0x3fc   : > { %16594 = vmatprep.subr.bf16.mxu1 %v18748_v14  ;;  %v5992_v60 = vpack.c.bf16 %v5967_v63, %v5966_v47  ;;  %v6349_v63 = vld [vmem:[#allocation2 + $0x159] sm:$0xff]  ;;  %v6348_v47 = vld [vmem:[#allocation2 + $0x151] sm:$0xff] }
 0x3ff   : > { %16595 = vmatpush3.bf16.msra.mxu1 %v18748_v14  ;;  %v5993_v14 = vpack.c.bf16 %v5969_v44, %v5968_v38  ;;  %v6350_v44 = vld [vmem:[#allocation2 + $0x169] sm:$0xff]  ;;  %v6352_v38 = vld [vmem:[#allocation2 + $0x181] sm:$0xff] }
 0x400   : > { %16596 = vmatprep.subr.bf16.mxu1 %v18749_v15 }
 0x402   : > { %16565 = vmatmul.mubr.bf16.gmra.mrb[4].mxu1 %v19977_v45 }
 0x403   : > { %16568 = vmatprep.mubr.bf16.mxu1 %v5249_v62  ;;  %16597 = vmatpush3.bf16.msra.mxu1 %v18749_v15  ;;  %v5970_v15 = vld [vmem:[#allocation2 + $0xf0] sm:$0xff] }
 0x404   : > { %16598 = vmatprep.subr.bf16.mxu1 %v18750_v42  ;;  %v5994_v33 = vpack.c.bf16 %v5971_v7, %v5970_v15  ;;  %v5973_v62 = vld [vmem:[#allocation2 + $0x110] sm:$0xff]  ;;  %v6354_v15 = vld [vmem:[#allocation2 + $0x199] sm:$0xff] }
 0x405   : > { %v5995_v32 = vpack.c.bf16 %v5973_v62, %v5972_v27  ;;  %v6695_v62 = vld [vmem:[#allocation2 + $0x3a] sm:$0xff]  ;;  %v6696_v27 = vld [vmem:[#allocation2 + $0x4a] sm:$0xff] }
 0x407   : > { %16599 = vmatpush3.bf16.msra.mxu1 %v18750_v42  ;;  %v18771_v42 = vld [vmem:[%s21197_s2 + $0x200] sm:$0xff]  }
 0x408   : > { %16600 = vmatprep.subr.bf16.mxu1 %v18751_v22 }
 0x40a   : > { %16569 = vmatmul.mubr.bf16.gmra.mrb[8].mxu1 %v19988_v10 }
 0x40b   : > { %16572 = vmatprep.mubr.bf16.mxu1 %v19735_v6  ;;  %16601 = vmatpush3.bf16.msra.mxu1 %v18751_v22  ;;  %v18755_v6 = vld [vmem:[%s21197_s2 + $0x180] sm:$0xff]   ;;  %v5975_v22 = vld [vmem:[#allocation2 + $0x128] sm:$0xff] }
 0x40c   : > { %16602 = vmatprep.subr.bf16.mxu1 %v18752_v0 }
 0x40f   : > { %16603 = vmatpush3.bf16.msra.mxu1 %v18752_v0  ;;  %v5974_v0 = vld [vmem:[#allocation2 + $0x120] sm:$0xff] }
 0x410   : > { %16604 = vmatprep.subr.bf16.mxu1 %v18753_v30 }
 0x412   : > { %16573 = vmatmul.mubr.bf16.gmra.mrb[12].mxu1 %v5252_v24  ;;  %v5977_v24 = vld [vmem:[#allocation2 + $0x140] sm:$0xff] }
 0x413   : > { %16576 = vmatprep.mubr.bf16.mxu1 %v19755_v18  ;;  %16605 = vmatpush3.bf16.msra.mxu1 %v18753_v30  ;;  %v20015_v18 = vpack.c.bf16 %v18923_v55, %v18923_v55  ;;  %v5996_v30 = vpack.c.bf16 %v5975_v22, %v5974_v0  ;;  %v6698_v0 = vld [vmem:[#allocation2 + $0x62] sm:$0xff] }
 0x414   : > { %16606 = vmatprep.subr.bf16.mxu1 %v18754_v31 }
 0x415   : > { %16800 = vmatprep.mubr.bf16.mxu0 %v20015_v18 }
 0x417   : > { %16607 = vmatpush3.bf16.msra.mxu1 %v18754_v31  ;;  %v5979_v31 = vld [vmem:[#allocation2 + $0x158] sm:$0xff] }
 0x418   : > { %16640 = vmatprep.subr.bf16.mxu1 %v18755_v6 }
 0x41a   : > { %16577 = vmatmul.mubr.bf16.gmra.mrb[16].mxu1 %v19748_v56  ;;  %v18756_v56 = vld [vmem:[%s21197_s2 + $0x188] sm:$0xff]  }
 0x41b   : > { %16580 = vmatprep.mubr.bf16.mxu1 %v19775_v9  ;;  %v18758_v9 = vld [vmem:[%s21197_s2 + $0x198] sm:$0xff]  }
 0x422   : > { %16581 = vmatmul.mubr.bf16.gmra.mrb[20].mxu1 %v19770_v39  ;;  %v18757_v39 = vld [vmem:[%s21197_s2 + $0x190] sm:$0xff]  }
 0x423   : > { %16584 = vmatprep.mubr.bf16.mxu1 %v19789_v53  ;;  %v18760_v53 = vld [vmem:[%s21197_s2 + $0x1a8] sm:$0xff]  }
 0x42a   : > { %16585 = vmatmul.mubr.bf16.gmra.mrb[24].mxu1 %v19785_v34  ;;  %v18759_v34 = vld [vmem:[%s21197_s2 + $0x1a0] sm:$0xff]  }
 0x42b   : > { %16588 = vmatprep.mubr.bf16.mxu1 %v19803_v2  ;;  %v18762_v2 = vld [vmem:[%s21197_s2 + $0x1b8] sm:$0xff]  }
 0x432   : > { %16589 = vmatmul.mubr.bf16.gmra.mrb[28].mxu1 %v19799_v29  ;;  %v18761_v29 = vld [vmem:[%s21197_s2 + $0x1b0] sm:$0xff]  }
 0x433   : > { %16608 = vmatprep.mubr.bf16.mxu1 %v19852_v3  ;;  %v18763_v3 = vld [vmem:[%s21197_s2 + $0x1c0] sm:$0xff]  }
 0x43a   : > { %16609 = vmatmul.mubr.bf16.vlgmr.msra.gmra.mrb[0].mxu1 %v19857_v50  ;;  %v5613_v50 = vld [vmem:[#allocation2 + $0x182] sm:$0xff] }
 0x43b   : > { %16641 = vmatpush3.bf16.msra.mxu1 %v18755_v6  ;;  %16612 = vmatprep.mubr.bf16.mxu1 %v19864_v36  ;;  %v5614_v36 = vld [vmem:[#allocation2 + $0x18a] sm:$0xff]  ;;  %v5976_v6 = vld [vmem:[#allocation2 + $0x138] sm:$0xff] }
 0x43c   : > { %16642 = vmatprep.subr.bf16.mxu1 %v18756_v56  ;;  %v5997_v55 = vpack.c.bf16 %v5977_v24, %v5976_v6  ;;  %v6700_v6 = vld [vmem:[#allocation2 + $0x7a] sm:$0xff] }
 0x43f   : > { %16643 = vmatpush3.bf16.msra.mxu1 %v18756_v56  ;;  %v5978_v56 = vld [vmem:[#allocation2 + $0x150] sm:$0xff] }
 0x440   : > { %16644 = vmatprep.subr.bf16.mxu1 %v18757_v39 }
 0x442   : > { %16613 = vmatmul.mubr.bf16.gmra.mrb[4].mxu1 %v19869_v43  ;;  %v5955_v43 = vld [vmem:[#allocation2 + $0x38] sm:$0xff] }
 0x443   : > { %16616 = vmatprep.mubr.bf16.mxu1 %v19876_v21  ;;  %16645 = vmatpush3.bf16.msra.mxu1 %v18757_v39  ;;  %v20058_v21 = vpack.c.bf16 %v5614_v36, %v5613_v50  ;;  %v5998_v39 = vpack.c.bf16 %v5979_v31, %v5978_v56  ;;  %v6331_v50 = vld [vmem:[#allocation2 + $0x81] sm:$0xff]  ;;  %v6702_v56 = vld [vmem:[#allocation2 + $0x92] sm:$0xff] }
 0x444   : > { %16646 = vmatprep.subr.bf16.mxu1 %v18758_v9  ;;  %v6359_v36 = vpack.c.bf16 %v6331_v50, %v19975_v52  ;;  %v18775_v52 = vld [vmem:[%s21197_s2 + $0x220] sm:$0xff]  }
 0x445   : > { %v6709_v50 = vld [vmem:[#allocation2 + $0xe2] sm:$0xff] }
 0x447   : > { %16647 = vmatpush3.bf16.msra.mxu1 %v18758_v9  ;;  %v5981_v9 = vld [vmem:[#allocation2 + $0x170] sm:$0xff] }
 0x448   : > { %16648 = vmatprep.subr.bf16.mxu1 %v18759_v34 }
 0x44a   : > { %16617 = vmatmul.mubr.bf16.gmra.mrb[8].mxu1 %v19881_v28  ;;  %v5954_v28 = vld [vmem:[#allocation2 + $0x30] sm:$0xff] }
 0x44b   : > { %16620 = vmatprep.mubr.bf16.mxu1 %v19888_v16  ;;  %16649 = vmatpush3.bf16.msra.mxu1 %v18759_v34  ;;  %v5986_v16 = vpack.c.bf16 %v5955_v43, %v5954_v28  ;;  %v5980_v34 = vld [vmem:[#allocation2 + $0x168] sm:$0xff]  ;;  %v6335_v28 = vld [vmem:[#allocation2 + $0xb1] sm:$0xff] }
 0x44c   : > { %16650 = vmatprep.subr.bf16.mxu1 %v18760_v53  ;;  %v18784_v43 = vld [vmem:[%s21197_s2 + $0x268] sm:$0xff]  }
 0x44f   : > { %16651 = vmatpush3.bf16.msra.mxu1 %v18760_v53  ;;  %v5999_v53 = vpack.c.bf16 %v5981_v9, %v5980_v34 }
 0x450   : > { %16652 = vmatprep.subr.bf16.mxu1 %v18761_v29 }
 0x452   : > { %16621 = vmatmul.mubr.bf16.gmra.mrb[12].mxu1 %v19893_v40  ;;  %v5957_v40 = vld [vmem:[#allocation2 + $0x50] sm:$0xff] }
 0x453   : > { %16624 = vmatprep.mubr.bf16.mxu1 %v19900_v26  ;;  %16653 = vmatpush3.bf16.msra.mxu1 %v18761_v29  ;;  %v5959_v26 = vld [vmem:[#allocation2 + $0x68] sm:$0xff]  ;;  %v18779_v29 = vld [vmem:[%s21197_s2 + $0x240] sm:$0xff]  }
 0x454   : > { %16654 = vmatprep.subr.bf16.mxu1 %v18762_v2  ;;  %16784 = vmatprep.subr.bf16.mxu0 %v18779_v29 }
 0x455   : > { %16785 = vmatpush3.bf16.msra.mxu0 %v18779_v29  ;;  %v6705_v29 = vld [vmem:[#allocation2 + $0xb2] sm:$0xff] }
 0x457   : > { %16655 = vmatpush3.bf16.msra.mxu1 %v18762_v2  ;;  %v18780_v2 = vld [vmem:[%s21197_s2 + $0x248] sm:$0xff]  }
 0x458   : > { %16688 = vmatprep.subr.bf16.mxu1 %v18763_v3  ;;  %16786 = vmatprep.subr.bf16.mxu0 %v18780_v2 }
 0x459   : > { %16787 = vmatpush3.bf16.msra.mxu0 %v18780_v2  ;;  %v6706_v2 = vld [vmem:[#allocation2 + $0xc2] sm:$0xff] }
 0x45a   : > { %16625 = vmatmul.mubr.bf16.gmra.mrb[16].mxu1 %v19902_v5  ;;  %v5956_v5 = vld [vmem:[#allocation2 + $0x48] sm:$0xff] }
 0x45b   : > { %16628 = vmatprep.mubr.bf16.mxu1 %v19906_v61  ;;  %v5987_v61 = vpack.c.bf16 %v5957_v40, %v5956_v5  ;;  %v6334_v40 = vld [vmem:[#allocation2 + $0xa9] sm:$0xff] }
 0x45c   : > { %v18776_v5 = vld [vmem:[%s21197_s2 + $0x228] sm:$0xff]  }
 0x462   : > { %16629 = vmatmul.mubr.bf16.gmra.mrb[20].mxu1 %v19908_v57  ;;  %v5958_v57 = vld [vmem:[#allocation2 + $0x60] sm:$0xff] }
 0x463   : > { %16632 = vmatprep.mubr.bf16.mxu1 %v19912_v37  ;;  %v18764_v37 = vld [vmem:[%s21197_s2 + $0x1c8] sm:$0xff]  }
 0x46a   : > { %16633 = vmatmul.mubr.bf16.gmra.mrb[24].mxu1 %v19914_v49  ;;  %v5988_v49 = vpack.c.bf16 %v5959_v26, %v5958_v57  ;;  %v6361_v26 = vpack.c.bf16 %v6335_v28, %v6334_v40  ;;  %v6339_v57 = vld [vmem:[#allocation2 + $0xe1] sm:$0xff]  ;;  %v6713_v28 = vld [vmem:[#allocation2 + $0x112] sm:$0xff]  ;;  %v6715_v40 = vld [vmem:[#allocation2 + $0x12a] sm:$0xff] }
 0x46b   : > { %16636 = vmatprep.mubr.bf16.mxu1 %v19918_v13  ;;  %v5963_v13 = vld [vmem:[#allocation2 + $0x98] sm:$0xff] }
 0x46c   : > { %v5990_v48 = vpack.c.bf16 %v5963_v13, %v5962_v41  ;;  %v6342_v41 = vld [vmem:[#allocation2 + $0x109] sm:$0xff] }
 0x472   : > { %16637 = vmatmul.mubr.bf16.gmra.mrb[28].mxu1 %v20058_v21 }
 0x473   : > { %16656 = vmatprep.mubr.bf16.mxu1 %v5986_v16  ;;  %v6337_v16 = vld [vmem:[#allocation2 + $0xc9] sm:$0xff] }
 0x47a   : > { %16657 = vmatmul.mubr.bf16.vlgmr.msra.gmra.mrb[0].mxu1 %v5987_v61  ;;  %v18777_v61 = vld [vmem:[%s21197_s2 + $0x230] sm:$0xff]  }
 0x47b   : > { %16689 = vmatpush3.bf16.msra.mxu1 %v18763_v3  ;;  %16660 = vmatprep.mubr.bf16.mxu1 %v5988_v49  ;;  %v18781_v3 = vld [vmem:[%s21197_s2 + $0x250] sm:$0xff]   ;;  %v6338_v49 = vld [vmem:[#allocation2 + $0xd9] sm:$0xff] }
 0x47c   : > { %16690 = vmatprep.subr.bf16.mxu1 %v18764_v37  ;;  %16788 = vmatprep.subr.bf16.mxu0 %v18781_v3 }
 0x47d   : > { %16789 = vmatpush3.bf16.msra.mxu0 %v18781_v3  ;;  %v6707_v3 = vld [vmem:[#allocation2 + $0xca] sm:$0xff] }
 0x47f   : > { %16691 = vmatpush3.bf16.msra.mxu1 %v18764_v37  ;;  %v6341_v37 = vld [vmem:[#allocation2 + $0xf9] sm:$0xff] }
 0x480   : > { %16692 = vmatprep.subr.bf16.mxu1 %v18765_v54  ;;  %v6364_v13 = vpack.c.bf16 %v6341_v37, %v6340_v4  ;;  %v6719_v37 = vld [vmem:[#allocation2 + $0x15a] sm:$0xff]  ;;  %v6720_v4 = vld [vmem:[#allocation2 + $0x16a] sm:$0xff] }
 0x482   : > { %16661 = vmatmul.mubr.bf16.gmra.mrb[4].mxu1 %v5989_v46  ;;  %v6345_v46 = vld [vmem:[#allocation2 + $0x129] sm:$0xff] }
 0x483   : > { %16664 = vmatprep.mubr.bf16.mxu1 %v5990_v48  ;;  %16693 = vmatpush3.bf16.msra.mxu1 %v18765_v54  ;;  %v6363_v54 = vpack.c.bf16 %v6339_v57, %v6338_v49  ;;  %v6344_v48 = vld [vmem:[#allocation2 + $0x121] sm:$0xff]  ;;  %v6718_v57 = vld [vmem:[#allocation2 + $0x152] sm:$0xff] }
 0x484   : > { %16694 = vmatprep.subr.bf16.mxu1 %v18766_v1 }
 0x487   : > { %16695 = vmatpush3.bf16.msra.mxu1 %v18766_v1  ;;  %v6365_v1 = vpack.c.bf16 %v6343_v20, %v6342_v41  ;;  %v6724_v20 = vld [vmem:[#allocation2 + $0x19a] sm:$0xff] }
 0x488   : > { %16696 = vmatprep.subr.bf16.mxu1 %v18767_v11 }
 0x48a   : > { %16665 = vmatmul.mubr.bf16.gmra.mrb[8].mxu1 %v5991_v25  ;;  %v6367_v25 = vpack.c.bf16 %v6347_v51, %v6346_v58 }
 0x48b   : > { %16668 = vmatprep.mubr.bf16.mxu1 %v5992_v60  ;;  %16697 = vmatpush3.bf16.msra.mxu1 %v18767_v11  ;;  %v6366_v11 = vpack.c.bf16 %v6345_v46, %v6344_v48  ;;  %v6351_v60 = vld [vmem:[#allocation2 + $0x171] sm:$0xff]  ;;  %v6725_v46 = vld [vmem:[#allocation2 + $0x1a2] sm:$0xff] }
 0x48c   : > { %16698 = vmatprep.subr.bf16.mxu1 %v18768_v59  ;;  %v6369_v7 = vpack.c.bf16 %v6351_v60, %v6350_v44  ;;  %v6741_v41 = vpack.c.bf16 %v6725_v46, %v6724_v20  ;;  %v18786_v48 = vld [vmem:[%s21197_s2 + $0x278] sm:$0xff]  }
 0x48f   : > { %16699 = vmatpush3.bf16.msra.mxu1 %v18768_v59  ;;  %v6368_v59 = vpack.c.bf16 %v6349_v63, %v6348_v47 }
 0x490   : > { %16700 = vmatprep.subr.bf16.mxu1 %v18769_v35 }
 0x492   : > { %16669 = vmatmul.mubr.bf16.gmra.mrb[12].mxu1 %v5993_v14 }
 0x493   : > { %16672 = vmatprep.mubr.bf16.mxu1 %v5994_v33  ;;  %16701 = vmatpush3.bf16.msra.mxu1 %v18769_v35  ;;  %v6353_v35 = vld [vmem:[#allocation2 + $0x189] sm:$0xff] }
 0x494   : > { %16702 = vmatprep.subr.bf16.mxu1 %v18770_v17  ;;  %v6370_v14 = vpack.c.bf16 %v6353_v35, %v6352_v38 }
 0x497   : > { %16703 = vmatpush3.bf16.msra.mxu1 %v18770_v17  ;;  %v6355_v17 = vld [vmem:[#allocation2 + $0x1a1] sm:$0xff] }
 0x498   : > { %16736 = vmatprep.subr.bf16.mxu1 %v18771_v42  ;;  %v6371_v33 = vpack.c.bf16 %v6355_v17, %v6354_v15 }
 0x49a   : > { %16673 = vmatmul.mubr.bf16.gmra.mrb[16].mxu1 %v5995_v32  ;;  %v6697_v32 = vld [vmem:[#allocation2 + $0x52] sm:$0xff] }
 0x49b   : > { %16676 = vmatprep.mubr.bf16.mxu1 %v5996_v30  ;;  %v6699_v30 = vld [vmem:[#allocation2 + $0x6a] sm:$0xff]  ;;  %v6727_v24 = vpack.c.bf16 %v6697_v32, %v6696_v27 }
 0x49c   : > { %v6728_v31 = vpack.c.bf16 %v6699_v30, %v6698_v0 }
 0x4a2   : > { %16677 = vmatmul.mubr.bf16.gmra.mrb[20].mxu1 %v5997_v55  ;;  %v6701_v55 = vld [vmem:[#allocation2 + $0x82] sm:$0xff] }
 0x4a3   : > { %16680 = vmatprep.mubr.bf16.mxu1 %v5998_v39  ;;  %v6703_v39 = vld [vmem:[#allocation2 + $0x9a] sm:$0xff]  ;;  %v6729_v9 = vpack.c.bf16 %v6701_v55, %v6700_v6 }
 0x4a4   : > { %v6730_v34 = vpack.c.bf16 %v6703_v39, %v6702_v56 }
 0x4aa   : > { %16681 = vmatmul.mubr.bf16.gmra.mrb[24].mxu1 %v5999_v53  ;;  %v6704_v53 = vld [vmem:[#allocation2 + $0xaa] sm:$0xff] }
 0x4ab   : > { %16684 = vmatprep.mubr.bf16.mxu1 %v19960_v23  ;;  %v18772_v23 = vld [vmem:[%s21197_s2 + $0x208] sm:$0xff]  }
 0x4b2   : > { %16685 = vmatmul.mubr.bf16.gmra.mrb[28].mxu1 %v20015_v18  ;;  %v18782_v18 = vld [vmem:[%s21197_s2 + $0x258] sm:$0xff]  }
 0x4b3   : > { %16704 = vmatprep.mubr.bf16.mxu1 %v19963_v12  ;;  %v18773_v12 = vld [vmem:[%s21197_s2 + $0x210] sm:$0xff]   ;;  %16790 = vmatprep.subr.bf16.mxu0 %v18782_v18 }
 0x4b4   : > { %16791 = vmatpush3.bf16.msra.mxu0 %v18782_v18  ;;  %v6732_v18 = vpack.c.bf16 %v6707_v3, %v6706_v2  ;;  %v18788_v3 = vld [vmem:[%s21197_s2 + $0x288] sm:$0xff]  }
 0x4ba   : > { %16705 = vmatmul.mubr.bf16.vlgmr.msra.gmra.mrb[0].mxu1 %v19968_v8  ;;  %v18783_v8 = vld [vmem:[%s21197_s2 + $0x260] sm:$0xff]  }
 0x4bb   : > { %16737 = vmatpush3.bf16.msra.mxu1 %v18771_v42  ;;  %16708 = vmatprep.mubr.bf16.mxu1 %v19977_v45  ;;  %v18774_v45 = vld [vmem:[%s21197_s2 + $0x218] sm:$0xff]  }
 0x4bc   : > { %16738 = vmatprep.subr.bf16.mxu1 %v18772_v23  ;;  %16792 = vmatprep.subr.bf16.mxu0 %v18783_v8  ;;  %v6694_v42 = vld [vmem:[#allocation2 + $0x32] sm:$0xff] }
 0x4bd   : > { %16793 = vmatpush3.bf16.msra.mxu0 %v18783_v8  ;;  %v6726_v22 = vpack.c.bf16 %v6695_v62, %v6694_v42  ;;  %v6710_v8 = vld [vmem:[#allocation2 + $0xf2] sm:$0xff] }
 0x4be   : > { %16794 = vmatprep.subr.bf16.mxu0 %v18784_v43 }
 0x4bf   : > { %16739 = vmatpush3.bf16.msra.mxu1 %v18772_v23  ;;  %v6731_v23 = vpack.c.bf16 %v6705_v29, %v6704_v53 }
 0x4c0   : > { %16740 = vmatprep.subr.bf16.mxu1 %v18773_v12 }
 0x4c1   : > { %16795 = vmatpush3.bf16.msra.mxu0 %v18784_v43 }
 0x4c2   : > { %16709 = vmatmul.mubr.bf16.gmra.mrb[4].mxu1 %v6359_v36  ;;  %v6711_v36 = vld [vmem:[#allocation2 + $0xfa] sm:$0xff] }
 0x4c3   : > { %16712 = vmatprep.mubr.bf16.mxu1 %v19988_v10  ;;  %16741 = vmatpush3.bf16.msra.mxu1 %v18773_v12  ;;  %v6362_v10 = vpack.c.bf16 %v6337_v16, %v19998_v19  ;;  %v18778_v19 = vld [vmem:[%s21197_s2 + $0x238] sm:$0xff]   ;;  %v6734_v43 = vpack.c.bf16 %v6711_v36, %v6710_v8  ;;  %v6714_v16 = vld [vmem:[#allocation2 + $0x122] sm:$0xff] }
 0x4c4   : > { %16742 = vmatprep.subr.bf16.mxu1 %v18774_v45  ;;  %v6708_v12 = vld [vmem:[#allocation2 + $0xda] sm:$0xff] }
 0x4c7   : > { %16743 = vmatpush3.bf16.msra.mxu1 %v18774_v45  ;;  %v6733_v45 = vpack.c.bf16 %v6709_v50, %v6708_v12 }
 0x4c8   : > { %16744 = vmatprep.subr.bf16.mxu1 %v18775_v52 }
 0x4ca   : > { %16713 = vmatmul.mubr.bf16.gmra.mrb[8].mxu1 %v6361_v26 }
 0x4cb   : > { %16716 = vmatprep.mubr.bf16.mxu1 %v6362_v10  ;;  %16745 = vmatpush3.bf16.msra.mxu1 %v18775_v52  ;;  %v6712_v52 = vld [vmem:[#allocation2 + $0x10a] sm:$0xff]  ;;  %v6716_v10 = vld [vmem:[#allocation2 + $0x13a] sm:$0xff] }
 0x4cc   : > { %16746 = vmatprep.subr.bf16.mxu1 %v18776_v5  ;;  %v6735_v26 = vpack.c.bf16 %v6713_v28, %v6712_v52 }
 0x4cf   : > { %16747 = vmatpush3.bf16.msra.mxu1 %v18776_v5  ;;  %v6736_v5 = vpack.c.bf16 %v6715_v40, %v6714_v16  ;;  %v18789_v40 = vld [vmem:[%s21197_s2 + $0x290] sm:$0xff]  }
 0x4d0   : > { %16748 = vmatprep.subr.bf16.mxu1 %v18777_v61 }
 0x4d2   : > { %16717 = vmatmul.mubr.bf16.gmra.mrb[12].mxu1 %v6363_v54  ;;  %v6738_v54 = vpack.c.bf16 %v6719_v37, %v6718_v57 }
 0x4d3   : > { %16720 = vmatprep.mubr.bf16.mxu1 %v6364_v13  ;;  %16749 = vmatpush3.bf16.msra.mxu1 %v18777_v61  ;;  %v6717_v61 = vld [vmem:[#allocation2 + $0x142] sm:$0xff] }
 0x4d4   : > { %16750 = vmatprep.subr.bf16.mxu1 %v18778_v19  ;;  %v6737_v49 = vpack.c.bf16 %v6717_v61, %v6716_v10 }
 0x4d7   : > { %16751 = vmatpush3.bf16.msra.mxu1 %v18778_v19  ;;  %v6721_v19 = vld [vmem:[#allocation2 + $0x172] sm:$0xff] }
 0x4d8   : > { %v6739_v13 = vpack.c.bf16 %v6721_v19, %v6720_v4  ;;  %v18790_v19 = vld [vmem:[%s21197_s2 + $0x298] sm:$0xff]  }
 0x4da   : > { %16721 = vmatmul.mubr.bf16.gmra.mrb[16].mxu1 %v6365_v1  ;;  %v18785_v1 = vld [vmem:[%s21197_s2 + $0x270] sm:$0xff]  }
 0x4db   : > { %16724 = vmatprep.mubr.bf16.mxu1 %v6366_v11  ;;  %16796 = vmatprep.subr.bf16.mxu0 %v18785_v1  ;;  %v20145_v11 = vld [vmem:[%s21198_s3 + $0x1] ss:$0 sm:$0xff] }
 0x4dc   : > { %16797 = vmatpush3.bf16.msra.mxu0 %v18785_v1 }
 0x4dd   : > { %16798 = vmatprep.subr.bf16.mxu0 %v18786_v48 }
 0x4e0   : > { %16799 = vmatpush3.bf16.msra.mxu0 %v18786_v48 }
 0x4e2   : > { %16725 = vmatmul.mubr.bf16.gmra.mrb[20].mxu1 %v6367_v25 }
 0x4e3   : > { %16728 = vmatprep.mubr.bf16.mxu1 %v6368_v59 }
 0x4ea   : > { %16729 = vmatmul.mubr.bf16.gmra.mrb[24].mxu1 %v6369_v7 }
 0x4eb   : > { %16732 = vmatprep.mubr.bf16.mxu1 %v6370_v14 }
 0x4f2   : > { %16733 = vmatmul.mubr.bf16.gmra.mrb[28].mxu1 %v6371_v33 }
 0x4f3   : > { %16752 = vmatprep.mubr.bf16.mxu1 %v6726_v22 }
 0x4fa   : > { %16753 = vmatmul.mubr.bf16.vlgmr.msra.gmra.mrb[0].mxu1 %v6727_v24 }
 0x4fb   : > { %16756 = vmatprep.mubr.bf16.mxu1 %v6728_v31 }
 0x502   : > { %16757 = vmatmul.mubr.bf16.gmra.mrb[4].mxu1 %v6729_v9 }
 0x503   : > { %16760 = vmatprep.mubr.bf16.mxu1 %v6730_v34 }
 0x50a   : > { %16761 = vmatmul.mubr.bf16.gmra.mrb[8].mxu1 %v6731_v23 }
 0x50b   : > { %16764 = vmatprep.mubr.bf16.mxu1 %v6732_v18 }
 0x512   : > { %16765 = vmatmul.mubr.bf16.gmra.mrb[12].mxu1 %v6733_v45 }
 0x513   : > { %16768 = vmatprep.mubr.bf16.mxu1 %v6734_v43 }
 0x51a   : > { %16769 = vmatmul.mubr.bf16.gmra.mrb[16].mxu1 %v6735_v26 }
 0x51b   : > { %16772 = vmatprep.mubr.bf16.mxu1 %v6736_v5 }
 0x522   : > { %16773 = vmatmul.mubr.bf16.gmra.mrb[20].mxu1 %v6737_v49 }
 0x523   : > { %16776 = vmatprep.mubr.bf16.mxu1 %v6738_v54 }
 0x52a   : > { %16777 = vmatmul.mubr.bf16.gmra.mrb[24].mxu1 %v6739_v13 }
 0x52b   : > { %16780 = vmatprep.mubr.bf16.mxu1 %v20058_v21  ;;  %v18787_v21 = vld [vmem:[%s21197_s2 + $0x280] sm:$0xff]  }
 0x52c   : > { %16832 = vmatprep.subr.bf16.mxu0 %v18787_v21 }
 0x532   : > { %16781 = vmatmul.mubr.bf16.gmra.mrb[28].mxu1 %v6741_v41 }
 0x5cd   : > { %v16754_v51 = vpop.f32.mrb[0].mxu1 }
 0x5ce   : > { %v7104_v63 = vadd.f32 %v16754_v51, %v20145_v11  ;;  %v6873_v58 = vpop.f32.mrb[1].mxu1 }
 0x5cf   : > { %v7102_v25 = vadd.f32 %v20145_v11, %v6873_v58  ;;  %v16755_v47 = vpop.f32.mrb[2].mxu1 }
 0x5d0   : > { %v7136_v59 = vmax.f32 %v7104_v63, 0.0  ;;  %v7105_v60 = vadd.f32 %v16755_v47, %v20145_v11  ;;  %v6876_v35 = vpop.f32.mrb[3].mxu1  ;;  %v18791_v47 = vld [vmem:[%s21197_s2 + $0x2a0] sm:$0xff]  }
 0x5d1   : > { %v7134_v44 = vmax.f32 %v7102_v25, 0.0  ;;  %v7103_v7 = vadd.f32 %v20145_v11, %v6876_v35 }
 0x5d2   : > { %7169 = vst [vmem:[#allocation3 + $0x31] sm:$0xff] %v7136_v59  ;;  %v7137_v38 = vmax.f32 %v7105_v60, 0.0 }
 0x5d3   : > { %7167 = vst [vmem:[#allocation3 + $0x19] sm:$0xff] %v7134_v44  ;;  %v7135_v14 = vmax.f32 %v7103_v7, 0.0 }
 0x5d4   : > { %7170 = vst [vmem:[#allocation3 + $0x39] sm:$0xff] %v7137_v38  ;;  %v20151_v15 = vpack.c.bf16 %v7137_v38, %v7136_v59 }
 0x5d5   : > { %7168 = vst [vmem:[#allocation3 + $0x21] sm:$0xff] %v7135_v14  ;;  %v16758_v17 = vpop.f32.mrb[4].mxu1  ;;  %v20153_v33 = vpack.c.bf16 %v7135_v14, %v7134_v44 }
 0x5d6   : > { %v7108_v42 = vadd.f32 %v16758_v17, %v20145_v11  ;;  %v6889_v62 = vpop.f32.mrb[5].mxu1 }
 0x5d7   : > { %v7106_v22 = vadd.f32 %v20145_v11, %v6889_v62  ;;  %v16759_v27 = vpop.f32.mrb[6].mxu1  ;;  %v18792_v62 = vld [vmem:[%s21197_s2 + $0x2a8] sm:$0xff]  }
 0x5d8   : > { %v7140_v32 = vmax.f32 %v7108_v42, 0.0  ;;  %v7109_v0 = vadd.f32 %v16759_v27, %v20145_v11  ;;  %v6892_v30 = vpop.f32.mrb[7].mxu1 }
 0x5d9   : > { %v7138_v24 = vmax.f32 %v7106_v22, 0.0  ;;  %v7107_v31 = vadd.f32 %v20145_v11, %v6892_v30  ;;  %v7237_v2 = vld [vmem:[#allocation3 + $0x30] sm:$0xff] }
 0x5da   : > { %7173 = vst [vmem:[#allocation3 + $0x61] sm:$0xff] %v7140_v32  ;;  %v7141_v6 = vmax.f32 %v7109_v0, 0.0  ;;  %v7235_v39 = vld [vmem:[#allocation3 + $0x18] sm:$0xff] }
 0x5db   : > { %7171 = vst [vmem:[#allocation3 + $0x49] sm:$0xff] %v7138_v24  ;;  %v7139_v55 = vmax.f32 %v7107_v31, 0.0  ;;  %v7238_v56 = vld [vmem:[#allocation3 + $0x38] sm:$0xff] }
 0x5dc   : > { %7174 = vst [vmem:[#allocation3 + $0x69] sm:$0xff] %v7141_v6  ;;  %v7236_v9 = vld [vmem:[#allocation3 + $0x20] sm:$0xff]  ;;  %v20159_v34 = vpack.c.bf16 %v7141_v6, %v7140_v32  ;;  %v20169_v50 = vpack.c.bf16 %v7238_v56, %v7237_v2 }
 0x5dd   : > { %7172 = vst [vmem:[#allocation3 + $0x51] sm:$0xff] %v7139_v55  ;;  %v16762_v53 = vpop.f32.mrb[8].mxu1  ;;  %v20161_v29 = vpack.c.bf16 %v7236_v9, %v7235_v39  ;;  %v20166_v23 = vpack.c.bf16 %v7139_v55, %v7138_v24  ;;  %v18793_v9 = vld [vmem:[%s21197_s2 + $0x2b0] sm:$0xff]  }
 0x5de   : > { %v7112_v18 = vadd.f32 %v16762_v53, %v20145_v11  ;;  %v6905_v12 = vpop.f32.mrb[9].mxu1 }
 0x5df   : > { %v7110_v8 = vadd.f32 %v20145_v11, %v6905_v12  ;;  %v16763_v36 = vpop.f32.mrb[10].mxu1  ;;  %16801 = vmatmul.mubr.bf16.vlgmr.msra.gmra.mrb[32].mxu0 %v20161_v29 }
 0x5e0   : > { %v7144_v45 = vmax.f32 %v7112_v18, 0.0  ;;  %v7113_v43 = vadd.f32 %v16763_v36, %v20145_v11  ;;  %16833 = vmatpush3.bf16.msra.mxu0 %v18787_v21  ;;  %v6908_v52 = vpop.f32.mrb[11].mxu1  ;;  %16804 = vmatprep.mubr.bf16.mxu0 %v20169_v50 }
 0x5e1   : > { %v7142_v28 = vmax.f32 %v7110_v8, 0.0  ;;  %v7111_v16 = vadd.f32 %v20145_v11, %v6908_v52  ;;  %16834 = vmatprep.subr.bf16.mxu0 %v18788_v3  ;;  %v7241_v4 = vld [vmem:[#allocation3 + $0x60] sm:$0xff]  ;;  %v18794_v52 = vld [vmem:[%s21197_s2 + $0x2b8] sm:$0xff]  }
 0x5e2   : > { %7177 = vst [vmem:[#allocation3 + $0x91] sm:$0xff] %v7144_v45  ;;  %v7145_v26 = vmax.f32 %v7113_v43, 0.0  ;;  %v7239_v61 = vld [vmem:[#allocation3 + $0x48] sm:$0xff] }
 0x5e3   : > { %7175 = vst [vmem:[#allocation3 + $0x79] sm:$0xff] %v7142_v28  ;;  %v20179_v5 = vmax.f32 %v7111_v16, 0.0  ;;  %v7242_v10 = vld [vmem:[#allocation3 + $0x68] sm:$0xff] }
 0x5e4   : > { %7178 = vst [vmem:[#allocation3 + $0x99] sm:$0xff] %v7145_v26  ;;  %v7240_v57 = vld [vmem:[#allocation3 + $0x50] sm:$0xff]  ;;  %16835 = vmatpush3.bf16.msra.mxu0 %v18788_v3  ;;  %v20181_v37 = vpack.c.bf16 %v7145_v26, %v7144_v45  ;;  %v20193_v41 = vpack.c.bf16 %v7242_v10, %v7241_v4 }
 0x5e5   : > { %7176 = vst [vmem:[#allocation3 + $0x81] sm:$0xff] %v20179_v5  ;;  %v16766_v49 = vpop.f32.mrb[12].mxu1  ;;  %v20184_v54 = vpack.c.bf16 %v7240_v57, %v7239_v61  ;;  %16836 = vmatprep.subr.bf16.mxu0 %v18789_v40  ;;  %v20190_v13 = vpack.c.bf16 %v20179_v5, %v7142_v28 }
 0x5e6   : > { %v7116_v20 = vadd.f32 %v16766_v49, %v20145_v11  ;;  %v6921_v46 = vpop.f32.mrb[13].mxu1 }
 0x5e7   : > { %v7114_v1 = vadd.f32 %v20145_v11, %v6921_v46  ;;  %v16767_v48 = vpop.f32.mrb[14].mxu1  ;;  %16805 = vmatmul.mubr.bf16.gmra.mrb[36].mxu0 %v20184_v54  ;;  %v20247_v46 = vld [vmem:[%s21197_s2 + $0x2c0] sm:$0xff]  }
 0x5e8   : > { %v7148_v21 = vmax.f32 %v7116_v20, 0.0  ;;  %v7117_v51 = vadd.f32 %v16767_v48, %v20145_v11  ;;  %v6924_v63 = vpop.f32.mrb[15].mxu1  ;;  %16808 = vmatprep.mubr.bf16.mxu0 %v20193_v41  ;;  %16837 = vmatpush3.bf16.msra.mxu0 %v18789_v40 }
 0x5e9   : > { %v7146_v58 = vmax.f32 %v7114_v1, 0.0  ;;  %v7115_v25 = vadd.f32 %v20145_v11, %v6924_v63  ;;  %16838 = vmatprep.subr.bf16.mxu0 %v18790_v19  ;;  %v7245_v42 = vld [vmem:[#allocation3 + $0x90] sm:$0xff] }
 0x5ea   : > { %7181 = vst [vmem:[#allocation3 + $0xc1] sm:$0xff] %v7148_v21  ;;  %v20203_v59 = vmax.f32 %v7117_v51, 0.0  ;;  %v7243_v44 = vld [vmem:[#allocation3 + $0x78] sm:$0xff] }
 0x5eb   : > { %7179 = vst [vmem:[#allocation3 + $0xa9] sm:$0xff] %v7146_v58  ;;  %v7147_v60 = vmax.f32 %v7115_v25, 0.0  ;;  %v7246_v35 = vld [vmem:[#allocation3 + $0x98] sm:$0xff] }
 0x5ec   : > { %7182 = vst [vmem:[#allocation3 + $0xc9] sm:$0xff] %v20203_v59  ;;  %v7244_v7 = vld [vmem:[#allocation3 + $0x80] sm:$0xff]  ;;  %16839 = vmatpush3.bf16.msra.mxu0 %v18790_v19  ;;  %v20207_v38 = vpack.c.bf16 %v20203_v59, %v7148_v21  ;;  %v20217_v0 = vpack.c.bf16 %v7246_v35, %v7245_v42 }
 0x5ed   : > { %7180 = vst [vmem:[#allocation3 + $0xb1] sm:$0xff] %v7147_v60  ;;  %v16770_v14 = vpop.f32.mrb[16].mxu1  ;;  %v20209_v17 = vpack.c.bf16 %v7244_v7, %v7243_v44  ;;  %16840 = vmatprep.subr.bf16.mxu0 %v18791_v47  ;;  %v20214_v22 = vpack.c.bf16 %v7147_v60, %v7146_v58 }
 0x5ee   : > { %v7120_v27 = vadd.f32 %v16770_v14, %v20145_v11  ;;  %v6937_v32 = vpop.f32.mrb[17].mxu1 }
 0x5ef   : > { %v7118_v30 = vadd.f32 %v20145_v11, %v6937_v32  ;;  %v16771_v24 = vpop.f32.mrb[18].mxu1  ;;  %16809 = vmatmul.mubr.bf16.gmra.mrb[40].mxu0 %v20209_v17 }
 0x5f0   : > { %v7152_v31 = vmax.f32 %v7120_v27, 0.0  ;;  %v7121_v6 = vadd.f32 %v16771_v24, %v20145_v11  ;;  %v6940_v55 = vpop.f32.mrb[19].mxu1  ;;  %16812 = vmatprep.mubr.bf16.mxu0 %v20217_v0  ;;  %16841 = vmatpush3.bf16.msra.mxu0 %v18791_v47 }
 0x5f1   : > { %v7150_v56 = vmax.f32 %v7118_v30, 0.0  ;;  %v7119_v39 = vadd.f32 %v20145_v11, %v6940_v55  ;;  %16842 = vmatprep.subr.bf16.mxu0 %v18792_v62  ;;  %v7249_v43 = vld [vmem:[#allocation3 + $0xc0] sm:$0xff] }
 0x5f2   : > { %7185 = vst [vmem:[#allocation3 + $0xf1] sm:$0xff] %v7152_v31  ;;  %v7153_v53 = vmax.f32 %v7121_v6, 0.0  ;;  %v7247_v18 = vld [vmem:[#allocation3 + $0xa8] sm:$0xff] }
 0x5f3   : > { %7183 = vst [vmem:[#allocation3 + $0xd9] sm:$0xff] %v7150_v56  ;;  %v7151_v2 = vmax.f32 %v7119_v39, 0.0  ;;  %v7250_v3 = vld [vmem:[#allocation3 + $0xc8] sm:$0xff] }
 0x5f4   : > { %7186 = vst [vmem:[#allocation3 + $0xf9] sm:$0xff] %v7153_v53  ;;  %v7248_v12 = vld [vmem:[#allocation3 + $0xb0] sm:$0xff]  ;;  %16843 = vmatpush3.bf16.msra.mxu0 %v18792_v62  ;;  %v20227_v8 = vpack.c.bf16 %v7153_v53, %v7152_v31  ;;  %v20237_v26 = vpack.c.bf16 %v7250_v3, %v7249_v43 }
 0x5f5   : > { %7184 = vst [vmem:[#allocation3 + $0xe1] sm:$0xff] %v7151_v2  ;;  %v16774_v36 = vpop.f32.mrb[20].mxu1  ;;  %v20229_v45 = vpack.c.bf16 %v7248_v12, %v7247_v18  ;;  %16844 = vmatprep.subr.bf16.mxu0 %v18793_v9  ;;  %v20234_v28 = vpack.c.bf16 %v7151_v2, %v7150_v56 }
 0x5f6   : > { %v7124_v16 = vadd.f32 %v16774_v36, %v20145_v11  ;;  %v6953_v40 = vpop.f32.mrb[21].mxu1 }
 0x5f7   : > { %v7122_v10 = vadd.f32 %v20145_v11, %v6953_v40  ;;  %v16775_v61 = vpop.f32.mrb[22].mxu1  ;;  %16813 = vmatmul.mubr.bf16.gmra.mrb[44].mxu0 %v20229_v45 }
 0x5f8   : > { %v7156_v57 = vmax.f32 %v7124_v16, 0.0  ;;  %v7125_v49 = vadd.f32 %v16775_v61, %v20145_v11  ;;  %v6956_v4 = vpop.f32.mrb[23].mxu1  ;;  %16816 = vmatprep.mubr.bf16.mxu0 %v20237_v26  ;;  %16845 = vmatpush3.bf16.msra.mxu0 %v18793_v9 }
 0x5f9   : > { %v7154_v19 = vmax.f32 %v7122_v10, 0.0  ;;  %v7123_v20 = vadd.f32 %v20145_v11, %v6956_v4  ;;  %16846 = vmatprep.subr.bf16.mxu0 %v18794_v52  ;;  %v7253_v60 = vld [vmem:[#allocation3 + $0xf0] sm:$0xff] }
 0x5fa   : > { %7189 = vst [vmem:[#allocation3 + $0x121] sm:$0xff] %v7156_v57  ;;  %v7157_v1 = vmax.f32 %v7125_v49, 0.0  ;;  %v7251_v51 = vld [vmem:[#allocation3 + $0xd8] sm:$0xff] }
 0x5fb   : > { %7187 = vst [vmem:[#allocation3 + $0x109] sm:$0xff] %v7154_v19  ;;  %v7155_v48 = vmax.f32 %v7123_v20, 0.0  ;;  %v7254_v21 = vld [vmem:[#allocation3 + $0xf8] sm:$0xff] }
 0x5fc   : > { %7190 = vst [vmem:[#allocation3 + $0x129] sm:$0xff] %v7157_v1  ;;  %v7252_v63 = vld [vmem:[#allocation3 + $0xe0] sm:$0xff]  ;;  %16847 = vmatpush3.bf16.msra.mxu0 %v18794_v52  ;;  %v20249_v58 = vpack.c.bf16 %v7157_v1, %v7156_v57  ;;  %v20257_v14 = vpack.c.bf16 %v7254_v21, %v7253_v60 }
 0x5fd   : > { %7188 = vst [vmem:[#allocation3 + $0x111] sm:$0xff] %v7155_v48  ;;  %v16778_v25 = vpop.f32.mrb[24].mxu1  ;;  %v20251_v47 = vpack.c.bf16 %v7252_v63, %v7251_v51  ;;  %16880 = vmatprep.subr.bf16.mxu0 %v20247_v46  ;;  %v20254_v35 = vpack.c.bf16 %v7155_v48, %v7154_v19 }
 0x5fe   : > { %v7128_v44 = vadd.f32 %v16778_v25, %v20145_v11  ;;  %v6969_v7 = vpop.f32.mrb[25].mxu1 }
 0x5ff   : > { %v7126_v42 = vadd.f32 %v20145_v11, %v6969_v7  ;;  %v16779_v62 = vpop.f32.mrb[26].mxu1  ;;  %16817 = vmatmul.mubr.bf16.gmra.mrb[48].mxu0 %v20251_v47  ;;  %v7604_v7 = vld [vmem:[#allocation3 + $0x9] sm:$0xff] }
 0x600   : > { %v7160_v27 = vmax.f32 %v7128_v44, 0.0  ;;  %v7129_v32 = vadd.f32 %v16779_v62, %v20145_v11  ;;  %v6972_v30 = vpop.f32.mrb[27].mxu1  ;;  %16820 = vmatprep.mubr.bf16.mxu0 %v20257_v14 }
 0x601   : > { %v7158_v24 = vmax.f32 %v7126_v42, 0.0  ;;  %v7127_v31 = vadd.f32 %v20145_v11, %v6972_v30  ;;  %v7257_v18 = vld [vmem:[#allocation3 + $0x120] sm:$0xff]  ;;  %v18796_v30 = vld [vmem:[%s21197_s2 + $0x2c8] sm:$0xff]  }
 0x602   : > { %7193 = vst [vmem:[#allocation3 + $0x151] sm:$0xff] %v7160_v27  ;;  %v7161_v6 = vmax.f32 %v7129_v32, 0.0  ;;  %v7255_v39 = vld [vmem:[#allocation3 + $0x108] sm:$0xff] }
 0x603   : > { %7191 = vst [vmem:[#allocation3 + $0x139] sm:$0xff] %v7158_v24  ;;  %v7159_v55 = vmax.f32 %v7127_v31, 0.0  ;;  %v7258_v56 = vld [vmem:[#allocation3 + $0x128] sm:$0xff] }
 0x604   : > { %7194 = vst [vmem:[#allocation3 + $0x159] sm:$0xff] %v7161_v6  ;;  %v7256_v9 = vld [vmem:[#allocation3 + $0x110] sm:$0xff]  ;;  %v20264_v53 = vpack.c.bf16 %v7161_v6, %v7160_v27  ;;  %v20271_v52 = vpack.c.bf16 %v7258_v56, %v7257_v18  ;;  %v18798_v31 = vld [vmem:[%s21197_s2 + $0x2d8] sm:$0xff]   ;;  %v7975_v6 = vld [vmem:[#allocation3 + $0x1a] sm:$0xff] }
 0x605   : > { %7192 = vst [vmem:[#allocation3 + $0x141] sm:$0xff] %v7159_v55  ;;  %v16782_v2 = vpop.f32.mrb[28].mxu1  ;;  %v20266_v3 = vpack.c.bf16 %v7256_v9, %v7255_v39  ;;  %v20268_v12 = vpack.c.bf16 %v7159_v55, %v7158_v24  ;;  %v18797_v24 = vld [vmem:[%s21197_s2 + $0x2d0] sm:$0xff]   ;;  %v7977_v56 = vld [vmem:[#allocation3 + $0x32] sm:$0xff] }
 0x606   : > { %v7132_v36 = vadd.f32 %v16782_v2, %v20145_v11  ;;  %v6985_v43 = vpop.f32.mrb[29].mxu1  ;;  %v7976_v55 = vld [vmem:[#allocation3 + $0x22] sm:$0xff]  ;;  %v7978_v39 = vld [vmem:[#allocation3 + $0x3a] sm:$0xff] }
 0x607   : > { %v7130_v16 = vadd.f32 %v20145_v11, %v6985_v43  ;;  %v16783_v40 = vpop.f32.mrb[30].mxu1  ;;  %16821 = vmatmul.mubr.bf16.gmra.mrb[52].mxu0 %v20266_v3  ;;  %v20331_v9 = vpack.c.bf16 %v7976_v55, %v7975_v6  ;;  %v18804_v2 = vld [vmem:[%s21197_s2 + $0x308] sm:$0xff]   ;;  %v20336_v18 = vpack.c.bf16 %v7978_v39, %v7977_v56  ;;  %v7979_v43 = vld [vmem:[#allocation3 + $0x4a] sm:$0xff]  ;;  %v7997_v56 = vld [vmem:[#allocation3 + $0x122] sm:$0xff] }
 0x608   : > { %v7164_v10 = vmax.f32 %v7132_v36, 0.0  ;;  %v7133_v61 = vadd.f32 %v16783_v40, %v20145_v11  ;;  %v6988_v57 = vpop.f32.mrb[31].mxu1  ;;  %16824 = vmatprep.mubr.bf16.mxu0 %v20271_v52  ;;  %v18805_v36 = vld [vmem:[%s21197_s2 + $0x310] sm:$0xff]   ;;  %v7995_v6 = vld [vmem:[#allocation3 + $0x10a] sm:$0xff]  ;;  %v7996_v55 = vld [vmem:[#allocation3 + $0x112] sm:$0xff] }
 0x609   : > { %v7162_v49 = vmax.f32 %v7130_v16, 0.0  ;;  %v7131_v4 = vadd.f32 %v20145_v11, %v6988_v57  ;;  %v7261_v25 = vld [vmem:[#allocation3 + $0x150] sm:$0xff]  ;;  %v7603_v11 = vld [vmem:[#allocation3 + $0x1] sm:$0xff] }
 0x60a   : > { %7197 = vst [vmem:[#allocation3 + $0x181] sm:$0xff] %v7164_v10  ;;  %v7165_v19 = vmax.f32 %v7133_v61, 0.0  ;;  %v7259_v48 = vld [vmem:[#allocation3 + $0x138] sm:$0xff]  ;;  %v7635_v27 = vpack.c.bf16 %v7604_v7, %v7603_v11  ;;  %v7981_v40 = vld [vmem:[#allocation3 + $0x62] sm:$0xff]  ;;  %v7998_v39 = vld [vmem:[#allocation3 + $0x12a] sm:$0xff] }
 0x60b   : > { %7195 = vst [vmem:[#allocation3 + $0x169] sm:$0xff] %v7162_v49  ;;  %v7163_v20 = vmax.f32 %v7131_v4, 0.0  ;;  %v7262_v1 = vld [vmem:[#allocation3 + $0x158] sm:$0xff]  ;;  %v18806_v57 = vld [vmem:[%s21197_s2 + $0x318] sm:$0xff]   ;;  %v18807_v4 = vld [vmem:[%s21197_s2 + $0x320] sm:$0xff]  }
 0x60c   : > { %7198 = vst [vmem:[#allocation3 + $0x189] sm:$0xff] %v7165_v19  ;;  %v7260_v21 = vld [vmem:[#allocation3 + $0x140] sm:$0xff]  ;;  %v20278_v51 = vpack.c.bf16 %v7165_v19, %v7164_v10  ;;  %v20284_v44 = vpack.c.bf16 %v7262_v1, %v7261_v25  ;;  %v7980_v16 = vld [vmem:[#allocation3 + $0x52] sm:$0xff]  ;;  %v7982_v10 = vld [vmem:[#allocation3 + $0x6a] sm:$0xff] }
 0x60d   : > { %7196 = vst [vmem:[#allocation3 + $0x171] sm:$0xff] %v7163_v20  ;;  %v20280_v63 = vpack.c.bf16 %v7260_v21, %v7259_v48  ;;  %v20282_v60 = vpack.c.bf16 %v7163_v20, %v7162_v49  ;;  %v20343_v61 = vpack.c.bf16 %v7980_v16, %v7979_v43  ;;  %v20348_v49 = vpack.c.bf16 %v7982_v10, %v7981_v40  ;;  %v7983_v19 = vld [vmem:[#allocation3 + $0x7a] sm:$0xff]  ;;  %v7984_v20 = vld [vmem:[#allocation3 + $0x82] sm:$0xff]  ;;  %v7985_v1 = vld [vmem:[#allocation3 + $0x92] sm:$0xff] }
 0x60e   : > { %v7986_v48 = vld [vmem:[#allocation3 + $0x9a] sm:$0xff]  ;;  %v20355_v21 = vpack.c.bf16 %v7984_v20, %v7983_v19  ;;  %v8000_v16 = vld [vmem:[#allocation3 + $0x142] sm:$0xff]  ;;  %v8001_v40 = vld [vmem:[#allocation3 + $0x152] sm:$0xff] }
 0x60f   : > { %16825 = vmatmul.mubr.bf16.gmra.mrb[56].mxu0 %v20280_v63  ;;  %v18808_v25 = vld [vmem:[%s21197_s2 + $0x328] sm:$0xff]   ;;  %v20360_v11 = vpack.c.bf16 %v7986_v48, %v7985_v1  ;;  %v18809_v7 = vld [vmem:[%s21197_s2 + $0x330] sm:$0xff]  }
 0x610   : > { %16828 = vmatprep.mubr.bf16.mxu0 %v20284_v44  ;;  %v7999_v43 = vld [vmem:[#allocation3 + $0x13a] sm:$0xff] }
 0x611   : > { %v8002_v10 = vld [vmem:[#allocation3 + $0x15a] sm:$0xff] }
 0x612   : > { %v7263_v42 = vld [vmem:[#allocation3 + $0x168] sm:$0xff]  ;;  %v18812_v48 = vld [vmem:[%s21197_s2 + $0x348] sm:$0xff]  }
 0x614   : > { %v7264_v62 = vld [vmem:[#allocation3 + $0x170] sm:$0xff] }
 0x615   : > { %v20288_v32 = vpack.c.bf16 %v7264_v62, %v7263_v42  ;;  %v7987_v42 = vld [vmem:[#allocation3 + $0xaa] sm:$0xff]  ;;  %v7988_v62 = vld [vmem:[#allocation3 + $0xb2] sm:$0xff] }
 0x616   : > { %v8003_v19 = vld [vmem:[#allocation3 + $0x16a] sm:$0xff]  ;;  %v8004_v20 = vld [vmem:[#allocation3 + $0x172] sm:$0xff] }
 0x617   : > { %16829 = vmatmul.mubr.bf16.gmra.mrb[60].mxu0 %v20288_v32  ;;  %v20397_v1 = vpack.c.bf16 %v8004_v20, %v8003_v19  ;;  %v9463_v19 = vld [vmem:[#allocation3 + $0x98] sm:$0xff] }
 0x618   : > { %16848 = vmatprep.mubr.bf16.mxu0 %v7635_v27  ;;  %v7989_v27 = vld [vmem:[#allocation3 + $0xc2] sm:$0xff]  ;;  %v9460_v20 = vld [vmem:[#allocation3 + $0x78] sm:$0xff] }
 0x61f   : > { %16849 = vmatmul.mubr.bf16.vlgmr.msra.gmra.mrb[32].mxu0 %v20153_v33  ;;  %v18800_v33 = vld [vmem:[%s21197_s2 + $0x2e8] sm:$0xff]  }
 0x620   : > { %16881 = vmatpush3.bf16.msra.mxu0 %v20247_v46  ;;  %16852 = vmatprep.mubr.bf16.mxu0 %v20151_v15  ;;  %v18799_v15 = vld [vmem:[%s21197_s2 + $0x2e0] sm:$0xff]  }
 0x621   : > { %16882 = vmatprep.subr.bf16.mxu0 %v18796_v30 }
 0x624   : > { %16883 = vmatpush3.bf16.msra.mxu0 %v18796_v30  ;;  %v7990_v30 = vld [vmem:[#allocation3 + $0xca] sm:$0xff] }
 0x625   : > { %16884 = vmatprep.subr.bf16.mxu0 %v18797_v24 }
 0x627   : > { %16853 = vmatmul.mubr.bf16.gmra.mrb[36].mxu0 %v20166_v23  ;;  %v18802_v23 = vld [vmem:[%s21197_s2 + $0x2f8] sm:$0xff]  }
 0x628   : > { %16856 = vmatprep.mubr.bf16.mxu0 %v20159_v34  ;;  %16885 = vmatpush3.bf16.msra.mxu0 %v18797_v24  ;;  %v18801_v34 = vld [vmem:[%s21197_s2 + $0x2f0] sm:$0xff]   ;;  %v20367_v24 = vpack.c.bf16 %v7988_v62, %v7987_v42 }
 0x629   : > { %16886 = vmatprep.subr.bf16.mxu0 %v18798_v31  ;;  %v8713_v42 = vld [vmem:[#allocation3 + $0x19] sm:$0xff] }
 0x62c   : > { %16887 = vmatpush3.bf16.msra.mxu0 %v18798_v31  ;;  %v18810_v31 = vld [vmem:[%s21197_s2 + $0x338] sm:$0xff]  }
 0x62d   : > { %16888 = vmatprep.subr.bf16.mxu0 %v18799_v15 }
 0x62f   : > { %16857 = vmatmul.mubr.bf16.gmra.mrb[40].mxu0 %v20190_v13  ;;  %v7973_v13 = vld [vmem:[#allocation3 + $0x2] sm:$0xff] }
 0x630   : > { %16860 = vmatprep.mubr.bf16.mxu0 %v20181_v37  ;;  %16889 = vmatpush3.bf16.msra.mxu0 %v18799_v15  ;;  %v18803_v37 = vld [vmem:[%s21197_s2 + $0x300] sm:$0xff]   ;;  %v20372_v15 = vpack.c.bf16 %v7990_v30, %v7989_v27  ;;  %v18821_v30 = vld [vmem:[%s21197_s2 + $0x390] sm:$0xff]  }
 0x631   : > { %16890 = vmatprep.subr.bf16.mxu0 %v18800_v33  ;;  %v8715_v27 = vld [vmem:[#allocation3 + $0x31] sm:$0xff] }
 0x634   : > { %16891 = vmatpush3.bf16.msra.mxu0 %v18800_v33  ;;  %v18811_v33 = vld [vmem:[%s21197_s2 + $0x340] sm:$0xff]  }
 0x635   : > { %16892 = vmatprep.subr.bf16.mxu0 %v18801_v34 }
 0x637   : > { %16861 = vmatmul.mubr.bf16.gmra.mrb[44].mxu0 %v20214_v22 }
 0x638   : > { %16864 = vmatprep.mubr.bf16.mxu0 %v20207_v38  ;;  %16893 = vmatpush3.bf16.msra.mxu0 %v18801_v34  ;;  %v7974_v38 = vld [vmem:[#allocation3 + $0xa] sm:$0xff]  ;;  %v7991_v34 = vld [vmem:[#allocation3 + $0xda] sm:$0xff] }
 0x639   : > { %16894 = vmatprep.subr.bf16.mxu0 %v18802_v23  ;;  %v8005_v46 = vpack.c.bf16 %v7974_v38, %v7973_v13  ;;  %v7994_v13 = vld [vmem:[#allocation3 + $0xfa] sm:$0xff] }
 0x63c   : > { %16895 = vmatpush3.bf16.msra.mxu0 %v18802_v23  ;;  %v7992_v23 = vld [vmem:[#allocation3 + $0xe2] sm:$0xff] }
 0x63d   : > { %16928 = vmatprep.subr.bf16.mxu0 %v18803_v37  ;;  %v20379_v38 = vpack.c.bf16 %v7992_v23, %v7991_v34  ;;  %v8719_v34 = vld [vmem:[#allocation3 + $0x61] sm:$0xff] }
 0x63f   : > { %16865 = vmatmul.mubr.bf16.gmra.mrb[48].mxu0 %v20234_v28 }
 0x640   : > { %16868 = vmatprep.mubr.bf16.mxu0 %v20227_v8 }
 0x647   : > { %16869 = vmatmul.mubr.bf16.gmra.mrb[52].mxu0 %v20254_v35 }
 0x648   : > { %16872 = vmatprep.mubr.bf16.mxu0 %v20249_v58 }
 0x64f   : > { %16873 = vmatmul.mubr.bf16.gmra.mrb[56].mxu0 %v20268_v12 }
 0x650   : > { %16876 = vmatprep.mubr.bf16.mxu0 %v20264_v53 }
 0x657   : > { %16877 = vmatmul.mubr.bf16.gmra.mrb[60].mxu0 %v20282_v60 }
 0x658   : > { %16896 = vmatprep.mubr.bf16.mxu0 %v8005_v46 }
 0x65f   : > { %16897 = vmatmul.mubr.bf16.vlgmr.msra.gmra.mrb[32].mxu0 %v20331_v9 }
 0x660   : > { %16929 = vmatpush3.bf16.msra.mxu0 %v18803_v37  ;;  %16900 = vmatprep.mubr.bf16.mxu0 %v20336_v18  ;;  %v7993_v37 = vld [vmem:[#allocation3 + $0xf2] sm:$0xff] }
 0x661   : > { %16930 = vmatprep.subr.bf16.mxu0 %v18804_v2  ;;  %v20381_v46 = vpack.c.bf16 %v7994_v13, %v7993_v37  ;;  %v18822_v37 = vld [vmem:[%s21197_s2 + $0x398] sm:$0xff]  }
 0x664   : > { %16931 = vmatpush3.bf16.msra.mxu0 %v18804_v2  ;;  %v20385_v2 = vpack.c.bf16 %v7996_v55, %v7995_v6  ;;  %v18823_v6 = vld [vmem:[%s21197_s2 + $0x3a0] sm:$0xff]   ;;  %v8724_v55 = vld [vmem:[#allocation3 + $0x99] sm:$0xff] }
 0x665   : > { %16932 = vmatprep.subr.bf16.mxu0 %v18805_v36 }
 0x667   : > { %16901 = vmatmul.mubr.bf16.gmra.mrb[36].mxu0 %v20343_v61 }
 0x668   : > { %16904 = vmatprep.mubr.bf16.mxu0 %v20348_v49  ;;  %16933 = vmatpush3.bf16.msra.mxu0 %v18805_v36  ;;  %v20387_v36 = vpack.c.bf16 %v7998_v39, %v7997_v56  ;;  %v8723_v56 = vld [vmem:[#allocation3 + $0x91] sm:$0xff] }
 0x669   : > { %16934 = vmatprep.subr.bf16.mxu0 %v18806_v57  ;;  %v20467_v39 = vpack.c.bf16 %v8724_v55, %v8723_v56  ;;  %v9474_v55 = vld [vmem:[#allocation3 + $0x120] sm:$0xff] }
 0x66c   : > { %16935 = vmatpush3.bf16.msra.mxu0 %v18806_v57  ;;  %v20391_v57 = vpack.c.bf16 %v8000_v16, %v7999_v43  ;;  %v18824_v43 = vld [vmem:[%s21197_s2 + $0x3a8] sm:$0xff]   ;;  %v20477_v16 = vld [vmem:[#allocation3 + $0xc1] sm:$0xff] }
 0x66d   : > { %16936 = vmatprep.subr.bf16.mxu0 %v18807_v4 }
 0x66f   : > { %16905 = vmatmul.mubr.bf16.gmra.mrb[40].mxu0 %v20355_v21 }
 0x670   : > { %16908 = vmatprep.mubr.bf16.mxu0 %v20360_v11  ;;  %16937 = vmatpush3.bf16.msra.mxu0 %v18807_v4  ;;  %v20393_v4 = vpack.c.bf16 %v8002_v10, %v8001_v40  ;;  %v8752_v40 = vpack.c.bf16 %v20203_v59, %v20477_v16  ;;  %v18826_v10 = vld [vmem:[%s21197_s2 + $0x3b8] sm:$0xff]   ;;  %v18828_v59 = vld [vmem:[%s21197_s2 + $0x3c8] sm:$0xff]  }
 0x671   : > { %16938 = vmatprep.subr.bf16.mxu0 %v18808_v25 }
 0x674   : > { %16939 = vmatpush3.bf16.msra.mxu0 %v18808_v25  ;;  %v18813_v25 = vld [vmem:[%s21197_s2 + $0x350] sm:$0xff]  }
 0x675   : > { %16940 = vmatprep.subr.bf16.mxu0 %v18809_v7 }
 0x677   : > { %16909 = vmatmul.mubr.bf16.gmra.mrb[44].mxu0 %v20367_v24 }
 0x678   : > { %16912 = vmatprep.mubr.bf16.mxu0 %v20372_v15  ;;  %16941 = vmatpush3.bf16.msra.mxu0 %v18809_v7 }
 0x679   : > { %16942 = vmatprep.subr.bf16.mxu0 %v18810_v31 }
 0x67c   : > { %16943 = vmatpush3.bf16.msra.mxu0 %v18810_v31  ;;  %v8720_v31 = vld [vmem:[#allocation3 + $0x69] sm:$0xff] }
 0x67d   : > { %16976 = vmatprep.subr.bf16.mxu0 %v18811_v33  ;;  %v20456_v23 = vpack.c.bf16 %v8720_v31, %v8719_v34  ;;  %v18843_v31 = vld [vmem:[%s21197_s2 + $0x440] sm:$0xff]  }
 0x67e   : > { %v9473_v34 = vld [vmem:[#allocation3 + $0x110] sm:$0xff] }
 0x67f   : > { %16913 = vmatmul.mubr.bf16.gmra.mrb[48].mxu0 %v20379_v38 }
 0x680   : > { %16916 = vmatprep.mubr.bf16.mxu0 %v20381_v46 }
 0x687   : > { %16917 = vmatmul.mubr.bf16.gmra.mrb[52].mxu0 %v20385_v2 }
 0x688   : > { %16920 = vmatprep.mubr.bf16.mxu0 %v20387_v36 }
 0x68f   : > { %16921 = vmatmul.mubr.bf16.gmra.mrb[56].mxu0 %v20391_v57 }
 0x690   : > { %16924 = vmatprep.mubr.bf16.mxu0 %v20393_v4 }
 0x697   : > { %16925 = vmatmul.mubr.bf16.gmra.mrb[60].mxu0 %v20397_v1 }
 0x698   : > { %16944 = vmatprep.mubr.bf16.mxu0 %v20161_v29  ;;  %v18814_v29 = vld [vmem:[%s21197_s2 + $0x358] sm:$0xff]  }
 0x69f   : > { %16945 = vmatmul.mubr.bf16.vlgmr.msra.gmra.mrb[32].mxu0 %v20169_v50  ;;  %v18815_v50 = vld [vmem:[%s21197_s2 + $0x360] sm:$0xff]  }
 0x6a0   : > { %16977 = vmatpush3.bf16.msra.mxu0 %v18811_v33  ;;  %16948 = vmatprep.mubr.bf16.mxu0 %v20184_v54  ;;  %v18816_v54 = vld [vmem:[%s21197_s2 + $0x368] sm:$0xff]  }
 0x6a1   : > { %16978 = vmatprep.subr.bf16.mxu0 %v18812_v48  ;;  %v20454_v33 = vld [vmem:[#allocation3 + $0x79] sm:$0xff] }
 0x6a2   : > { %v8749_v13 = vpack.c.bf16 %v20179_v5, %v20454_v33  ;;  %v18825_v5 = vld [vmem:[%s21197_s2 + $0x3b0] sm:$0xff]  }
 0x6a4   : > { %16979 = vmatpush3.bf16.msra.mxu0 %v18812_v48  ;;  %v9462_v48 = vld [vmem:[#allocation3 + $0x90] sm:$0xff] }
 0x6a5   : > { %16980 = vmatprep.subr.bf16.mxu0 %v18813_v25 }
 0x6a7   : > { %16949 = vmatmul.mubr.bf16.gmra.mrb[36].mxu0 %v20193_v41  ;;  %v18817_v41 = vld [vmem:[%s21197_s2 + $0x370] sm:$0xff]  }
 0x6a8   : > { %16952 = vmatprep.mubr.bf16.mxu0 %v20209_v17  ;;  %16981 = vmatpush3.bf16.msra.mxu0 %v18813_v25  ;;  %v18818_v17 = vld [vmem:[%s21197_s2 + $0x378] sm:$0xff]  }
 0x6a9   : > { %16982 = vmatprep.subr.bf16.mxu0 %v18814_v29  ;;  %v18838_v25 = vld [vmem:[%s21197_s2 + $0x418] sm:$0xff]  }
 0x6ac   : > { %16983 = vmatpush3.bf16.msra.mxu0 %v18814_v29  ;;  %v9490_v29 = vpack.c.bf16 %v9463_v19, %v9462_v48  ;;  %v9840_v19 = vld [vmem:[#allocation3 + $0xf1] sm:$0xff]  ;;  %v9845_v48 = vld [vmem:[#allocation3 + $0x129] sm:$0xff] }
 0x6ad   : > { %16984 = vmatprep.subr.bf16.mxu0 %v18815_v50 }
 0x6af   : > { %16953 = vmatmul.mubr.bf16.gmra.mrb[40].mxu0 %v20217_v0  ;;  %v18819_v0 = vld [vmem:[%s21197_s2 + $0x380] sm:$0xff]  }
 0x6b0   : > { %16956 = vmatprep.mubr.bf16.mxu0 %v20229_v45  ;;  %16985 = vmatpush3.bf16.msra.mxu0 %v18815_v50  ;;  %v8374_v45 = vld [vmem:[#allocation3 + $0x188] sm:$0xff]  ;;  %v18839_v50 = vld [vmem:[%s21197_s2 + $0x420] sm:$0xff]  }
 0x6b1   : > { %16986 = vmatprep.subr.bf16.mxu0 %v18816_v54 }
 0x6b4   : > { %16987 = vmatpush3.bf16.msra.mxu0 %v18816_v54  ;;  %v9465_v54 = vld [vmem:[#allocation3 + $0xb0] sm:$0xff] }
 0x6b5   : > { %16988 = vmatprep.subr.bf16.mxu0 %v18817_v41 }
 0x6b7   : > { %16957 = vmatmul.mubr.bf16.gmra.mrb[44].mxu0 %v20237_v26  ;;  %v8714_v26 = vld [vmem:[#allocation3 + $0x21] sm:$0xff] }
 0x6b8   : > { %16960 = vmatprep.mubr.bf16.mxu0 %v20251_v47  ;;  %16989 = vmatpush3.bf16.msra.mxu0 %v18817_v41  ;;  %v8373_v47 = vld [vmem:[#allocation3 + $0x180] sm:$0xff]  ;;  %v8745_v62 = vpack.c.bf16 %v8714_v26, %v8713_v42  ;;  %v9467_v41 = vld [vmem:[#allocation3 + $0xc8] sm:$0xff]  ;;  %v18840_v26 = vld [vmem:[%s21197_s2 + $0x428] sm:$0xff]  }
 0x6b9   : > { %16990 = vmatprep.subr.bf16.mxu0 %v18818_v17  ;;  %v20439_v7 = vpack.c.bf16 %v8374_v45, %v8373_v47  ;;  %v9466_v45 = vld [vmem:[#allocation3 + $0xc0] sm:$0xff] }
 0x6ba   : > { %v9492_v47 = vpack.c.bf16 %v9467_v41, %v9466_v45  ;;  %v18841_v42 = vld [vmem:[%s21197_s2 + $0x430] sm:$0xff]  }
 0x6bb   : > { %v9847_v41 = vld [vmem:[#allocation3 + $0x141] sm:$0xff] }
 0x6bc   : > { %16991 = vmatpush3.bf16.msra.mxu0 %v18818_v17  ;;  %v9464_v17 = vld [vmem:[#allocation3 + $0xa8] sm:$0xff] }
 0x6bd   : > { %17024 = vmatprep.subr.bf16.mxu0 %v18819_v0 }
 0x6bf   : > { %16961 = vmatmul.mubr.bf16.gmra.mrb[48].mxu0 %v20257_v14  ;;  %v8716_v14 = vld [vmem:[#allocation3 + $0x39] sm:$0xff] }
 0x6c0   : > { %16964 = vmatprep.mubr.bf16.mxu0 %v20266_v3  ;;  %v8718_v3 = vld [vmem:[#allocation3 + $0x51] sm:$0xff] }
 0x6c7   : > { %16965 = vmatmul.mubr.bf16.gmra.mrb[52].mxu0 %v20271_v52  ;;  %v20442_v52 = vpack.c.bf16 %v8716_v14, %v8715_v27  ;;  %v9471_v14 = vld [vmem:[#allocation3 + $0xf8] sm:$0xff] }
 0x6c8   : > { %16968 = vmatprep.mubr.bf16.mxu0 %v20280_v63  ;;  %v8717_v63 = vld [vmem:[#allocation3 + $0x49] sm:$0xff] }
 0x6cf   : > { %16969 = vmatmul.mubr.bf16.gmra.mrb[56].mxu0 %v20284_v44  ;;  %v18820_v44 = vld [vmem:[%s21197_s2 + $0x388] sm:$0xff]  }
 0x6d0   : > { %16972 = vmatprep.mubr.bf16.mxu0 %v20288_v32  ;;  %v20447_v32 = vpack.c.bf16 %v8718_v3, %v8717_v63  ;;  %v9468_v3 = vld [vmem:[#allocation3 + $0xd8] sm:$0xff]  ;;  %v9470_v63 = vld [vmem:[#allocation3 + $0xf0] sm:$0xff] }
 0x6d7   : > { %16973 = vmatmul.mubr.bf16.gmra.mrb[60].mxu0 %v20439_v7 }
 0x6d8   : > { %16992 = vmatprep.mubr.bf16.mxu0 %v8745_v62  ;;  %v9469_v62 = vld [vmem:[#allocation3 + $0xe0] sm:$0xff] }
 0x6d9   : > { %v9493_v27 = vpack.c.bf16 %v9469_v62, %v9468_v3  ;;  %v9853_v62 = vld [vmem:[#allocation3 + $0x189] sm:$0xff] }
 0x6df   : > { %16993 = vmatmul.mubr.bf16.vlgmr.msra.gmra.mrb[32].mxu0 %v20442_v52 }
 0x6e0   : > { %17025 = vmatpush3.bf16.msra.mxu0 %v18819_v0  ;;  %16996 = vmatprep.mubr.bf16.mxu0 %v20447_v32  ;;  %v9491_v0 = vpack.c.bf16 %v9465_v54, %v9464_v17  ;;  %v9849_v17 = vld [vmem:[#allocation3 + $0x159] sm:$0xff] }
 0x6e1   : > { %17026 = vmatprep.subr.bf16.mxu0 %v18820_v44 }
 0x6e4   : > { %17027 = vmatpush3.bf16.msra.mxu0 %v18820_v44  ;;  %v18842_v44 = vld [vmem:[%s21197_s2 + $0x438] sm:$0xff]  }
 0x6e5   : > { %17028 = vmatprep.subr.bf16.mxu0 %v18821_v30 }
 0x6e7   : > { %16997 = vmatmul.mubr.bf16.gmra.mrb[36].mxu0 %v20456_v23 }
 0x6e8   : > { %17000 = vmatprep.mubr.bf16.mxu0 %v8749_v13  ;;  %17029 = vmatpush3.bf16.msra.mxu0 %v18821_v30  ;;  %v9494_v30 = vpack.c.bf16 %v9471_v14, %v9470_v63  ;;  %v9472_v13 = vld [vmem:[#allocation3 + $0x108] sm:$0xff] }
 0x6e9   : > { %17030 = vmatprep.subr.bf16.mxu0 %v18822_v37  ;;  %v9850_v14 = vld [vmem:[#allocation3 + $0x169] sm:$0xff] }
 0x6ec   : > { %17031 = vmatpush3.bf16.msra.mxu0 %v18822_v37  ;;  %v9475_v37 = vld [vmem:[#allocation3 + $0x128] sm:$0xff] }
 0x6ed   : > { %17032 = vmatprep.subr.bf16.mxu0 %v18823_v6  ;;  %v9496_v56 = vpack.c.bf16 %v9475_v37, %v9474_v55  ;;  %v10195_v37 = vld [vmem:[#allocation3 + $0x3a] sm:$0xff]  ;;  %v10197_v55 = vld [vmem:[#allocation3 + $0x52] sm:$0xff] }
 0x6ef   : > { %17001 = vmatmul.mubr.bf16.gmra.mrb[40].mxu0 %v20467_v39 }
 0x6f0   : > { %17004 = vmatprep.mubr.bf16.mxu0 %v20214_v22  ;;  %17033 = vmatpush3.bf16.msra.mxu0 %v18823_v6  ;;  %v18827_v22 = vld [vmem:[%s21197_s2 + $0x3c0] sm:$0xff]   ;;  %v9495_v6 = vpack.c.bf16 %v9473_v34, %v9472_v13 }
 0x6f1   : > { %17034 = vmatprep.subr.bf16.mxu0 %v18824_v43  ;;  %v10194_v34 = vld [vmem:[#allocation3 + $0x32] sm:$0xff] }
 0x6f2   : > { %v10226_v13 = vpack.c.bf16 %v10195_v37, %v10194_v34 }
 0x6f4   : > { %17035 = vmatpush3.bf16.msra.mxu0 %v18824_v43  ;;  %v9477_v43 = vld [vmem:[#allocation3 + $0x140] sm:$0xff] }
 0x6f5   : > { %17036 = vmatprep.subr.bf16.mxu0 %v18825_v5 }
 0x6f7   : > { %17005 = vmatmul.mubr.bf16.gmra.mrb[44].mxu0 %v8752_v40  ;;  %v9476_v40 = vld [vmem:[#allocation3 + $0x138] sm:$0xff] }
 0x6f8   : > { %17008 = vmatprep.mubr.bf16.mxu0 %v20234_v28  ;;  %17037 = vmatpush3.bf16.msra.mxu0 %v18825_v5  ;;  %v18830_v28 = vld [vmem:[%s21197_s2 + $0x3d8] sm:$0xff]   ;;  %v9479_v5 = vld [vmem:[#allocation3 + $0x158] sm:$0xff] }
 0x6f9   : > { %17038 = vmatprep.subr.bf16.mxu0 %v18826_v10 }
 0x6fc   : > { %17039 = vmatpush3.bf16.msra.mxu0 %v18826_v10  ;;  %v9497_v10 = vpack.c.bf16 %v9477_v43, %v9476_v40  ;;  %v10199_v43 = vld [vmem:[#allocation3 + $0x6a] sm:$0xff] }
 0x6fd   : > { %17072 = vmatprep.subr.bf16.mxu0 %v18827_v22 }
 0x6ff   : > { %17009 = vmatmul.mubr.bf16.gmra.mrb[48].mxu0 %v20227_v8  ;;  %v18829_v8 = vld [vmem:[%s21197_s2 + $0x3d0] sm:$0xff]  }
 0x700   : > { %17012 = vmatprep.mubr.bf16.mxu0 %v20254_v35  ;;  %v18832_v35 = vld [vmem:[%s21197_s2 + $0x3e8] sm:$0xff]  }
 0x707   : > { %17013 = vmatmul.mubr.bf16.gmra.mrb[52].mxu0 %v20249_v58  ;;  %v18831_v58 = vld [vmem:[%s21197_s2 + $0x3e0] sm:$0xff]  }
 0x708   : > { %17016 = vmatprep.mubr.bf16.mxu0 %v20268_v12  ;;  %v18834_v12 = vld [vmem:[%s21197_s2 + $0x3f8] sm:$0xff]  }
 0x70f   : > { %17017 = vmatmul.mubr.bf16.gmra.mrb[56].mxu0 %v20264_v53  ;;  %v18833_v53 = vld [vmem:[%s21197_s2 + $0x3f0] sm:$0xff]  }
 0x710   : > { %17020 = vmatprep.mubr.bf16.mxu0 %v20282_v60  ;;  %v9113_v60 = vld [vmem:[#allocation3 + $0x182] sm:$0xff] }
 0x717   : > { %17021 = vmatmul.mubr.bf16.gmra.mrb[60].mxu0 %v20278_v51  ;;  %v18835_v51 = vld [vmem:[%s21197_s2 + $0x400] sm:$0xff]  }
 0x718   : > { %17040 = vmatprep.mubr.bf16.mxu0 %v20331_v9  ;;  %v9114_v9 = vld [vmem:[#allocation3 + $0x18a] sm:$0xff] }
 0x71f   : > { %17041 = vmatmul.mubr.bf16.vlgmr.msra.gmra.mrb[32].mxu0 %v20336_v18  ;;  %v9455_v18 = vld [vmem:[#allocation3 + $0x38] sm:$0xff] }
 0x720   : > { %17073 = vmatpush3.bf16.msra.mxu0 %v18827_v22  ;;  %17044 = vmatprep.mubr.bf16.mxu0 %v20343_v61  ;;  %v20534_v61 = vpack.c.bf16 %v9114_v9, %v9113_v60  ;;  %v9478_v22 = vld [vmem:[#allocation3 + $0x150] sm:$0xff]  ;;  %v20585_v60 = vld [vmem:[%s21197_s2 + $0x490] sm:$0xff]   ;;  %v20597_v9 = vld [vmem:[%s21197_s2 + $0x498] sm:$0xff]  }
 0x721   : > { %17074 = vmatprep.subr.bf16.mxu0 %v18828_v59 }
 0x724   : > { %17075 = vmatpush3.bf16.msra.mxu0 %v18828_v59  ;;  %v9498_v59 = vpack.c.bf16 %v9479_v5, %v9478_v22  ;;  %v10201_v22 = vld [vmem:[#allocation3 + $0x82] sm:$0xff] }
 0x725   : > { %17076 = vmatprep.subr.bf16.mxu0 %v18829_v8 }
 0x727   : > { %17045 = vmatmul.mubr.bf16.gmra.mrb[36].mxu0 %v20348_v49  ;;  %v9454_v49 = vld [vmem:[#allocation3 + $0x30] sm:$0xff] }
 0x728   : > { %17048 = vmatprep.mubr.bf16.mxu0 %v20355_v21  ;;  %17077 = vmatpush3.bf16.msra.mxu0 %v18829_v8  ;;  %v9486_v21 = vpack.c.bf16 %v9455_v18, %v9454_v49  ;;  %v9481_v8 = vld [vmem:[#allocation3 + $0x170] sm:$0xff]  ;;  %v9831_v18 = vld [vmem:[#allocation3 + $0x81] sm:$0xff] }
 0x729   : > { %17078 = vmatprep.subr.bf16.mxu0 %v18830_v28  ;;  %v20608_v49 = vld [vmem:[%s21197_s2 + $0x4a0] sm:$0xff]  }
 0x72c   : > { %17079 = vmatpush3.bf16.msra.mxu0 %v18830_v28  ;;  %v9480_v28 = vld [vmem:[#allocation3 + $0x168] sm:$0xff] }
 0x72d   : > { %17080 = vmatprep.subr.bf16.mxu0 %v18831_v58 }
 0x72f   : > { %17049 = vmatmul.mubr.bf16.gmra.mrb[40].mxu0 %v20360_v11  ;;  %v9457_v11 = vld [vmem:[#allocation3 + $0x50] sm:$0xff] }
 0x730   : > { %17052 = vmatprep.mubr.bf16.mxu0 %v20367_v24  ;;  %17081 = vmatpush3.bf16.msra.mxu0 %v18831_v58  ;;  %v9459_v24 = vld [vmem:[#allocation3 + $0x68] sm:$0xff]  ;;  %v9499_v58 = vpack.c.bf16 %v9481_v8, %v9480_v28  ;;  %v10203_v8 = vld [vmem:[#allocation3 + $0x9a] sm:$0xff] }
 0x731   : > { %17082 = vmatprep.subr.bf16.mxu0 %v18832_v35 }
 0x734   : > { %17083 = vmatpush3.bf16.msra.mxu0 %v18832_v35  ;;  %v18924_v35 = vld [vmem:[#allocation2] sm:$0xff] }
 0x735   : > { %17084 = vmatprep.subr.bf16.mxu0 %v18833_v53 }
 0x737   : > { %17053 = vmatmul.mubr.bf16.gmra.mrb[44].mxu0 %v20372_v15  ;;  %v9456_v15 = vld [vmem:[#allocation3 + $0x48] sm:$0xff] }
 0x738   : > { %17056 = vmatprep.mubr.bf16.mxu0 %v20379_v38  ;;  %17085 = vmatpush3.bf16.msra.mxu0 %v18833_v53  ;;  %v9487_v38 = vpack.c.bf16 %v9457_v11, %v9456_v15  ;;  %v20562_v53 = vpack.c.bf16 %v18924_v35, %v18924_v35  ;;  %v9837_v11 = vld [vmem:[#allocation3 + $0xc9] sm:$0xff] }
 0x739   : > { %17086 = vmatprep.subr.bf16.mxu0 %v18834_v12  ;;  %v10204_v35 = vld [vmem:[#allocation3 + $0xaa] sm:$0xff] }
 0x73c   : > { %17087 = vmatpush3.bf16.msra.mxu0 %v18834_v12  ;;  %v20568_v12 = vld [vmem:[%s21197_s2 + $0x480] sm:$0xff]  }
 0x73d   : > { %17120 = vmatprep.subr.bf16.mxu0 %v18835_v51  ;;  %17648 = vmatprep.subr.bf16.mxu1 %v20568_v12 }
 0x73e   : > { %17656 = vmatpush3.bf16.msra.mxu1 %v20568_v12 }
 0x73f   : > { %17057 = vmatmul.mubr.bf16.gmra.mrb[48].mxu0 %v20381_v46  ;;  %v9458_v46 = vld [vmem:[#allocation3 + $0x60] sm:$0xff] }
 0x740   : > { %17060 = vmatprep.mubr.bf16.mxu0 %v20385_v2  ;;  %v18836_v2 = vld [vmem:[%s21197_s2 + $0x408] sm:$0xff]  }
 0x747   : > { %17061 = vmatmul.mubr.bf16.gmra.mrb[52].mxu0 %v20387_v36  ;;  %v9488_v36 = vpack.c.bf16 %v9459_v24, %v9458_v46  ;;  %v9834_v24 = vld [vmem:[#allocation3 + $0xa9] sm:$0xff]  ;;  %v18849_v46 = vld [vmem:[%s21197_s2 + $0x470] sm:$0xff]  }
 0x748   : > { %17064 = vmatprep.mubr.bf16.mxu0 %v20391_v57  ;;  %v18837_v57 = vld [vmem:[%s21197_s2 + $0x410] sm:$0xff]  }
 0x74f   : > { %17065 = vmatmul.mubr.bf16.gmra.mrb[56].mxu0 %v20393_v4  ;;  %v9461_v4 = vld [vmem:[#allocation3 + $0x80] sm:$0xff] }
 0x750   : > { %17068 = vmatprep.mubr.bf16.mxu0 %v20397_v1  ;;  %v9489_v1 = vpack.c.bf16 %v9461_v4, %v9460_v20  ;;  %v18850_v20 = vld [vmem:[%s21197_s2 + $0x478] sm:$0xff]  }
 0x757   : > { %17069 = vmatmul.mubr.bf16.gmra.mrb[60].mxu0 %v20534_v61 }
 0x758   : > { %17088 = vmatprep.mubr.bf16.mxu0 %v9486_v21  ;;  %v9835_v21 = vld [vmem:[#allocation3 + $0xb1] sm:$0xff] }
 0x759   : > { %v9861_v15 = vpack.c.bf16 %v9835_v21, %v9834_v24  ;;  %v10212_v24 = vld [vmem:[#allocation3 + $0x10a] sm:$0xff] }
 0x75f   : > { %17089 = vmatmul.mubr.bf16.vlgmr.msra.gmra.mrb[32].mxu0 %v9487_v38  ;;  %v18848_v38 = vld [vmem:[%s21197_s2 + $0x468] sm:$0xff]  }
 0x760   : > { %17121 = vmatpush3.bf16.msra.mxu0 %v18835_v51  ;;  %17092 = vmatprep.mubr.bf16.mxu0 %v9488_v36  ;;  %v20575_v51 = vld [vmem:[%s21197_s2 + $0x488] sm:$0xff]  }
 0x761   : > { %17122 = vmatprep.subr.bf16.mxu0 %v18836_v2  ;;  %17649 = vmatprep.subr.bf16.mxu1 %v20575_v51  ;;  %v9841_v36 = vld [vmem:[#allocation3 + $0xf9] sm:$0xff] }
 0x762   : > { %17657 = vmatpush3.bf16.msra.mxu1 %v20575_v51 }
 0x763   : > { %17650 = vmatprep.subr.bf16.mxu1 %v20585_v60 }
 0x764   : > { %17123 = vmatpush3.bf16.msra.mxu0 %v18836_v2  ;;  %v9839_v2 = vld [vmem:[#allocation3 + $0xe1] sm:$0xff] }
 0x765   : > { %17124 = vmatprep.subr.bf16.mxu0 %v18837_v57 }
 0x766   : > { %17658 = vmatpush3.bf16.msra.mxu1 %v20585_v60 }
 0x767   : > { %17093 = vmatmul.mubr.bf16.gmra.mrb[36].mxu0 %v9489_v1  ;;  %17651 = vmatprep.subr.bf16.mxu1 %v20597_v9  ;;  %v9843_v1 = vld [vmem:[#allocation3 + $0x111] sm:$0xff] }
 0x768   : > { %17096 = vmatprep.mubr.bf16.mxu0 %v9490_v29  ;;  %17125 = vmatpush3.bf16.msra.mxu0 %v18837_v57  ;;  %v9838_v57 = vld [vmem:[#allocation3 + $0xd9] sm:$0xff] }
 0x769   : > { %17126 = vmatprep.subr.bf16.mxu0 %v18838_v25  ;;  %v9863_v4 = vpack.c.bf16 %v9839_v2, %v9838_v57  ;;  %v10216_v2 = vld [vmem:[#allocation3 + $0x13a] sm:$0xff]  ;;  %v10218_v57 = vld [vmem:[#allocation3 + $0x152] sm:$0xff] }
 0x76a   : > { %17659 = vmatpush3.bf16.msra.mxu1 %v20597_v9 }
 0x76b   : > { %17652 = vmatprep.subr.bf16.mxu1 %v20608_v49 }
 0x76c   : > { %17127 = vmatpush3.bf16.msra.mxu0 %v18838_v25  ;;  %v9842_v25 = vld [vmem:[#allocation3 + $0x109] sm:$0xff] }
 0x76d   : > { %17128 = vmatprep.subr.bf16.mxu0 %v18839_v50  ;;  %v9865_v29 = vpack.c.bf16 %v9843_v1, %v9842_v25  ;;  %v10225_v25 = vld [vmem:[#allocation3 + $0x1a2] sm:$0xff] }
 0x76e   : > { %17660 = vmatpush3.bf16.msra.mxu1 %v20608_v49 }
 0x76f   : > { %17097 = vmatmul.mubr.bf16.gmra.mrb[40].mxu0 %v9491_v0  ;;  %v9846_v0 = vld [vmem:[#allocation3 + $0x139] sm:$0xff] }
 0x770   : > { %17100 = vmatprep.mubr.bf16.mxu0 %v9492_v47  ;;  %17129 = vmatpush3.bf16.msra.mxu0 %v18839_v50  ;;  %v9844_v50 = vld [vmem:[#allocation3 + $0x121] sm:$0xff]  ;;  %v9867_v45 = vpack.c.bf16 %v9847_v41, %v9846_v0  ;;  %v20657_v41 = vld [vmem:[%s21198_s3 + $0x2] ss:$0 sm:$0xff] }
 0x771   : > { %17130 = vmatprep.subr.bf16.mxu0 %v18840_v26  ;;  %v9866_v54 = vpack.c.bf16 %v9845_v48, %v9844_v50  ;;  %v10224_v48 = vld [vmem:[#allocation3 + $0x19a] sm:$0xff] }
 0x772   : > { %v18856_v50 = vld [vmem:[%s21197_s2 + $0x4a8] sm:$0xff]  }
 0x773   : > { %17653 = vmatprep.subr.bf16.mxu1 %v18856_v50 }
 0x774   : > { %17131 = vmatpush3.bf16.msra.mxu0 %v18840_v26  ;;  %v9848_v26 = vld [vmem:[#allocation3 + $0x151] sm:$0xff]  ;;  %17661 = vmatpush3.bf16.msra.mxu1 %v18856_v50 }
 0x775   : > { %17132 = vmatprep.subr.bf16.mxu0 %v18841_v42  ;;  %v9868_v47 = vpack.c.bf16 %v9849_v17, %v9848_v26 }
 0x777   : > { %17101 = vmatmul.mubr.bf16.gmra.mrb[44].mxu0 %v9493_v27  ;;  %v9852_v27 = vld [vmem:[#allocation3 + $0x181] sm:$0xff] }
 0x778   : > { %17104 = vmatprep.mubr.bf16.mxu0 %v9494_v30  ;;  %17133 = vmatpush3.bf16.msra.mxu0 %v18841_v42  ;;  %v9851_v42 = vld [vmem:[#allocation3 + $0x171] sm:$0xff]  ;;  %v9870_v63 = vpack.c.bf16 %v9853_v62, %v9852_v27  ;;  %v9855_v30 = vld [vmem:[#allocation3 + $0x1a1] sm:$0xff] }
 0x779   : > { %17134 = vmatprep.subr.bf16.mxu0 %v18842_v44  ;;  %v9869_v3 = vpack.c.bf16 %v9851_v42, %v9850_v14 }
 0x77c   : > { %17135 = vmatpush3.bf16.msra.mxu0 %v18842_v44  ;;  %v9854_v44 = vld [vmem:[#allocation3 + $0x199] sm:$0xff] }
 0x77d   : > { %17168 = vmatprep.subr.bf16.mxu0 %v18843_v31 }
 0x77f   : > { %17105 = vmatmul.mubr.bf16.gmra.mrb[48].mxu0 %v9495_v6  ;;  %v10196_v6 = vld [vmem:[#allocation3 + $0x4a] sm:$0xff] }
 0x780   : > { %17108 = vmatprep.mubr.bf16.mxu0 %v9496_v56  ;;  %v10198_v56 = vld [vmem:[#allocation3 + $0x62] sm:$0xff]  ;;  %v10227_v5 = vpack.c.bf16 %v10197_v55, %v10196_v6 }
 0x781   : > { %v10228_v40 = vpack.c.bf16 %v10199_v43, %v10198_v56 }
 0x787   : > { %17109 = vmatmul.mubr.bf16.gmra.mrb[52].mxu0 %v9497_v10  ;;  %v10200_v10 = vld [vmem:[#allocation3 + $0x7a] sm:$0xff] }
 0x788   : > { %17112 = vmatprep.mubr.bf16.mxu0 %v9498_v59  ;;  %v10202_v59 = vld [vmem:[#allocation3 + $0x92] sm:$0xff]  ;;  %v10229_v28 = vpack.c.bf16 %v10201_v22, %v10200_v10 }
 0x78f   : > { %17113 = vmatmul.mubr.bf16.gmra.mrb[56].mxu0 %v9499_v58  ;;  %v10230_v58 = vpack.c.bf16 %v10203_v8, %v10202_v59 }
 0x790   : > { %17116 = vmatprep.mubr.bf16.mxu0 %v20439_v7  ;;  %v18844_v7 = vld [vmem:[%s21197_s2 + $0x448] sm:$0xff]  }
 0x797   : > { %17117 = vmatmul.mubr.bf16.gmra.mrb[60].mxu0 %v20562_v53 }
 0x798   : > { %17136 = vmatprep.mubr.bf16.mxu0 %v20442_v52  ;;  %v18845_v52 = vld [vmem:[%s21197_s2 + $0x450] sm:$0xff]  }
 0x79f   : > { %17137 = vmatmul.mubr.bf16.vlgmr.msra.gmra.mrb[32].mxu0 %v20447_v32  ;;  %v9859_v32 = vpack.c.bf16 %v9831_v18, %v20454_v33  ;;  %v18847_v33 = vld [vmem:[%s21197_s2 + $0x460] sm:$0xff]  }
 0x7a0   : > { %17169 = vmatpush3.bf16.msra.mxu0 %v18843_v31  ;;  %17140 = vmatprep.mubr.bf16.mxu0 %v20456_v23  ;;  %v18846_v23 = vld [vmem:[%s21197_s2 + $0x458] sm:$0xff]   ;;  %v9871_v31 = vpack.c.bf16 %v9855_v30, %v9854_v44 }
 0x7a1   : > { %17170 = vmatprep.subr.bf16.mxu0 %v18844_v7 }
 0x7a4   : > { %17171 = vmatpush3.bf16.msra.mxu0 %v18844_v7  ;;  %v10206_v7 = vld [vmem:[#allocation3 + $0xc2] sm:$0xff] }
 0x7a5   : > { %17172 = vmatprep.subr.bf16.mxu0 %v18845_v52 }
 0x7a7   : > { %17141 = vmatmul.mubr.bf16.gmra.mrb[36].mxu0 %v9859_v32  ;;  %v10208_v32 = vld [vmem:[#allocation3 + $0xda] sm:$0xff] }
 0x7a8   : > { %17144 = vmatprep.mubr.bf16.mxu0 %v20467_v39  ;;  %17173 = vmatpush3.bf16.msra.mxu0 %v18845_v52  ;;  %v9862_v39 = vpack.c.bf16 %v9837_v11, %v20477_v16  ;;  %v9864_v16 = vpack.c.bf16 %v9841_v36, %v9840_v19  ;;  %v10207_v52 = vld [vmem:[#allocation3 + $0xca] sm:$0xff]  ;;  %v10217_v36 = vld [vmem:[#allocation3 + $0x142] sm:$0xff] }
 0x7a9   : > { %17174 = vmatprep.subr.bf16.mxu0 %v18846_v23 }
 0x7ac   : > { %17175 = vmatpush3.bf16.msra.mxu0 %v18846_v23  ;;  %v10209_v23 = vld [vmem:[#allocation3 + $0xe2] sm:$0xff] }
 0x7ad   : > { %17176 = vmatprep.subr.bf16.mxu0 %v18847_v33  ;;  %v10233_v21 = vpack.c.bf16 %v10209_v23, %v10208_v32 }
 0x7af   : > { %17145 = vmatmul.mubr.bf16.gmra.mrb[40].mxu0 %v9861_v15  ;;  %v10213_v15 = vld [vmem:[#allocation3 + $0x112] sm:$0xff] }
 0x7b0   : > { %17148 = vmatprep.mubr.bf16.mxu0 %v9862_v39  ;;  %17177 = vmatpush3.bf16.msra.mxu0 %v18847_v33  ;;  %v10210_v33 = vld [vmem:[#allocation3 + $0xf2] sm:$0xff]  ;;  %v10235_v39 = vpack.c.bf16 %v10213_v15, %v10212_v24 }
 0x7b1   : > { %17178 = vmatprep.subr.bf16.mxu0 %v18848_v38 }
 0x7b4   : > { %17179 = vmatpush3.bf16.msra.mxu0 %v18848_v38  ;;  %v10214_v38 = vld [vmem:[#allocation3 + $0x122] sm:$0xff] }
 0x7b5   : > { %17180 = vmatprep.subr.bf16.mxu0 %v18849_v46 }
 0x7b7   : > { %17149 = vmatmul.mubr.bf16.gmra.mrb[44].mxu0 %v9863_v4  ;;  %v10237_v4 = vpack.c.bf16 %v10217_v36, %v10216_v2 }
 0x7b8   : > { %17152 = vmatprep.mubr.bf16.mxu0 %v9864_v16  ;;  %17181 = vmatpush3.bf16.msra.mxu0 %v18849_v46  ;;  %v10221_v16 = vld [vmem:[#allocation3 + $0x172] sm:$0xff] }
 0x7b9   : > { %17182 = vmatprep.subr.bf16.mxu0 %v18850_v20 }
 0x7bc   : > { %17183 = vmatpush3.bf16.msra.mxu0 %v18850_v20  ;;  %v10220_v20 = vld [vmem:[#allocation3 + $0x16a] sm:$0xff] }
 0x7bd   : > { %17216 = vmatprep.subr.bf16.mxu0 %v20568_v12  ;;  %v10239_v1 = vpack.c.bf16 %v10221_v16, %v10220_v20  ;;  %v18860_v20 = vld [vmem:[%s21197_s2 + $0x4c8] sm:$0xff]  }
 0x7bf   : > { %17153 = vmatmul.mubr.bf16.gmra.mrb[48].mxu0 %v9865_v29  ;;  %v10241_v29 = vpack.c.bf16 %v10225_v25, %v10224_v48 }
 0x7c0   : > { %17156 = vmatprep.mubr.bf16.mxu0 %v9866_v54  ;;  %v18857_v54 = vld [vmem:[%s21197_s2 + $0x4b0] sm:$0xff]  }
 0x7c1   : > { %17654 = vmatprep.subr.bf16.mxu1 %v18857_v54 }
 0x7c2   : > { %17662 = vmatpush3.bf16.msra.mxu1 %v18857_v54 }
 0x7c7   : > { %17157 = vmatmul.mubr.bf16.gmra.mrb[52].mxu0 %v9867_v45 }
 0x7c8   : > { %17160 = vmatprep.mubr.bf16.mxu0 %v9868_v47 }
 0x7cf   : > { %17161 = vmatmul.mubr.bf16.gmra.mrb[56].mxu0 %v9869_v3 }
 0x7d0   : > { %17164 = vmatprep.mubr.bf16.mxu0 %v9870_v63 }
 0x7d7   : > { %17165 = vmatmul.mubr.bf16.gmra.mrb[60].mxu0 %v9871_v31 }
 0x7d8   : > { %17184 = vmatprep.mubr.bf16.mxu0 %v10226_v13 }
 0x7df   : > { %17185 = vmatmul.mubr.bf16.vlgmr.msra.gmra.mrb[32].mxu0 %v10227_v5 }
 0x7e0   : > { %17188 = vmatprep.mubr.bf16.mxu0 %v10228_v40  ;;  %17217 = vmatpush3.bf16.msra.mxu0 %v20568_v12  ;;  %v10205_v12 = vld [vmem:[#allocation3 + $0xb2] sm:$0xff] }
 0x7e1   : > { %17218 = vmatprep.subr.bf16.mxu0 %v20575_v51  ;;  %v10231_v18 = vpack.c.bf16 %v10205_v12, %v10204_v35 }
 0x7e4   : > { %17219 = vmatpush3.bf16.msra.mxu0 %v20575_v51  ;;  %v10232_v51 = vpack.c.bf16 %v10207_v52, %v10206_v7 }
 0x7e5   : > { %17220 = vmatprep.subr.bf16.mxu0 %v20585_v60 }
 0x7e7   : > { %17189 = vmatmul.mubr.bf16.gmra.mrb[36].mxu0 %v10229_v28 }
 0x7e8   : > { %17192 = vmatprep.mubr.bf16.mxu0 %v10230_v58  ;;  %17221 = vmatpush3.bf16.msra.mxu0 %v20585_v60  ;;  %v10211_v60 = vld [vmem:[#allocation3 + $0xfa] sm:$0xff] }
 0x7e9   : > { %17222 = vmatprep.subr.bf16.mxu0 %v20597_v9  ;;  %v10234_v11 = vpack.c.bf16 %v10211_v60, %v10210_v33 }
 0x7ec   : > { %17223 = vmatpush3.bf16.msra.mxu0 %v20597_v9  ;;  %v10215_v9 = vld [vmem:[#allocation3 + $0x12a] sm:$0xff] }
 0x7ed   : > { %17224 = vmatprep.subr.bf16.mxu0 %v20608_v49  ;;  %v10236_v46 = vpack.c.bf16 %v10215_v9, %v10214_v38 }
 0x7ef   : > { %17193 = vmatmul.mubr.bf16.gmra.mrb[40].mxu0 %v10231_v18 }
 0x7f0   : > { %17196 = vmatprep.mubr.bf16.mxu0 %v10232_v51  ;;  %17225 = vmatpush3.bf16.msra.mxu0 %v20608_v49  ;;  %v10219_v49 = vld [vmem:[#allocation3 + $0x15a] sm:$0xff] }
 0x7f1   : > { %v10238_v19 = vpack.c.bf16 %v10219_v49, %v10218_v57  ;;  %17226 = vmatprep.subr.bf16.mxu0 %v18856_v50 }
 0x7f4   : > { %17227 = vmatpush3.bf16.msra.mxu0 %v18856_v50 }
 0x7f5   : > { %17228 = vmatprep.subr.bf16.mxu0 %v18857_v54 }
 0x7f7   : > { %17197 = vmatmul.mubr.bf16.gmra.mrb[44].mxu0 %v10233_v21 }
 0x7f8   : > { %17200 = vmatprep.mubr.bf16.mxu0 %v10234_v11  ;;  %17229 = vmatpush3.bf16.msra.mxu0 %v18857_v54 }
 0x7ff   : > { %17201 = vmatmul.mubr.bf16.gmra.mrb[48].mxu0 %v10235_v39 }
 0x800   : > { %17204 = vmatprep.mubr.bf16.mxu0 %v10236_v46 }
 0x807   : > { %17205 = vmatmul.mubr.bf16.gmra.mrb[52].mxu0 %v10237_v4 }
 0x808   : > { %17208 = vmatprep.mubr.bf16.mxu0 %v10238_v19 }
 0x80f   : > { %17209 = vmatmul.mubr.bf16.gmra.mrb[56].mxu0 %v10239_v1 }
 0x810   : > { %17212 = vmatprep.mubr.bf16.mxu0 %v20534_v61  ;;  %v18858_v61 = vld [vmem:[%s21197_s2 + $0x4b8] sm:$0xff]  }
 0x811   : > { %17230 = vmatprep.subr.bf16.mxu0 %v18858_v61  ;;  %17655 = vmatprep.subr.bf16.mxu1 %v18858_v61 }
 0x812   : > { %17231 = vmatpush3.bf16.msra.mxu0 %v18858_v61  ;;  %17663 = vmatpush3.bf16.msra.mxu1 %v18858_v61 }
 0x817   : > { %17213 = vmatmul.mubr.bf16.gmra.mrb[60].mxu0 %v10241_v29 }
 0x818   : > { %17232 = vmatprep.mubr.bf16.mxu0 %v20562_v53  ;;  %v20651_v53 = vld [vmem:[%s21197_s2 + $0x4c0] sm:$0xff]  }
 0x819   : > { %17264 = vmatprep.subr.bf16.mxu1 %v20651_v53 }
 0x8b2   : > { %v17186_v17 = vpop.f32.mrb[32].mxu0 }
 0x8b3   : > { %v10604_v0 = vadd.f32 %v17186_v17, %v20657_v41  ;;  %v10373_v45 = vpop.f32.mrb[33].mxu0 }
 0x8b4   : > { %v10602_v26 = vadd.f32 %v20657_v41, %v10373_v45  ;;  %v17187_v47 = vpop.f32.mrb[34].mxu0 }
 0x8b5   : > { %v10636_v42 = vmax.f32 %v10604_v0, 0.0  ;;  %v10605_v62 = vadd.f32 %v17187_v47, %v20657_v41  ;;  %v10376_v14 = vpop.f32.mrb[35].mxu0 }
 0x8b6   : > { %v10634_v3 = vmax.f32 %v10602_v26, 0.0  ;;  %v10603_v27 = vadd.f32 %v20657_v41, %v10376_v14  ;;  %v18861_v26 = vld [vmem:[%s21197_s2 + $0x4d0] sm:$0xff]  }
 0x8b7   : > { %10668 = vst [vmem:[#allocation2 + $0x31] sm:$0xff] %v10636_v42  ;;  %v10637_v63 = vmax.f32 %v10605_v62, 0.0 }
 0x8b8   : > { %10666 = vst [vmem:[#allocation2 + $0x19] sm:$0xff] %v10634_v3  ;;  %v10635_v44 = vmax.f32 %v10603_v27, 0.0 }
 0x8b9   : > { %10669 = vst [vmem:[#allocation2 + $0x39] sm:$0xff] %v10637_v63  ;;  %v20663_v30 = vpack.c.bf16 %v10637_v63, %v10636_v42 }
 0x8ba   : > { %10667 = vst [vmem:[#allocation2 + $0x21] sm:$0xff] %v10635_v44  ;;  %v17190_v31 = vpop.f32.mrb[36].mxu0  ;;  %v20665_v34 = vpack.c.bf16 %v10635_v44, %v10634_v3 }
 0x8bb   : > { %v10608_v37 = vadd.f32 %v17190_v31, %v20657_v41  ;;  %v10389_v13 = vpop.f32.mrb[37].mxu0  ;;  %v18862_v31 = vld [vmem:[%s21197_s2 + $0x4d8] sm:$0xff]  }
 0x8bc   : > { %v10606_v6 = vadd.f32 %v20657_v41, %v10389_v13  ;;  %v17191_v55 = vpop.f32.mrb[38].mxu0 }
 0x8bd   : > { %v10640_v56 = vmax.f32 %v10608_v37, 0.0  ;;  %v10609_v43 = vadd.f32 %v17191_v55, %v20657_v41  ;;  %v10392_v5 = vpop.f32.mrb[39].mxu0 }
 0x8be   : > { %v10638_v40 = vmax.f32 %v10606_v6, 0.0  ;;  %v10607_v10 = vadd.f32 %v20657_v41, %v10392_v5  ;;  %v10736_v8 = vld [vmem:[#allocation2 + $0x30] sm:$0xff] }
 0x8bf   : > { %10672 = vst [vmem:[#allocation2 + $0x61] sm:$0xff] %v10640_v56  ;;  %v10641_v22 = vmax.f32 %v10609_v43, 0.0  ;;  %v10734_v35 = vld [vmem:[#allocation2 + $0x18] sm:$0xff] }
 0x8c0   : > { %10670 = vst [vmem:[#allocation2 + $0x49] sm:$0xff] %v10638_v40  ;;  %v10639_v59 = vmax.f32 %v10607_v10, 0.0  ;;  %v10737_v28 = vld [vmem:[#allocation2 + $0x38] sm:$0xff] }
 0x8c1   : > { %10673 = vst [vmem:[#allocation2 + $0x69] sm:$0xff] %v10641_v22  ;;  %v20671_v58 = vpack.c.bf16 %v10737_v28, %v10736_v8  ;;  %v10735_v12 = vld [vmem:[#allocation2 + $0x20] sm:$0xff]  ;;  %v20673_v7 = vpack.c.bf16 %v10641_v22, %v10640_v56 }
 0x8c2   : > { %10671 = vst [vmem:[#allocation2 + $0x51] sm:$0xff] %v10639_v59  ;;  %v17194_v52 = vpop.f32.mrb[40].mxu0  ;;  %v20675_v18 = vpack.c.bf16 %v10735_v12, %v10734_v35  ;;  %v20677_v51 = vpack.c.bf16 %v10639_v59, %v10638_v40  ;;  %v18863_v8 = vld [vmem:[%s21197_s2 + $0x4e0] sm:$0xff]  }
 0x8c3   : > { %v10612_v32 = vadd.f32 %v17194_v52, %v20657_v41  ;;  %v10405_v23 = vpop.f32.mrb[41].mxu0  ;;  %17236 = vmatprep.mubr.bf16.mxu1 %v20671_v58 }
 0x8c4   : > { %v10610_v33 = vadd.f32 %v20657_v41, %v10405_v23  ;;  %v17195_v60 = vpop.f32.mrb[42].mxu0  ;;  %17233 = vmatmul.mubr.bf16.vlgmr.msra.gmra.mrb[64].mxu0 %v20675_v18 }
 0x8c5   : > { %v10644_v21 = vmax.f32 %v10612_v32, 0.0  ;;  %v10613_v11 = vadd.f32 %v17195_v60, %v20657_v41  ;;  %v10408_v24 = vpop.f32.mrb[43].mxu0 }
 0x8c6   : > { %v10642_v15 = vmax.f32 %v10610_v33, 0.0  ;;  %v10611_v38 = vadd.f32 %v20657_v41, %v10408_v24  ;;  %v10740_v19 = vld [vmem:[#allocation2 + $0x60] sm:$0xff] }
 0x8c7   : > { %10676 = vst [vmem:[#allocation2 + $0x91] sm:$0xff] %v10644_v21  ;;  %v10645_v9 = vmax.f32 %v10613_v11, 0.0  ;;  %v10738_v2 = vld [vmem:[#allocation2 + $0x48] sm:$0xff] }
 0x8c8   : > { %10674 = vst [vmem:[#allocation2 + $0x79] sm:$0xff] %v10642_v15  ;;  %v10643_v39 = vmax.f32 %v10611_v38, 0.0  ;;  %v10741_v46 = vld [vmem:[#allocation2 + $0x68] sm:$0xff] }
 0x8c9   : > { %10677 = vst [vmem:[#allocation2 + $0x99] sm:$0xff] %v10645_v9  ;;  %v10739_v36 = vld [vmem:[#allocation2 + $0x50] sm:$0xff]  ;;  %v20685_v57 = vpack.c.bf16 %v10645_v9, %v10644_v21  ;;  %v20695_v25 = vpack.c.bf16 %v10741_v46, %v10740_v19  ;;  %v18864_v11 = vld [vmem:[%s21197_s2 + $0x4e8] sm:$0xff]  }
 0x8ca   : > { %10675 = vst [vmem:[#allocation2 + $0x81] sm:$0xff] %v10643_v39  ;;  %v17198_v49 = vpop.f32.mrb[44].mxu0  ;;  %v20687_v4 = vpack.c.bf16 %v10739_v36, %v10738_v2  ;;  %v20692_v16 = vpack.c.bf16 %v10643_v39, %v10642_v15 }
 0x8cb   : > { %v10616_v1 = vadd.f32 %v17198_v49, %v20657_v41  ;;  %v10421_v48 = vpop.f32.mrb[45].mxu0 }
 0x8cc   : > { %v10614_v29 = vadd.f32 %v20657_v41, %v10421_v48  ;;  %v17199_v50 = vpop.f32.mrb[46].mxu0  ;;  %17237 = vmatmul.mubr.bf16.vlgmr.msra.gmra.mrb[32].mxu1 %v20687_v4 }
 0x8cd   : > { %v10648_v54 = vmax.f32 %v10616_v1, 0.0  ;;  %v10617_v61 = vadd.f32 %v17199_v50, %v20657_v41  ;;  %17265 = vmatpush3.bf16.msra.mxu1 %v20651_v53  ;;  %v10424_v17 = vpop.f32.mrb[47].mxu0  ;;  %17240 = vmatprep.mubr.bf16.mxu1 %v20695_v25  ;;  %v18865_v1 = vld [vmem:[%s21197_s2 + $0x4f0] sm:$0xff]  }
 0x8ce   : > { %v10646_v0 = vmax.f32 %v10614_v29, 0.0  ;;  %v10615_v45 = vadd.f32 %v20657_v41, %v10424_v17  ;;  %17266 = vmatprep.subr.bf16.mxu1 %v18860_v20  ;;  %v10744_v44 = vld [vmem:[#allocation2 + $0x90] sm:$0xff] }
 0x8cf   : > { %10680 = vst [vmem:[#allocation2 + $0xc1] sm:$0xff] %v10648_v54  ;;  %v10649_v47 = vmax.f32 %v10617_v61, 0.0  ;;  %v10742_v53 = vld [vmem:[#allocation2 + $0x78] sm:$0xff] }
 0x8d0   : > { %10678 = vst [vmem:[#allocation2 + $0xa9] sm:$0xff] %v10646_v0  ;;  %v20706_v42 = vmax.f32 %v10615_v45, 0.0  ;;  %v10745_v62 = vld [vmem:[#allocation2 + $0x98] sm:$0xff] }
 0x8d1   : > { %10681 = vst [vmem:[#allocation2 + $0xc9] sm:$0xff] %v10649_v47  ;;  %17267 = vmatpush3.bf16.msra.mxu1 %v18860_v20  ;;  %v10743_v14 = vld [vmem:[#allocation2 + $0x80] sm:$0xff]  ;;  %v20708_v3 = vpack.c.bf16 %v10649_v47, %v10648_v54  ;;  %v20720_v55 = vpack.c.bf16 %v10745_v62, %v10744_v44  ;;  %v18866_v47 = vld [vmem:[%s21197_s2 + $0x4f8] sm:$0xff]  }
 0x8d2   : > { %10679 = vst [vmem:[#allocation2 + $0xb1] sm:$0xff] %v20706_v42  ;;  %v17202_v27 = vpop.f32.mrb[48].mxu0  ;;  %v20711_v63 = vpack.c.bf16 %v10743_v14, %v10742_v53  ;;  %17268 = vmatprep.subr.bf16.mxu1 %v18861_v26  ;;  %v20717_v37 = vpack.c.bf16 %v20706_v42, %v10646_v0 }
 0x8d3   : > { %v10620_v13 = vadd.f32 %v17202_v27, %v20657_v41  ;;  %v10437_v6 = vpop.f32.mrb[49].mxu0 }
 0x8d4   : > { %v10618_v56 = vadd.f32 %v20657_v41, %v10437_v6  ;;  %v17203_v43 = vpop.f32.mrb[50].mxu0  ;;  %17241 = vmatmul.mubr.bf16.gmra.mrb[36].mxu1 %v20711_v63 }
 0x8d5   : > { %v10652_v5 = vmax.f32 %v10620_v13, 0.0  ;;  %v10621_v40 = vadd.f32 %v17203_v43, %v20657_v41  ;;  %v10440_v10 = vpop.f32.mrb[51].mxu0  ;;  %17244 = vmatprep.mubr.bf16.mxu1 %v20720_v55  ;;  %17269 = vmatpush3.bf16.msra.mxu1 %v18861_v26 }
 0x8d6   : > { %v10650_v22 = vmax.f32 %v10618_v56, 0.0  ;;  %v10619_v59 = vadd.f32 %v20657_v41, %v10440_v10  ;;  %17270 = vmatprep.subr.bf16.mxu1 %v18862_v31  ;;  %v10748_v21 = vld [vmem:[#allocation2 + $0xc0] sm:$0xff] }
 0x8d7   : > { %10684 = vst [vmem:[#allocation2 + $0xf1] sm:$0xff] %v10652_v5  ;;  %v20730_v28 = vmax.f32 %v10621_v40, 0.0  ;;  %v10746_v52 = vld [vmem:[#allocation2 + $0xa8] sm:$0xff]  ;;  %v18867_v40 = vld [vmem:[%s21197_s2 + $0x500] sm:$0xff]  }
 0x8d8   : > { %10682 = vst [vmem:[#allocation2 + $0xd9] sm:$0xff] %v10650_v22  ;;  %v10651_v35 = vmax.f32 %v10619_v59, 0.0  ;;  %v10749_v12 = vld [vmem:[#allocation2 + $0xc8] sm:$0xff] }
 0x8d9   : > { %10685 = vst [vmem:[#allocation2 + $0xf9] sm:$0xff] %v20730_v28  ;;  %v10747_v32 = vld [vmem:[#allocation2 + $0xb0] sm:$0xff]  ;;  %17271 = vmatpush3.bf16.msra.mxu1 %v18862_v31  ;;  %v20734_v23 = vpack.c.bf16 %v20730_v28, %v10652_v5  ;;  %v20744_v9 = vpack.c.bf16 %v10749_v12, %v10748_v21 }
 0x8da   : > { %10683 = vst [vmem:[#allocation2 + $0xe1] sm:$0xff] %v10651_v35  ;;  %v17206_v33 = vpop.f32.mrb[52].mxu0  ;;  %v20736_v60 = vpack.c.bf16 %v10747_v32, %v10746_v52  ;;  %17272 = vmatprep.subr.bf16.mxu1 %v18863_v8  ;;  %v20741_v24 = vpack.c.bf16 %v10651_v35, %v10650_v22 }
 0x8db   : > { %v10624_v15 = vadd.f32 %v17206_v33, %v20657_v41  ;;  %v10453_v38 = vpop.f32.mrb[53].mxu0 }
 0x8dc   : > { %v10622_v39 = vadd.f32 %v20657_v41, %v10453_v38  ;;  %v17207_v46 = vpop.f32.mrb[54].mxu0  ;;  %17245 = vmatmul.mubr.bf16.gmra.mrb[40].mxu1 %v20736_v60 }
 0x8dd   : > { %v10656_v2 = vmax.f32 %v10624_v15, 0.0  ;;  %v10625_v36 = vadd.f32 %v17207_v46, %v20657_v41  ;;  %v10456_v49 = vpop.f32.mrb[55].mxu0  ;;  %17248 = vmatprep.mubr.bf16.mxu1 %v20744_v9  ;;  %17273 = vmatpush3.bf16.msra.mxu1 %v18863_v8 }
 0x8de   : > { %v10654_v19 = vmax.f32 %v10622_v39, 0.0  ;;  %v10623_v20 = vadd.f32 %v20657_v41, %v10456_v49  ;;  %17274 = vmatprep.subr.bf16.mxu1 %v18864_v11  ;;  %v10752_v26 = vld [vmem:[#allocation2 + $0xf0] sm:$0xff] }
 0x8df   : > { %10688 = vst [vmem:[#allocation2 + $0x121] sm:$0xff] %v10656_v2  ;;  %v10657_v48 = vmax.f32 %v10625_v36, 0.0  ;;  %v10750_v54 = vld [vmem:[#allocation2 + $0xd8] sm:$0xff] }
 0x8e0   : > { %10686 = vst [vmem:[#allocation2 + $0x109] sm:$0xff] %v10654_v19  ;;  %v10655_v29 = vmax.f32 %v10623_v20, 0.0  ;;  %v10753_v50 = vld [vmem:[#allocation2 + $0xf8] sm:$0xff] }
 0x8e1   : > { %10689 = vst [vmem:[#allocation2 + $0x129] sm:$0xff] %v10657_v48  ;;  %v10751_v61 = vld [vmem:[#allocation2 + $0xe0] sm:$0xff]  ;;  %17275 = vmatpush3.bf16.msra.mxu1 %v18864_v11  ;;  %v20754_v17 = vpack.c.bf16 %v10657_v48, %v10656_v2  ;;  %v20764_v27 = vpack.c.bf16 %v10753_v50, %v10752_v26 }
 0x8e2   : > { %10687 = vst [vmem:[#allocation2 + $0x111] sm:$0xff] %v10655_v29  ;;  %v17210_v0 = vpop.f32.mrb[56].mxu0  ;;  %v20756_v45 = vpack.c.bf16 %v10751_v61, %v10750_v54  ;;  %17276 = vmatprep.subr.bf16.mxu1 %v18865_v1  ;;  %v20761_v62 = vpack.c.bf16 %v10655_v29, %v10654_v19 }
 0x8e3   : > { %v10628_v53 = vadd.f32 %v17210_v0, %v20657_v41  ;;  %v10469_v14 = vpop.f32.mrb[57].mxu0 }
 0x8e4   : > { %v10626_v44 = vadd.f32 %v20657_v41, %v10469_v14  ;;  %v17211_v31 = vpop.f32.mrb[58].mxu0  ;;  %17249 = vmatmul.mubr.bf16.gmra.mrb[44].mxu1 %v20756_v45  ;;  %v11103_v14 = vld [vmem:[#allocation2 + $0x9] sm:$0xff] }
 0x8e5   : > { %v10660_v13 = vmax.f32 %v10628_v53, 0.0  ;;  %v10629_v6 = vadd.f32 %v17211_v31, %v20657_v41  ;;  %v10472_v56 = vpop.f32.mrb[59].mxu0  ;;  %17252 = vmatprep.mubr.bf16.mxu1 %v20764_v27  ;;  %17277 = vmatpush3.bf16.msra.mxu1 %v18865_v1 }
 0x8e6   : > { %v10658_v43 = vmax.f32 %v10626_v44, 0.0  ;;  %v10627_v5 = vadd.f32 %v20657_v41, %v10472_v56  ;;  %17278 = vmatprep.subr.bf16.mxu1 %v18866_v47  ;;  %v10756_v33 = vld [vmem:[#allocation2 + $0x120] sm:$0xff]  ;;  %v18868_v56 = vld [vmem:[%s21197_s2 + $0x508] sm:$0xff]  }
 0x8e7   : > { %10692 = vst [vmem:[#allocation2 + $0x151] sm:$0xff] %v10660_v13  ;;  %v10661_v10 = vmax.f32 %v10629_v6, 0.0  ;;  %v10754_v8 = vld [vmem:[#allocation2 + $0x108] sm:$0xff] }
 0x8e8   : > { %10690 = vst [vmem:[#allocation2 + $0x139] sm:$0xff] %v10658_v43  ;;  %v10659_v22 = vmax.f32 %v10627_v5, 0.0  ;;  %v10757_v59 = vld [vmem:[#allocation2 + $0x128] sm:$0xff]  ;;  %v18870_v5 = vld [vmem:[%s21197_s2 + $0x518] sm:$0xff]  }
 0x8e9   : > { %10693 = vst [vmem:[#allocation2 + $0x159] sm:$0xff] %v10661_v10  ;;  %v10755_v35 = vld [vmem:[#allocation2 + $0x110] sm:$0xff]  ;;  %17279 = vmatpush3.bf16.msra.mxu1 %v18866_v47  ;;  %v20774_v12 = vpack.c.bf16 %v10661_v10, %v10660_v13  ;;  %v20781_v38 = vpack.c.bf16 %v10757_v59, %v10756_v33  ;;  %v11475_v10 = vld [vmem:[#allocation2 + $0x22] sm:$0xff]  ;;  %v11477_v59 = vld [vmem:[#allocation2 + $0x3a] sm:$0xff] }
 0x8ea   : > { %10691 = vst [vmem:[#allocation2 + $0x141] sm:$0xff] %v10659_v22  ;;  %v17214_v52 = vpop.f32.mrb[60].mxu0  ;;  %v20776_v32 = vpack.c.bf16 %v10755_v35, %v10754_v8  ;;  %17312 = vmatprep.subr.bf16.mxu1 %v18867_v40  ;;  %v20778_v21 = vpack.c.bf16 %v10659_v22, %v10658_v43  ;;  %v18869_v43 = vld [vmem:[%s21197_s2 + $0x510] sm:$0xff]  }
 0x8eb   : > { %v10632_v11 = vadd.f32 %v17214_v52, %v20657_v41  ;;  %v10485_v15 = vpop.f32.mrb[61].mxu0  ;;  %v11476_v22 = vld [vmem:[#allocation2 + $0x32] sm:$0xff]  ;;  %v11478_v33 = vld [vmem:[#allocation2 + $0x4a] sm:$0xff] }
 0x8ec   : > { %v10630_v39 = vadd.f32 %v20657_v41, %v10485_v15  ;;  %v17215_v46 = vpop.f32.mrb[62].mxu0  ;;  %17253 = vmatmul.mubr.bf16.gmra.mrb[48].mxu1 %v20776_v32  ;;  %v20845_v35 = vpack.c.bf16 %v11477_v59, %v11476_v22  ;;  %v18877_v52 = vld [vmem:[%s21197_s2 + $0x550] sm:$0xff]   ;;  %v11480_v15 = vld [vmem:[#allocation2 + $0x62] sm:$0xff] }
 0x8ed   : > { %v10664_v2 = vmax.f32 %v10632_v11, 0.0  ;;  %v10633_v36 = vadd.f32 %v17215_v46, %v20657_v41  ;;  %v10488_v49 = vpop.f32.mrb[63].mxu0  ;;  %17256 = vmatprep.mubr.bf16.mxu1 %v20781_v38  ;;  %v11479_v11 = vld [vmem:[#allocation2 + $0x52] sm:$0xff] }
 0x8ee   : > { %v10662_v19 = vmax.f32 %v10630_v39, 0.0  ;;  %v10631_v20 = vadd.f32 %v20657_v41, %v10488_v49  ;;  %v10760_v26 = vld [vmem:[#allocation2 + $0x150] sm:$0xff]  ;;  %v11102_v41 = vld [vmem:[#allocation2 + $0x1] sm:$0xff]  ;;  %v20852_v46 = vpack.c.bf16 %v11479_v11, %v11478_v33 }
 0x8ef   : > { %10696 = vst [vmem:[#allocation2 + $0x181] sm:$0xff] %v10664_v2  ;;  %v10665_v1 = vmax.f32 %v10633_v36, 0.0  ;;  %v10758_v50 = vld [vmem:[#allocation2 + $0x138] sm:$0xff]  ;;  %v11134_v13 = vpack.c.bf16 %v11103_v14, %v11102_v41  ;;  %v11481_v39 = vld [vmem:[#allocation2 + $0x6a] sm:$0xff]  ;;  %v18879_v49 = vld [vmem:[%s21197_s2 + $0x560] sm:$0xff]  }
 0x8f0   : > { %10694 = vst [vmem:[#allocation2 + $0x169] sm:$0xff] %v10662_v19  ;;  %v10663_v48 = vmax.f32 %v10631_v20, 0.0  ;;  %v10761_v29 = vld [vmem:[#allocation2 + $0x158] sm:$0xff]  ;;  %v20857_v36 = vpack.c.bf16 %v11481_v39, %v11480_v15  ;;  %v11483_v20 = vld [vmem:[#allocation2 + $0x82] sm:$0xff]  ;;  %v11486_v41 = vld [vmem:[#allocation2 + $0xaa] sm:$0xff] }
 0x8f1   : > { %10697 = vst [vmem:[#allocation2 + $0x189] sm:$0xff] %v10665_v1  ;;  %v10759_v54 = vld [vmem:[#allocation2 + $0x140] sm:$0xff]  ;;  %v20788_v61 = vpack.c.bf16 %v10665_v1, %v10664_v2  ;;  %v20794_v53 = vpack.c.bf16 %v10761_v29, %v10760_v26  ;;  %v18878_v2 = vld [vmem:[%s21197_s2 + $0x558] sm:$0xff]   ;;  %v18881_v26 = vld [vmem:[%s21197_s2 + $0x570] sm:$0xff]  }
 0x8f2   : > { %10695 = vst [vmem:[#allocation2 + $0x171] sm:$0xff] %v10663_v48  ;;  %v20790_v0 = vpack.c.bf16 %v10759_v54, %v10758_v50  ;;  %v20792_v47 = vpack.c.bf16 %v10663_v48, %v10662_v19  ;;  %v11482_v19 = vld [vmem:[#allocation2 + $0x7a] sm:$0xff]  ;;  %v11484_v1 = vld [vmem:[#allocation2 + $0x92] sm:$0xff]  ;;  %v18880_v50 = vld [vmem:[%s21197_s2 + $0x568] sm:$0xff]  }
 0x8f3   : > { %v11485_v48 = vld [vmem:[#allocation2 + $0x9a] sm:$0xff]  ;;  %v20864_v29 = vpack.c.bf16 %v11483_v20, %v11482_v19  ;;  %v11487_v14 = vld [vmem:[#allocation2 + $0xb2] sm:$0xff]  ;;  %v18884_v20 = vld [vmem:[%s21197_s2 + $0x588] sm:$0xff]  }
 0x8f4   : > { %17257 = vmatmul.mubr.bf16.gmra.mrb[52].mxu1 %v20790_v0  ;;  %v20869_v54 = vpack.c.bf16 %v11485_v48, %v11484_v1  ;;  %v11500_v33 = vld [vmem:[#allocation2 + $0x152] sm:$0xff]  ;;  %v11501_v11 = vld [vmem:[#allocation2 + $0x15a] sm:$0xff] }
 0x8f5   : > { %17260 = vmatprep.mubr.bf16.mxu1 %v20794_v53  ;;  %v20902_v39 = vpack.c.bf16 %v11501_v11, %v11500_v33  ;;  %v18885_v1 = vld [vmem:[%s21197_s2 + $0x590] sm:$0xff]  }
 0x8f6   : > { %v12222_v33 = vld [vmem:[#allocation2 + $0x91] sm:$0xff] }
 0x8f7   : > { %v10762_v44 = vld [vmem:[#allocation2 + $0x168] sm:$0xff] }
 0x8f9   : > { %v10763_v31 = vld [vmem:[#allocation2 + $0x170] sm:$0xff] }
 0x8fa   : > { %v20798_v6 = vpack.c.bf16 %v10763_v31, %v10762_v44  ;;  %v11488_v44 = vld [vmem:[#allocation2 + $0xc2] sm:$0xff]  ;;  %v11489_v31 = vld [vmem:[#allocation2 + $0xca] sm:$0xff] }
 0x8fc   : > { %17261 = vmatmul.mubr.bf16.gmra.mrb[56].mxu1 %v20798_v6 }
 0x8fd   : > { %17280 = vmatprep.mubr.bf16.mxu1 %v11134_v13  ;;  %v20876_v13 = vpack.c.bf16 %v11487_v14, %v11486_v41  ;;  %v11872_v41 = vld [vmem:[#allocation2 + $0x180] sm:$0xff] }
 0x904   : > { %17281 = vmatmul.mubr.bf16.vlgmr.msra.gmra.mrb[60].mxu1 %v20665_v34  ;;  %v18872_v34 = vld [vmem:[%s21197_s2 + $0x528] sm:$0xff]  }
 0x905   : > { %17313 = vmatpush3.bf16.msra.mxu1 %v18867_v40  ;;  %17284 = vmatprep.mubr.bf16.mxu1 %v20663_v30  ;;  %v18871_v30 = vld [vmem:[%s21197_s2 + $0x520] sm:$0xff]  }
 0x906   : > { %17314 = vmatprep.subr.bf16.mxu1 %v18868_v56  ;;  %v11474_v40 = vld [vmem:[#allocation2 + $0x1a] sm:$0xff] }
 0x907   : > { %v20840_v8 = vpack.c.bf16 %v11475_v10, %v11474_v40  ;;  %v11496_v40 = vld [vmem:[#allocation2 + $0x122] sm:$0xff]  ;;  %v11497_v10 = vld [vmem:[#allocation2 + $0x12a] sm:$0xff] }
 0x908   : > { %v20896_v59 = vpack.c.bf16 %v11497_v10, %v11496_v40  ;;  %v18895_v10 = vld [vmem:[%s21197_s2 + $0x5e0] sm:$0xff]  }
 0x909   : > { %17315 = vmatpush3.bf16.msra.mxu1 %v18868_v56  ;;  %v18882_v56 = vld [vmem:[%s21197_s2 + $0x578] sm:$0xff]  }
 0x90a   : > { %17316 = vmatprep.subr.bf16.mxu1 %v18869_v43 }
 0x90c   : > { %17285 = vmatmul.mubr.bf16.gmra.mrb[32].mxu1 %v20677_v51  ;;  %v18874_v51 = vld [vmem:[%s21197_s2 + $0x538] sm:$0xff]  }
 0x90d   : > { %17288 = vmatprep.mubr.bf16.mxu1 %v20673_v7  ;;  %17317 = vmatpush3.bf16.msra.mxu1 %v18869_v43  ;;  %v18873_v7 = vld [vmem:[%s21197_s2 + $0x530] sm:$0xff]   ;;  %v20881_v43 = vpack.c.bf16 %v11489_v31, %v11488_v44  ;;  %v12212_v44 = vld [vmem:[#allocation2 + $0x19] sm:$0xff] }
 0x90e   : > { %17318 = vmatprep.subr.bf16.mxu1 %v18870_v5 }
 0x911   : > { %17319 = vmatpush3.bf16.msra.mxu1 %v18870_v5  ;;  %v18883_v5 = vld [vmem:[%s21197_s2 + $0x580] sm:$0xff]  }
 0x912   : > { %17320 = vmatprep.subr.bf16.mxu1 %v18871_v30 }
 0x914   : > { %17289 = vmatmul.mubr.bf16.gmra.mrb[36].mxu1 %v20692_v16  ;;  %v11472_v16 = vld [vmem:[#allocation2 + $0x2] sm:$0xff] }
 0x915   : > { %17292 = vmatprep.mubr.bf16.mxu1 %v20685_v57  ;;  %17321 = vmatpush3.bf16.msra.mxu1 %v18871_v30  ;;  %v18875_v57 = vld [vmem:[%s21197_s2 + $0x540] sm:$0xff]  }
 0x916   : > { %17322 = vmatprep.subr.bf16.mxu1 %v18872_v34  ;;  %v11490_v30 = vld [vmem:[#allocation2 + $0xda] sm:$0xff] }
 0x919   : > { %17323 = vmatpush3.bf16.msra.mxu1 %v18872_v34  ;;  %v11491_v34 = vld [vmem:[#allocation2 + $0xe2] sm:$0xff] }
 0x91a   : > { %17324 = vmatprep.subr.bf16.mxu1 %v18873_v7 }
 0x91c   : > { %17293 = vmatmul.mubr.bf16.gmra.mrb[40].mxu1 %v20717_v37 }
 0x91d   : > { %17296 = vmatprep.mubr.bf16.mxu1 %v20708_v3  ;;  %17325 = vmatpush3.bf16.msra.mxu1 %v18873_v7  ;;  %v11473_v3 = vld [vmem:[#allocation2 + $0xa] sm:$0xff]  ;;  %v11492_v7 = vld [vmem:[#allocation2 + $0xf2] sm:$0xff] }
 0x91e   : > { %17326 = vmatprep.subr.bf16.mxu1 %v18874_v51  ;;  %v11504_v37 = vpack.c.bf16 %v11473_v3, %v11472_v16  ;;  %v11494_v3 = vld [vmem:[#allocation2 + $0x10a] sm:$0xff] }
 0x921   : > { %17327 = vmatpush3.bf16.msra.mxu1 %v18874_v51  ;;  %v11493_v51 = vld [vmem:[#allocation2 + $0xfa] sm:$0xff] }
 0x922   : > { %17360 = vmatprep.subr.bf16.mxu1 %v18875_v57  ;;  %v20890_v16 = vpack.c.bf16 %v11493_v51, %v11492_v7  ;;  %v12218_v7 = vld [vmem:[#allocation2 + $0x61] sm:$0xff] }
 0x924   : > { %17297 = vmatmul.mubr.bf16.gmra.mrb[44].mxu1 %v20741_v24 }
 0x925   : > { %17300 = vmatprep.mubr.bf16.mxu1 %v20734_v23  ;;  %v18876_v23 = vld [vmem:[%s21197_s2 + $0x548] sm:$0xff]  }
 0x92c   : > { %17301 = vmatmul.mubr.bf16.gmra.mrb[48].mxu1 %v20761_v62 }
 0x92d   : > { %17304 = vmatprep.mubr.bf16.mxu1 %v20754_v17 }
 0x934   : > { %17305 = vmatmul.mubr.bf16.gmra.mrb[52].mxu1 %v20778_v21 }
 0x935   : > { %17308 = vmatprep.mubr.bf16.mxu1 %v20774_v12 }
 0x93c   : > { %17309 = vmatmul.mubr.bf16.gmra.mrb[56].mxu1 %v20792_v47 }
 0x93d   : > { %17328 = vmatprep.mubr.bf16.mxu1 %v11504_v37  ;;  %v11495_v37 = vld [vmem:[#allocation2 + $0x112] sm:$0xff] }
 0x93e   : > { %v20894_v22 = vpack.c.bf16 %v11495_v37, %v11494_v3  ;;  %v12220_v3 = vld [vmem:[#allocation2 + $0x79] sm:$0xff] }
 0x93f   : > { %v18894_v37 = vld [vmem:[%s21197_s2 + $0x5d8] sm:$0xff]  }
 0x944   : > { %17329 = vmatmul.mubr.bf16.vlgmr.msra.gmra.mrb[60].mxu1 %v20840_v8 }
 0x945   : > { %17361 = vmatpush3.bf16.msra.mxu1 %v18875_v57  ;;  %17332 = vmatprep.mubr.bf16.mxu1 %v20845_v35  ;;  %v20888_v57 = vpack.c.bf16 %v11491_v34, %v11490_v30  ;;  %v12219_v30 = vld [vmem:[#allocation2 + $0x69] sm:$0xff]  ;;  %v12221_v34 = vld [vmem:[#allocation2 + $0x81] sm:$0xff] }
 0x946   : > { %17362 = vmatprep.subr.bf16.mxu1 %v18876_v23  ;;  %v20971_v51 = vpack.c.bf16 %v12219_v30, %v12218_v7  ;;  %v20976_v40 = vpack.c.bf16 %v12221_v34, %v12220_v3  ;;  %v18912_v30 = vld [vmem:[%s21197_s2 + $0x668] sm:$0xff]   ;;  %v18913_v7 = vld [vmem:[%s21197_s2 + $0x670] sm:$0xff]   ;;  %v12967_v3 = vld [vmem:[#allocation2 + $0xe0] sm:$0xff] }
 0x949   : > { %17363 = vmatpush3.bf16.msra.mxu1 %v18876_v23  ;;  %v11498_v23 = vld [vmem:[#allocation2 + $0x13a] sm:$0xff] }
 0x94a   : > { %17364 = vmatprep.subr.bf16.mxu1 %v18877_v52 }
 0x94c   : > { %17333 = vmatmul.mubr.bf16.gmra.mrb[32].mxu1 %v20852_v46 }
 0x94d   : > { %17336 = vmatprep.mubr.bf16.mxu1 %v20857_v36  ;;  %17365 = vmatpush3.bf16.msra.mxu1 %v18877_v52  ;;  %v11499_v52 = vld [vmem:[#allocation2 + $0x142] sm:$0xff] }
 0x94e   : > { %17366 = vmatprep.subr.bf16.mxu1 %v18878_v2  ;;  %v20900_v15 = vpack.c.bf16 %v11499_v52, %v11498_v23  ;;  %v12223_v23 = vld [vmem:[#allocation2 + $0x99] sm:$0xff]  ;;  %v20983_v52 = vld [vmem:[#allocation2 + $0xa9] sm:$0xff] }
 0x94f   : > { %v20985_v11 = vpack.c.bf16 %v12223_v23, %v12222_v33  ;;  %v12968_v33 = vld [vmem:[#allocation2 + $0xf0] sm:$0xff] }
 0x951   : > { %17367 = vmatpush3.bf16.msra.mxu1 %v18878_v2  ;;  %v11502_v2 = vld [vmem:[#allocation2 + $0x16a] sm:$0xff] }
 0x952   : > { %17368 = vmatprep.subr.bf16.mxu1 %v18879_v49 }
 0x954   : > { %17337 = vmatmul.mubr.bf16.gmra.mrb[36].mxu1 %v20864_v29 }
 0x955   : > { %17340 = vmatprep.mubr.bf16.mxu1 %v20869_v54  ;;  %17369 = vmatpush3.bf16.msra.mxu1 %v18879_v49  ;;  %v11503_v49 = vld [vmem:[#allocation2 + $0x172] sm:$0xff] }
 0x956   : > { %17370 = vmatprep.subr.bf16.mxu1 %v18880_v50  ;;  %v20906_v19 = vpack.c.bf16 %v11503_v49, %v11502_v2  ;;  %v18896_v2 = vld [vmem:[%s21197_s2 + $0x5e8] sm:$0xff]   ;;  %v12250_v49 = vpack.c.bf16 %v20706_v42, %v20983_v52  ;;  %v18899_v42 = vld [vmem:[%s21197_s2 + $0x600] sm:$0xff]  }
 0x959   : > { %17371 = vmatpush3.bf16.msra.mxu1 %v18880_v50 }
 0x95a   : > { %17372 = vmatprep.subr.bf16.mxu1 %v18881_v26 }
 0x95c   : > { %17341 = vmatmul.mubr.bf16.gmra.mrb[40].mxu1 %v20876_v13 }
 0x95d   : > { %17344 = vmatprep.mubr.bf16.mxu1 %v20881_v43  ;;  %17373 = vmatpush3.bf16.msra.mxu1 %v18881_v26 }
 0x95e   : > { %17374 = vmatprep.subr.bf16.mxu1 %v18882_v56 }
 0x961   : > { %17375 = vmatpush3.bf16.msra.mxu1 %v18882_v56  ;;  %v12214_v56 = vld [vmem:[#allocation2 + $0x31] sm:$0xff] }
 0x962   : > { %17408 = vmatprep.subr.bf16.mxu1 %v18883_v5 }
 0x964   : > { %17345 = vmatmul.mubr.bf16.gmra.mrb[44].mxu1 %v20888_v57 }
 0x965   : > { %17348 = vmatprep.mubr.bf16.mxu1 %v20890_v16 }
 0x96c   : > { %17349 = vmatmul.mubr.bf16.gmra.mrb[48].mxu1 %v20894_v22 }
 0x96d   : > { %17352 = vmatprep.mubr.bf16.mxu1 %v20896_v59 }
 0x974   : > { %17353 = vmatmul.mubr.bf16.gmra.mrb[52].mxu1 %v20900_v15 }
 0x975   : > { %17356 = vmatprep.mubr.bf16.mxu1 %v20902_v39 }
 0x97c   : > { %17357 = vmatmul.mubr.bf16.gmra.mrb[56].mxu1 %v20906_v19 }
 0x97d   : > { %17376 = vmatprep.mubr.bf16.mxu1 %v20675_v18  ;;  %v18886_v18 = vld [vmem:[%s21197_s2 + $0x598] sm:$0xff]  }
 0x984   : > { %17377 = vmatmul.mubr.bf16.vlgmr.msra.gmra.mrb[60].mxu1 %v20671_v58  ;;  %v18887_v58 = vld [vmem:[%s21197_s2 + $0x5a0] sm:$0xff]  }
 0x985   : > { %17409 = vmatpush3.bf16.msra.mxu1 %v18883_v5  ;;  %17380 = vmatprep.mubr.bf16.mxu1 %v20687_v4  ;;  %v18888_v4 = vld [vmem:[%s21197_s2 + $0x5a8] sm:$0xff]   ;;  %v18893_v5 = vld [vmem:[%s21197_s2 + $0x5d0] sm:$0xff]  }
 0x986   : > { %17410 = vmatprep.subr.bf16.mxu1 %v18884_v20 }
 0x989   : > { %17411 = vmatpush3.bf16.msra.mxu1 %v18884_v20  ;;  %v18897_v20 = vld [vmem:[%s21197_s2 + $0x5f0] sm:$0xff]  }
 0x98a   : > { %17412 = vmatprep.subr.bf16.mxu1 %v18885_v1 }
 0x98c   : > { %17381 = vmatmul.mubr.bf16.gmra.mrb[32].mxu1 %v20695_v25  ;;  %v18889_v25 = vld [vmem:[%s21197_s2 + $0x5b0] sm:$0xff]  }
 0x98d   : > { %17384 = vmatprep.mubr.bf16.mxu1 %v20711_v63  ;;  %17413 = vmatpush3.bf16.msra.mxu1 %v18885_v1  ;;  %v12227_v1 = vld [vmem:[#allocation2 + $0xc9] sm:$0xff] }
 0x98e   : > { %17414 = vmatprep.subr.bf16.mxu1 %v18886_v18 }
 0x991   : > { %17415 = vmatpush3.bf16.msra.mxu1 %v18886_v18  ;;  %v12226_v18 = vld [vmem:[#allocation2 + $0xc1] sm:$0xff] }
 0x992   : > { %17416 = vmatprep.subr.bf16.mxu1 %v18887_v58 }
 0x994   : > { %17385 = vmatmul.mubr.bf16.gmra.mrb[36].mxu1 %v20720_v55  ;;  %v18890_v55 = vld [vmem:[%s21197_s2 + $0x5b8] sm:$0xff]  }
 0x995   : > { %17388 = vmatprep.mubr.bf16.mxu1 %v20736_v60  ;;  %17417 = vmatpush3.bf16.msra.mxu1 %v18887_v58  ;;  %v18891_v60 = vld [vmem:[%s21197_s2 + $0x5c0] sm:$0xff]   ;;  %v20996_v58 = vpack.c.bf16 %v12227_v1, %v12226_v18  ;;  %v12971_v1 = vld [vmem:[#allocation2 + $0x110] sm:$0xff]  ;;  %v12973_v18 = vld [vmem:[#allocation2 + $0x128] sm:$0xff] }
 0x996   : > { %17418 = vmatprep.subr.bf16.mxu1 %v18888_v4 }
 0x997   : > { %v20934_v63 = vpop.f32.mrb[64].mxu0 }
 0x998   : > { %v20936_v48 = vpop.f32.mrb[65].mxu0 }
 0x999   : > { %v20938_v50 = vpop.f32.mrb[66].mxu0  ;;  %17419 = vmatpush3.bf16.msra.mxu1 %v18888_v4  ;;  %v18898_v4 = vld [vmem:[%s21197_s2 + $0x5f8] sm:$0xff]  }
 0x99a   : > { %v20940_v26 = vpop.f32.mrb[67].mxu0  ;;  %17420 = vmatprep.subr.bf16.mxu1 %v18889_v25 }
 0x99c   : > { %17389 = vmatmul.mubr.bf16.gmra.mrb[40].mxu1 %v20744_v9  ;;  %v11873_v9 = vld [vmem:[#allocation2 + $0x188] sm:$0xff] }
 0x99d   : > { %17392 = vmatprep.mubr.bf16.mxu1 %v20756_v45  ;;  %17421 = vmatpush3.bf16.msra.mxu1 %v18889_v25  ;;  %v12213_v45 = vld [vmem:[#allocation2 + $0x21] sm:$0xff]  ;;  %v20956_v14 = vpack.c.bf16 %v11873_v9, %v11872_v41  ;;  %v21006_v25 = vld [vmem:[#allocation2 + $0xf1] sm:$0xff] }
 0x99e   : > { %17422 = vmatprep.subr.bf16.mxu1 %v18890_v55  ;;  %v12244_v31 = vpack.c.bf16 %v12213_v45, %v12212_v44  ;;  %v12958_v9 = vld [vmem:[#allocation2 + $0x78] sm:$0xff]  ;;  %v12960_v41 = vld [vmem:[#allocation2 + $0x90] sm:$0xff] }
 0x99f   : > { %v18910_v44 = vld [vmem:[%s21197_s2 + $0x658] sm:$0xff]  }
 0x9a1   : > { %17423 = vmatpush3.bf16.msra.mxu1 %v18890_v55  ;;  %v12253_v55 = vpack.c.bf16 %v20730_v28, %v21006_v25  ;;  %v18900_v28 = vld [vmem:[%s21197_s2 + $0x608] sm:$0xff]  }
 0x9a2   : > { %17456 = vmatprep.subr.bf16.mxu1 %v18891_v60 }
 0x9a4   : > { %17393 = vmatmul.mubr.bf16.gmra.mrb[44].mxu1 %v20764_v27  ;;  %v12215_v27 = vld [vmem:[#allocation2 + $0x39] sm:$0xff] }
 0x9a5   : > { %17396 = vmatprep.mubr.bf16.mxu1 %v20776_v32  ;;  %v12217_v32 = vld [vmem:[#allocation2 + $0x51] sm:$0xff] }
 0x9ac   : > { %17397 = vmatmul.mubr.bf16.gmra.mrb[48].mxu1 %v20781_v38  ;;  %v20959_v38 = vpack.c.bf16 %v12215_v27, %v12214_v56  ;;  %v18911_v27 = vld [vmem:[%s21197_s2 + $0x660] sm:$0xff]   ;;  %v12965_v56 = vld [vmem:[#allocation2 + $0xc8] sm:$0xff] }
 0x9ad   : > { %17400 = vmatprep.mubr.bf16.mxu1 %v20790_v0  ;;  %v12216_v0 = vld [vmem:[#allocation2 + $0x49] sm:$0xff] }
 0x9b4   : > { %17401 = vmatmul.mubr.bf16.gmra.mrb[52].mxu1 %v20794_v53  ;;  %v18892_v53 = vld [vmem:[%s21197_s2 + $0x5c8] sm:$0xff]  }
 0x9b5   : > { %17404 = vmatprep.mubr.bf16.mxu1 %v20798_v6  ;;  %v20964_v6 = vpack.c.bf16 %v12217_v32, %v12216_v0  ;;  %v12963_v32 = vld [vmem:[#allocation2 + $0xb0] sm:$0xff]  ;;  %v12962_v0 = vld [vmem:[#allocation2 + $0xa8] sm:$0xff] }
 0x9bc   : > { %17405 = vmatmul.mubr.bf16.gmra.mrb[56].mxu1 %v20956_v14 }
 0x9bd   : > { %17424 = vmatprep.mubr.bf16.mxu1 %v12244_v31 }
 0x9c4   : > { %17425 = vmatmul.mubr.bf16.vlgmr.msra.gmra.mrb[60].mxu1 %v20959_v38 }
 0x9c5   : > { %17457 = vmatpush3.bf16.msra.mxu1 %v18891_v60  ;;  %17428 = vmatprep.mubr.bf16.mxu1 %v20964_v6  ;;  %v12961_v60 = vld [vmem:[#allocation2 + $0x98] sm:$0xff] }
 0x9c6   : > { %17458 = vmatprep.subr.bf16.mxu1 %v18892_v53  ;;  %v12988_v31 = vpack.c.bf16 %v12961_v60, %v12960_v41  ;;  %v13342_v60 = vld [vmem:[#allocation2 + $0x121] sm:$0xff]  ;;  %v13347_v41 = vld [vmem:[#allocation2 + $0x159] sm:$0xff] }
 0x9c9   : > { %17459 = vmatpush3.bf16.msra.mxu1 %v18892_v53  ;;  %v12989_v53 = vpack.c.bf16 %v12963_v32, %v12962_v0  ;;  %v13348_v0 = vld [vmem:[#allocation2 + $0x169] sm:$0xff] }
 0x9ca   : > { %17460 = vmatprep.subr.bf16.mxu1 %v18893_v5 }
 0x9cc   : > { %17429 = vmatmul.mubr.bf16.gmra.mrb[32].mxu1 %v20971_v51 }
 0x9cd   : > { %17432 = vmatprep.mubr.bf16.mxu1 %v20976_v40  ;;  %17461 = vmatpush3.bf16.msra.mxu1 %v18893_v5  ;;  %v12964_v5 = vld [vmem:[#allocation2 + $0xc0] sm:$0xff] }
 0x9ce   : > { %17462 = vmatprep.subr.bf16.mxu1 %v18894_v37  ;;  %v12990_v34 = vpack.c.bf16 %v12965_v56, %v12964_v5  ;;  %v13351_v56 = vld [vmem:[#allocation2 + $0x189] sm:$0xff]  ;;  %v13350_v5 = vld [vmem:[#allocation2 + $0x181] sm:$0xff] }
 0x9d1   : > { %17463 = vmatpush3.bf16.msra.mxu1 %v18894_v37  ;;  %v12969_v37 = vld [vmem:[#allocation2 + $0xf8] sm:$0xff] }
 0x9d2   : > { %17464 = vmatprep.subr.bf16.mxu1 %v18895_v10 }
 0x9d4   : > { %17433 = vmatmul.mubr.bf16.gmra.mrb[36].mxu1 %v20985_v11 }
 0x9d5   : > { %17436 = vmatprep.mubr.bf16.mxu1 %v12250_v49  ;;  %17465 = vmatpush3.bf16.msra.mxu1 %v18895_v10  ;;  %v12966_v10 = vld [vmem:[#allocation2 + $0xd8] sm:$0xff]  ;;  %v12992_v49 = vpack.c.bf16 %v12969_v37, %v12968_v33  ;;  %v13694_v33 = vld [vmem:[#allocation2 + $0x4a] sm:$0xff] }
 0x9d6   : > { %17466 = vmatprep.subr.bf16.mxu1 %v18896_v2  ;;  %v12991_v23 = vpack.c.bf16 %v12967_v3, %v12966_v10  ;;  %v13692_v37 = vld [vmem:[#allocation2 + $0x32] sm:$0xff]  ;;  %v13693_v10 = vld [vmem:[#allocation2 + $0x3a] sm:$0xff] }
 0x9d9   : > { %17467 = vmatpush3.bf16.msra.mxu1 %v18896_v2  ;;  %v18914_v2 = vld [vmem:[%s21197_s2 + $0x678] sm:$0xff]  }
 0x9da   : > { %17468 = vmatprep.subr.bf16.mxu1 %v18897_v20 }
 0x9dc   : > { %17437 = vmatmul.mubr.bf16.gmra.mrb[40].mxu1 %v20996_v58 }
 0x9dd   : > { %17440 = vmatprep.mubr.bf16.mxu1 %v20741_v24  ;;  %17469 = vmatpush3.bf16.msra.mxu1 %v18897_v20  ;;  %v18901_v24 = vld [vmem:[%s21197_s2 + $0x610] sm:$0xff]   ;;  %v18915_v20 = vld [vmem:[%s21197_s2 + $0x680] sm:$0xff]  }
 0x9de   : > { %17470 = vmatprep.subr.bf16.mxu1 %v18898_v4 }
 0x9e1   : > { %17471 = vmatpush3.bf16.msra.mxu1 %v18898_v4  ;;  %v12970_v4 = vld [vmem:[#allocation2 + $0x108] sm:$0xff] }
 0x9e2   : > { %17504 = vmatprep.subr.bf16.mxu1 %v18899_v42 }
 0x9e4   : > { %17441 = vmatmul.mubr.bf16.gmra.mrb[44].mxu1 %v12253_v55  ;;  %v12972_v55 = vld [vmem:[#allocation2 + $0x120] sm:$0xff] }
 0x9e5   : > { %17444 = vmatprep.mubr.bf16.mxu1 %v20761_v62  ;;  %v18903_v62 = vld [vmem:[%s21197_s2 + $0x620] sm:$0xff]  }
 0x9ec   : > { %17445 = vmatmul.mubr.bf16.gmra.mrb[48].mxu1 %v20754_v17  ;;  %v18902_v17 = vld [vmem:[%s21197_s2 + $0x618] sm:$0xff]  }
 0x9ed   : > { %17448 = vmatprep.mubr.bf16.mxu1 %v20778_v21  ;;  %v18905_v21 = vld [vmem:[%s21197_s2 + $0x630] sm:$0xff]  }
 0x9f4   : > { %17449 = vmatmul.mubr.bf16.gmra.mrb[52].mxu1 %v20774_v12  ;;  %v18904_v12 = vld [vmem:[%s21197_s2 + $0x628] sm:$0xff]  }
 0x9f5   : > { %17452 = vmatprep.mubr.bf16.mxu1 %v20792_v47  ;;  %v18907_v47 = vld [vmem:[%s21197_s2 + $0x640] sm:$0xff]  }
 0x9fc   : > { %17453 = vmatmul.mubr.bf16.gmra.mrb[56].mxu1 %v20788_v61  ;;  %v18906_v61 = vld [vmem:[%s21197_s2 + $0x638] sm:$0xff]  }
 0x9fd   : > { %17472 = vmatprep.mubr.bf16.mxu1 %v20840_v8  ;;  %v12612_v8 = vld [vmem:[#allocation2 + $0x182] sm:$0xff] }
 0xa04   : > { %17473 = vmatmul.mubr.bf16.vlgmr.msra.gmra.mrb[60].mxu1 %v20845_v35  ;;  %v12613_v35 = vld [vmem:[#allocation2 + $0x18a] sm:$0xff] }
 0xa05   : > { %17505 = vmatpush3.bf16.msra.mxu1 %v18899_v42  ;;  %17476 = vmatprep.mubr.bf16.mxu1 %v20852_v46  ;;  %v12953_v46 = vld [vmem:[#allocation2 + $0x38] sm:$0xff]  ;;  %v12993_v42 = vpack.c.bf16 %v12971_v1, %v12970_v4 }
 0xa06   : > { %17506 = vmatprep.subr.bf16.mxu1 %v18900_v28  ;;  %v13698_v4 = vld [vmem:[#allocation2 + $0x7a] sm:$0xff] }
 0xa09   : > { %17507 = vmatpush3.bf16.msra.mxu1 %v18900_v28  ;;  %v12994_v28 = vpack.c.bf16 %v12973_v18, %v12972_v55  ;;  %v13700_v55 = vld [vmem:[#allocation2 + $0x92] sm:$0xff] }
 0xa0a   : > { %17508 = vmatprep.subr.bf16.mxu1 %v18901_v24 }
 0xa0c   : > { %17477 = vmatmul.mubr.bf16.gmra.mrb[32].mxu1 %v20857_v36  ;;  %v21055_v36 = vpack.c.bf16 %v12613_v35, %v12612_v8  ;;  %v12978_v8 = vld [vmem:[#allocation2 + $0x168] sm:$0xff] }
 0xa0d   : > { %17480 = vmatprep.mubr.bf16.mxu1 %v20864_v29  ;;  %17509 = vmatpush3.bf16.msra.mxu1 %v18901_v24  ;;  %v12952_v29 = vld [vmem:[#allocation2 + $0x30] sm:$0xff]  ;;  %v12975_v24 = vld [vmem:[#allocation2 + $0x140] sm:$0xff] }
 0xa0e   : > { %17510 = vmatprep.subr.bf16.mxu1 %v18902_v17 }
 0xa11   : > { %17511 = vmatpush3.bf16.msra.mxu1 %v18902_v17  ;;  %v12977_v17 = vld [vmem:[#allocation2 + $0x158] sm:$0xff] }
 0xa12   : > { %17512 = vmatprep.subr.bf16.mxu1 %v18903_v62 }
 0xa14   : > { %17481 = vmatmul.mubr.bf16.gmra.mrb[36].mxu1 %v20869_v54  ;;  %v12984_v54 = vpack.c.bf16 %v12953_v46, %v12952_v29  ;;  %v18925_v46 = vld [vmem:[#allocation2] sm:$0xff] }
 0xa15   : > { %17484 = vmatprep.mubr.bf16.mxu1 %v20876_v13  ;;  %17513 = vmatpush3.bf16.msra.mxu1 %v18903_v62  ;;  %v12955_v13 = vld [vmem:[#allocation2 + $0x50] sm:$0xff]  ;;  %v12974_v62 = vld [vmem:[#allocation2 + $0x138] sm:$0xff]  ;;  %v12999_v29 = vpack.c.bf16 %v18925_v46, %v18925_v46  ;;  %v13707_v46 = vld [vmem:[#allocation2 + $0xe2] sm:$0xff] }
 0xa16   : > { %17514 = vmatprep.subr.bf16.mxu1 %v18904_v12 }
 0xa19   : > { %17515 = vmatpush3.bf16.msra.mxu1 %v18904_v12  ;;  %v12995_v12 = vpack.c.bf16 %v12975_v24, %v12974_v62  ;;  %v13702_v62 = vld [vmem:[#allocation2 + $0xaa] sm:$0xff] }
 0xa1a   : > { %17516 = vmatprep.subr.bf16.mxu1 %v18905_v21 }
 0xa1c   : > { %17485 = vmatmul.mubr.bf16.gmra.mrb[40].mxu1 %v20881_v43  ;;  %v12957_v43 = vld [vmem:[#allocation2 + $0x68] sm:$0xff] }
 0xa1d   : > { %17488 = vmatprep.mubr.bf16.mxu1 %v20888_v57  ;;  %17517 = vmatpush3.bf16.msra.mxu1 %v18905_v21  ;;  %v12954_v57 = vld [vmem:[#allocation2 + $0x48] sm:$0xff]  ;;  %v12976_v21 = vld [vmem:[#allocation2 + $0x150] sm:$0xff] }
 0xa1e   : > { %17518 = vmatprep.subr.bf16.mxu1 %v18906_v61 }
 0xa21   : > { %17519 = vmatpush3.bf16.msra.mxu1 %v18906_v61  ;;  %v12996_v61 = vpack.c.bf16 %v12977_v17, %v12976_v21  ;;  %v13704_v21 = vld [vmem:[#allocation2 + $0xc2] sm:$0xff] }
 0xa22   : > { %17552 = vmatprep.subr.bf16.mxu1 %v18907_v47 }
 0xa24   : > { %17489 = vmatmul.mubr.bf16.gmra.mrb[44].mxu1 %v20890_v16  ;;  %v12985_v16 = vpack.c.bf16 %v12955_v13, %v12954_v57  ;;  %v18917_v13 = vld [vmem:[%s21197_s2 + $0x690] sm:$0xff]   ;;  %v13339_v57 = vld [vmem:[#allocation2 + $0xf9] sm:$0xff] }
 0xa25   : > { %17492 = vmatprep.mubr.bf16.mxu1 %v20894_v22  ;;  %v12956_v22 = vld [vmem:[#allocation2 + $0x60] sm:$0xff] }
 0xa2c   : > { %17493 = vmatmul.mubr.bf16.gmra.mrb[48].mxu1 %v20896_v59  ;;  %v18908_v59 = vld [vmem:[%s21197_s2 + $0x648] sm:$0xff]  }
 0xa2d   : > { %17496 = vmatprep.mubr.bf16.mxu1 %v20900_v15  ;;  %v12986_v15 = vpack.c.bf16 %v12957_v43, %v12956_v22  ;;  %v18920_v43 = vld [vmem:[%s21197_s2 + $0x6a8] sm:$0xff]  }
 0xa34   : > { %17497 = vmatmul.mubr.bf16.gmra.mrb[52].mxu1 %v20902_v39  ;;  %v18909_v39 = vld [vmem:[%s21197_s2 + $0x650] sm:$0xff]  }
 0xa35   : > { %17500 = vmatprep.mubr.bf16.mxu1 %v20906_v19  ;;  %v12959_v19 = vld [vmem:[#allocation2 + $0x80] sm:$0xff] }
 0xa36   : > { %v12987_v45 = vpack.c.bf16 %v12959_v19, %v12958_v9 }
 0xa3c   : > { %17501 = vmatmul.mubr.bf16.gmra.mrb[56].mxu1 %v21055_v36 }
 0xa3d   : > { %17520 = vmatprep.mubr.bf16.mxu1 %v12984_v54  ;;  %v18916_v54 = vld [vmem:[%s21197_s2 + $0x688] sm:$0xff]  }
 0xa44   : > { %17521 = vmatmul.mubr.bf16.vlgmr.msra.gmra.mrb[60].mxu1 %v12985_v16  ;;  %v13336_v16 = vld [vmem:[#allocation2 + $0xd9] sm:$0xff] }
 0xa45   : > { %17553 = vmatpush3.bf16.msra.mxu1 %v18907_v47  ;;  %17524 = vmatprep.mubr.bf16.mxu1 %v12986_v15  ;;  %v12979_v47 = vld [vmem:[#allocation2 + $0x170] sm:$0xff] }
 0xa46   : > { %17554 = vmatprep.subr.bf16.mxu1 %v18908_v59  ;;  %v12997_v35 = vpack.c.bf16 %v12979_v47, %v12978_v8  ;;  %v13343_v15 = vld [vmem:[#allocation2 + $0x129] sm:$0xff] }
 0xa47   : > { %v13364_v9 = vpack.c.bf16 %v13343_v15, %v13342_v60  ;;  %v13718_v15 = vld [vmem:[#allocation2 + $0x16a] sm:$0xff]  ;;  %v13722_v60 = vld [vmem:[#allocation2 + $0x19a] sm:$0xff] }
 0xa49   : > { %17555 = vmatpush3.bf16.msra.mxu1 %v18908_v59  ;;  %v13362_v59 = vpack.c.bf16 %v13339_v57, %v21006_v25  ;;  %v13349_v25 = vld [vmem:[#allocation2 + $0x171] sm:$0xff]  ;;  %v13714_v57 = vld [vmem:[#allocation2 + $0x13a] sm:$0xff] }
 0xa4a   : > { %17556 = vmatprep.subr.bf16.mxu1 %v18909_v39 }
 0xa4c   : > { %17525 = vmatmul.mubr.bf16.gmra.mrb[32].mxu1 %v12987_v45  ;;  %v13345_v45 = vld [vmem:[#allocation2 + $0x141] sm:$0xff] }
 0xa4d   : > { %17528 = vmatprep.mubr.bf16.mxu1 %v12988_v31  ;;  %17557 = vmatpush3.bf16.msra.mxu1 %v18909_v39  ;;  %v13340_v39 = vld [vmem:[#allocation2 + $0x109] sm:$0xff] }
 0xa4e   : > { %17558 = vmatprep.subr.bf16.mxu1 %v18910_v44 }
 0xa51   : > { %17559 = vmatpush3.bf16.msra.mxu1 %v18910_v44  ;;  %v13344_v44 = vld [vmem:[#allocation2 + $0x139] sm:$0xff] }
 0xa52   : > { %17560 = vmatprep.subr.bf16.mxu1 %v18911_v27  ;;  %v13365_v31 = vpack.c.bf16 %v13345_v45, %v13344_v44 }
 0xa54   : > { %17529 = vmatmul.mubr.bf16.gmra.mrb[36].mxu1 %v12989_v53  ;;  %v13367_v53 = vpack.c.bf16 %v13349_v25, %v13348_v0 }
 0xa55   : > { %17532 = vmatprep.mubr.bf16.mxu1 %v12990_v34  ;;  %17561 = vmatpush3.bf16.msra.mxu1 %v18911_v27  ;;  %v13346_v27 = vld [vmem:[#allocation2 + $0x151] sm:$0xff]  ;;  %v13352_v34 = vld [vmem:[#allocation2 + $0x199] sm:$0xff] }
 0xa56   : > { %17562 = vmatprep.subr.bf16.mxu1 %v18912_v30  ;;  %v13366_v32 = vpack.c.bf16 %v13347_v41, %v13346_v27  ;;  %v21116_v41 = vld [vmem:[%s21198_s3 + $0x3] ss:$0 sm:$0xff] }
 0xa59   : > { %17563 = vmatpush3.bf16.msra.mxu1 %v18912_v30  ;;  %v13368_v30 = vpack.c.bf16 %v13351_v56, %v13350_v5 }
 0xa5a   : > { %17564 = vmatprep.subr.bf16.mxu1 %v18913_v7 }
 0xa5c   : > { %17533 = vmatmul.mubr.bf16.gmra.mrb[40].mxu1 %v12991_v23  ;;  %v13724_v23 = vpack.c.bf16 %v13693_v10, %v13692_v37 }
 0xa5d   : > { %17536 = vmatprep.mubr.bf16.mxu1 %v12992_v49  ;;  %17565 = vmatpush3.bf16.msra.mxu1 %v18913_v7  ;;  %v13353_v7 = vld [vmem:[#allocation2 + $0x1a1] sm:$0xff] }
 0xa5e   : > { %17566 = vmatprep.subr.bf16.mxu1 %v18914_v2  ;;  %v13369_v3 = vpack.c.bf16 %v13353_v7, %v13352_v34  ;;  %v13696_v49 = vld [vmem:[#allocation2 + $0x62] sm:$0xff] }
 0xa61   : > { %17567 = vmatpush3.bf16.msra.mxu1 %v18914_v2  ;;  %v13695_v2 = vld [vmem:[#allocation2 + $0x52] sm:$0xff] }
 0xa62   : > { %17600 = vmatprep.subr.bf16.mxu1 %v18915_v20  ;;  %v13725_v1 = vpack.c.bf16 %v13695_v2, %v13694_v33 }
 0xa64   : > { %17537 = vmatmul.mubr.bf16.gmra.mrb[44].mxu1 %v12993_v42  ;;  %v13699_v42 = vld [vmem:[#allocation2 + $0x82] sm:$0xff] }
 0xa65   : > { %17540 = vmatprep.mubr.bf16.mxu1 %v12994_v28  ;;  %v13701_v28 = vld [vmem:[#allocation2 + $0x9a] sm:$0xff]  ;;  %v13727_v24 = vpack.c.bf16 %v13699_v42, %v13698_v4 }
 0xa66   : > { %v13728_v17 = vpack.c.bf16 %v13701_v28, %v13700_v55 }
 0xa6c   : > { %17541 = vmatmul.mubr.bf16.gmra.mrb[48].mxu1 %v12995_v12  ;;  %v13703_v12 = vld [vmem:[#allocation2 + $0xb2] sm:$0xff] }
 0xa6d   : > { %17544 = vmatprep.mubr.bf16.mxu1 %v12996_v61  ;;  %v13705_v61 = vld [vmem:[#allocation2 + $0xca] sm:$0xff]  ;;  %v13729_v47 = vpack.c.bf16 %v13703_v12, %v13702_v62 }
 0xa6e   : > { %v13730_v8 = vpack.c.bf16 %v13705_v61, %v13704_v21 }
 0xa74   : > { %17545 = vmatmul.mubr.bf16.gmra.mrb[52].mxu1 %v12997_v35  ;;  %v13706_v35 = vld [vmem:[#allocation2 + $0xda] sm:$0xff] }
 0xa75   : > { %17548 = vmatprep.mubr.bf16.mxu1 %v20956_v14  ;;  %v18918_v14 = vld [vmem:[%s21197_s2 + $0x698] sm:$0xff]  }
 0xa7c   : > { %17549 = vmatmul.mubr.bf16.gmra.mrb[56].mxu1 %v12999_v29  ;;  %v13708_v29 = vld [vmem:[#allocation2 + $0xf2] sm:$0xff] }
 0xa7d   : > { %17568 = vmatprep.mubr.bf16.mxu1 %v20959_v38  ;;  %v18919_v38 = vld [vmem:[%s21197_s2 + $0x6a0] sm:$0xff]  }
 0xa84   : > { %17569 = vmatmul.mubr.bf16.vlgmr.msra.gmra.mrb[60].mxu1 %v20964_v6  ;;  %v13333_v6 = vld [vmem:[#allocation2 + $0xb1] sm:$0xff] }
 0xa85   : > { %17601 = vmatpush3.bf16.msra.mxu1 %v18915_v20  ;;  %17572 = vmatprep.mubr.bf16.mxu1 %v20971_v51  ;;  %v13359_v51 = vpack.c.bf16 %v13333_v6, %v20983_v52  ;;  %v18922_v52 = vld [vmem:[%s21197_s2 + $0x6b8] sm:$0xff]   ;;  %v13697_v20 = vld [vmem:[#allocation2 + $0x6a] sm:$0xff] }
 0xa86   : > { %17602 = vmatprep.subr.bf16.mxu1 %v18916_v54  ;;  %v13726_v18 = vpack.c.bf16 %v13697_v20, %v13696_v49  ;;  %v13711_v6 = vld [vmem:[#allocation2 + $0x112] sm:$0xff] }
 0xa89   : > { %17603 = vmatpush3.bf16.msra.mxu1 %v18916_v54  ;;  %v13709_v54 = vld [vmem:[#allocation2 + $0xfa] sm:$0xff] }
 0xa8a   : > { %17604 = vmatprep.subr.bf16.mxu1 %v18917_v13 }
 0xa8c   : > { %17573 = vmatmul.mubr.bf16.gmra.mrb[32].mxu1 %v20976_v40  ;;  %v18921_v40 = vld [vmem:[%s21197_s2 + $0x6b0] sm:$0xff]  }
 0xa8d   : > { %17576 = vmatprep.mubr.bf16.mxu1 %v20985_v11  ;;  %17605 = vmatpush3.bf16.msra.mxu1 %v18917_v13  ;;  %v13337_v11 = vld [vmem:[#allocation2 + $0xe1] sm:$0xff]  ;;  %v13731_v13 = vpack.c.bf16 %v13707_v46, %v13706_v35 }
 0xa8e   : > { %17606 = vmatprep.subr.bf16.mxu1 %v18918_v14  ;;  %v13361_v22 = vpack.c.bf16 %v13337_v11, %v13336_v16  ;;  %v13715_v16 = vld [vmem:[#allocation2 + $0x142] sm:$0xff] }
 0xa91   : > { %17607 = vmatpush3.bf16.msra.mxu1 %v18918_v14  ;;  %v13732_v14 = vpack.c.bf16 %v13709_v54, %v13708_v29 }
 0xa92   : > { %17608 = vmatprep.subr.bf16.mxu1 %v18919_v38 }
 0xa94   : > { %17577 = vmatmul.mubr.bf16.gmra.mrb[36].mxu1 %v13359_v51  ;;  %v13712_v51 = vld [vmem:[#allocation2 + $0x122] sm:$0xff] }
 0xa95   : > { %17580 = vmatprep.mubr.bf16.mxu1 %v20996_v58  ;;  %17609 = vmatpush3.bf16.msra.mxu1 %v18919_v38  ;;  %v13341_v58 = vld [vmem:[#allocation2 + $0x111] sm:$0xff] }
 0xa96   : > { %17610 = vmatprep.subr.bf16.mxu1 %v18920_v43  ;;  %v13363_v19 = vpack.c.bf16 %v13341_v58, %v13340_v39  ;;  %v13710_v38 = vld [vmem:[#allocation2 + $0x10a] sm:$0xff]  ;;  %v13719_v39 = vld [vmem:[#allocation2 + $0x172] sm:$0xff] }
 0xa99   : > { %17611 = vmatpush3.bf16.msra.mxu1 %v18920_v43  ;;  %v13713_v43 = vld [vmem:[#allocation2 + $0x12a] sm:$0xff] }
 0xa9a   : > { %17612 = vmatprep.subr.bf16.mxu1 %v18921_v40  ;;  %v13734_v11 = vpack.c.bf16 %v13713_v43, %v13712_v51 }
 0xa9c   : > { %17581 = vmatmul.mubr.bf16.gmra.mrb[40].mxu1 %v13361_v22  ;;  %v13716_v22 = vld [vmem:[#allocation2 + $0x152] sm:$0xff] }
 0xa9d   : > { %17584 = vmatprep.mubr.bf16.mxu1 %v13362_v59  ;;  %17613 = vmatpush3.bf16.msra.mxu1 %v18921_v40  ;;  %v13733_v40 = vpack.c.bf16 %v13711_v6, %v13710_v38  ;;  %v13735_v59 = vpack.c.bf16 %v13715_v16, %v13714_v57 }
 0xa9e   : > { %17614 = vmatprep.subr.bf16.mxu1 %v18922_v52 }
 0xaa1   : > { %17615 = vmatpush3.bf16.msra.mxu1 %v18922_v52  ;;  %v13717_v52 = vld [vmem:[#allocation2 + $0x15a] sm:$0xff] }
 0xaa2   : > { %v13736_v58 = vpack.c.bf16 %v13717_v52, %v13716_v22 }
 0xaa4   : > { %17585 = vmatmul.mubr.bf16.gmra.mrb[44].mxu1 %v13363_v19  ;;  %v13737_v19 = vpack.c.bf16 %v13719_v39, %v13718_v15 }
 0xaa5   : > { %17588 = vmatprep.mubr.bf16.mxu1 %v13364_v9  ;;  %v13723_v9 = vld [vmem:[#allocation2 + $0x1a2] sm:$0xff] }
 0xaa6   : > { %v13739_v45 = vpack.c.bf16 %v13723_v9, %v13722_v60 }
 0xaac   : > { %17589 = vmatmul.mubr.bf16.gmra.mrb[48].mxu1 %v13365_v31 }
 0xaad   : > { %17592 = vmatprep.mubr.bf16.mxu1 %v13366_v32 }
 0xab4   : > { %17593 = vmatmul.mubr.bf16.gmra.mrb[52].mxu1 %v13367_v53 }
 0xab5   : > { %17596 = vmatprep.mubr.bf16.mxu1 %v13368_v30 }
 0xabc   : > { %17597 = vmatmul.mubr.bf16.gmra.mrb[56].mxu1 %v13369_v3 }
 0xabd   : > { %17616 = vmatprep.mubr.bf16.mxu1 %v13724_v23 }
 0xac4   : > { %17617 = vmatmul.mubr.bf16.vlgmr.msra.gmra.mrb[60].mxu1 %v13725_v1 }
 0xac5   : > { %17620 = vmatprep.mubr.bf16.mxu1 %v13726_v18 }
 0xacc   : > { %17621 = vmatmul.mubr.bf16.gmra.mrb[32].mxu1 %v13727_v24 }
 0xacd   : > { %17624 = vmatprep.mubr.bf16.mxu1 %v13728_v17 }
 0xad4   : > { %17625 = vmatmul.mubr.bf16.gmra.mrb[36].mxu1 %v13729_v47 }
 0xad5   : > { %17628 = vmatprep.mubr.bf16.mxu1 %v13730_v8 }
 0xadc   : > { %17629 = vmatmul.mubr.bf16.gmra.mrb[40].mxu1 %v13731_v13 }
 0xadd   : > { %17632 = vmatprep.mubr.bf16.mxu1 %v13732_v14 }
 0xae4   : > { %17633 = vmatmul.mubr.bf16.gmra.mrb[44].mxu1 %v13733_v40 }
 0xae5   : > { %17636 = vmatprep.mubr.bf16.mxu1 %v13734_v11 }
 0xaec   : > { %17637 = vmatmul.mubr.bf16.gmra.mrb[48].mxu1 %v13735_v59 }
 0xaed   : > { %17640 = vmatprep.mubr.bf16.mxu1 %v13736_v58 }
 0xaf4   : > { %17641 = vmatmul.mubr.bf16.gmra.mrb[52].mxu1 %v13737_v19 }
 0xaf5   : > { %17644 = vmatprep.mubr.bf16.mxu1 %v21055_v36 }
 0xafc   : > { %17645 = vmatmul.mubr.bf16.gmra.mrb[56].mxu1 %v13739_v45 }
 0xb97   : > { %v17618_v44 = vpop.f32.mrb[60].mxu1 }
 0xb98   : > { %v17664_v31 = vadd.f32 %v17618_v44, %v20934_v63  ;;  %v13871_v27 = vpop.f32.mrb[61].mxu1 }
 0xb99   : > { %v17665_v32 = vadd.f32 %v13871_v27, %v20936_v48  ;;  %v17619_v25 = vpop.f32.mrb[62].mxu1 }
 0xb9a   : > { %v14102_v56 = vadd.f32 %v17664_v31, %v21116_v41  ;;  %v17666_v36 = vadd.f32 %v17619_v25, %v20938_v50  ;;  %v13874_v0 = vpop.f32.mrb[63].mxu1 }
 0xb9b   : > { %v14100_v63 = vadd.f32 %v17665_v32, %v21116_v41  ;;  %v17667_v53 = vadd.f32 %v13874_v0, %v20940_v26 }
 0xb9c   : > { %v14134_v48 = vmax.f32 %v14102_v56, 0.0  ;;  %v14103_v5 = vadd.f32 %v17666_v36, %v21116_v41 }
 0xb9d   : > { %v14132_v30 = vmax.f32 %v14100_v63, 0.0  ;;  %v14101_v50 = vadd.f32 %v17667_v53, %v21116_v41 }
 0xb9e   : > { %14166 = vst [vmem:[%s21126_s27 + $0x10] sm:$0xff] %v14134_v48  ;;  %v14135_v34 = vmax.f32 %v14103_v5, 0.0 }
 0xb9f   : > { %14164 = vst [vmem:[%s21126_s27] sm:$0xff] %v14132_v30  ;;  %v14133_v7 = vmax.f32 %v14101_v50, 0.0  ;;  %v17622_v3 = vpop.f32.mrb[32].mxu1 }
 0xba0   : > { %14167 = vst [vmem:[%s21126_s27 + $0x18] sm:$0xff] %v14135_v34  ;;  %v14106_v37 = vadd.f32 %v17622_v3, %v21116_v41  ;;  %v13887_v10 = vpop.f32.mrb[33].mxu1 }
 0xba1   : > { %14165 = vst [vmem:[%s21126_s27 + $0x8] sm:$0xff] %v14133_v7  ;;  %v14104_v26 = vadd.f32 %v21116_v41, %v13887_v10  ;;  %v17623_v23 = vpop.f32.mrb[34].mxu1 }
 0xba2   : > { %v14138_v33 = vmax.f32 %v14106_v37, 0.0  ;;  %v14107_v2 = vadd.f32 %v17623_v23, %v21116_v41  ;;  %v13890_v49 = vpop.f32.mrb[35].mxu1 }
 0xba3   : > { %v14136_v20 = vmax.f32 %v14104_v26, 0.0  ;;  %v14105_v1 = vadd.f32 %v21116_v41, %v13890_v49 }
 0xba4   : > { %14170 = vst [vmem:[%s21126_s27 + $0x30] sm:$0xff] %v14138_v33  ;;  %v14139_v18 = vmax.f32 %v14107_v2, 0.0 }
 0xba5   : > { %14168 = vst [vmem:[%s21126_s27 + $0x20] sm:$0xff] %v14136_v20  ;;  %v14137_v4 = vmax.f32 %v14105_v1, 0.0 }
 0xba6   : > { %14171 = vst [vmem:[%s21126_s27 + $0x38] sm:$0xff] %v14139_v18 }
 0xba7   : > { %14169 = vst [vmem:[%s21126_s27 + $0x28] sm:$0xff] %v14137_v4  ;;  %v17626_v42 = vpop.f32.mrb[36].mxu1 }
 0xba8   : > { %v14110_v55 = vadd.f32 %v17626_v42, %v21116_v41  ;;  %v13903_v28 = vpop.f32.mrb[37].mxu1 }
 0xba9   : > { %v14108_v24 = vadd.f32 %v21116_v41, %v13903_v28  ;;  %v17627_v17 = vpop.f32.mrb[38].mxu1 }
 0xbaa   : > { %v14142_v62 = vmax.f32 %v14110_v55, 0.0  ;;  %v14111_v12 = vadd.f32 %v17627_v17, %v21116_v41  ;;  %v13906_v21 = vpop.f32.mrb[39].mxu1 }
 0xbab   : > { %v14140_v61 = vmax.f32 %v14108_v24, 0.0  ;;  %v14109_v47 = vadd.f32 %v21116_v41, %v13906_v21 }
 0xbac   : > { %14174 = vst [vmem:[%s21126_s27 + $0x50] sm:$0xff] %v14142_v62  ;;  %v14143_v8 = vmax.f32 %v14111_v12, 0.0 }
 0xbad   : > { %14172 = vst [vmem:[%s21126_s27 + $0x40] sm:$0xff] %v14140_v61  ;;  %v14141_v35 = vmax.f32 %v14109_v47, 0.0 }
 0xbae   : > { %14175 = vst [vmem:[%s21126_s27 + $0x58] sm:$0xff] %v14143_v8 }
 0xbaf   : > { %14173 = vst [vmem:[%s21126_s27 + $0x48] sm:$0xff] %v14141_v35  ;;  %v17630_v46 = vpop.f32.mrb[40].mxu1 }
 0xbb0   : > { %v14114_v29 = vadd.f32 %v17630_v46, %v21116_v41  ;;  %v13919_v54 = vpop.f32.mrb[41].mxu1 }
 0xbb1   : > { %v14112_v13 = vadd.f32 %v21116_v41, %v13919_v54  ;;  %v17631_v14 = vpop.f32.mrb[42].mxu1 }
 0xbb2   : > { %v14146_v38 = vmax.f32 %v14114_v29, 0.0  ;;  %v14115_v6 = vadd.f32 %v17631_v14, %v21116_v41  ;;  %v13922_v51 = vpop.f32.mrb[43].mxu1 }
 0xbb3   : > { %v14144_v43 = vmax.f32 %v14112_v13, 0.0  ;;  %v14113_v40 = vadd.f32 %v21116_v41, %v13922_v51 }
 0xbb4   : > { %14178 = vst [vmem:[%s21126_s27 + $0x70] sm:$0xff] %v14146_v38  ;;  %v14147_v11 = vmax.f32 %v14115_v6, 0.0 }
 0xbb5   : > { %14176 = vst [vmem:[%s21126_s27 + $0x60] sm:$0xff] %v14144_v43  ;;  %v14145_v57 = vmax.f32 %v14113_v40, 0.0 }
 0xbb6   : > { %14179 = vst [vmem:[%s21126_s27 + $0x78] sm:$0xff] %v14147_v11 }
 0xbb7   : > { %14177 = vst [vmem:[%s21126_s27 + $0x68] sm:$0xff] %v14145_v57  ;;  %v17634_v16 = vpop.f32.mrb[44].mxu1 }
 0xbb8   : > { %v14118_v22 = vadd.f32 %v17634_v16, %v21116_v41  ;;  %v13935_v52 = vpop.f32.mrb[45].mxu1 }
 0xbb9   : > { %v14116_v59 = vadd.f32 %v21116_v41, %v13935_v52  ;;  %v17635_v58 = vpop.f32.mrb[46].mxu1 }
 0xbba   : > { %v14150_v15 = vmax.f32 %v14118_v22, 0.0  ;;  %v14119_v39 = vadd.f32 %v17635_v58, %v21116_v41  ;;  %v13938_v19 = vpop.f32.mrb[47].mxu1 }
 0xbbb   : > { %v14148_v60 = vmax.f32 %v14116_v59, 0.0  ;;  %v14117_v9 = vadd.f32 %v21116_v41, %v13938_v19 }
 0xbbc   : > { %14182 = vst [vmem:[%s21126_s27 + $0x90] sm:$0xff] %v14150_v15  ;;  %v14151_v45 = vmax.f32 %v14119_v39, 0.0 }
 0xbbd   : > { %14180 = vst [vmem:[%s21126_s27 + $0x80] sm:$0xff] %v14148_v60  ;;  %v14149_v44 = vmax.f32 %v14117_v9, 0.0 }
 0xbbe   : > { %14183 = vst [vmem:[%s21126_s27 + $0x98] sm:$0xff] %v14151_v45 }
 0xbbf   : > { %14181 = vst [vmem:[%s21126_s27 + $0x88] sm:$0xff] %v14149_v44  ;;  %v17638_v31 = vpop.f32.mrb[48].mxu1 }
 0xbc0   : > { %v14122_v27 = vadd.f32 %v17638_v31, %v21116_v41  ;;  %v13951_v32 = vpop.f32.mrb[49].mxu1 }
 0xbc1   : > { %v14120_v25 = vadd.f32 %v21116_v41, %v13951_v32  ;;  %v17639_v56 = vpop.f32.mrb[50].mxu1 }
 0xbc2   : > { %v14154_v36 = vmax.f32 %v14122_v27, 0.0  ;;  %v14123_v0 = vadd.f32 %v17639_v56, %v21116_v41  ;;  %v13954_v63 = vpop.f32.mrb[51].mxu1 }
 0xbc3   : > { %v14152_v53 = vmax.f32 %v14120_v25, 0.0  ;;  %v14121_v48 = vadd.f32 %v21116_v41, %v13954_v63 }
 0xbc4   : > { %14186 = vst [vmem:[%s21126_s27 + $0xb0] sm:$0xff] %v14154_v36  ;;  %v14155_v5 = vmax.f32 %v14123_v0, 0.0 }
 0xbc5   : > { %14184 = vst [vmem:[%s21126_s27 + $0xa0] sm:$0xff] %v14152_v53  ;;  %v14153_v30 = vmax.f32 %v14121_v48, 0.0 }
 0xbc6   : > { %14187 = vst [vmem:[%s21126_s27 + $0xb8] sm:$0xff] %v14155_v5 }
 0xbc7   : > { %14185 = vst [vmem:[%s21126_s27 + $0xa8] sm:$0xff] %v14153_v30  ;;  %v17642_v50 = vpop.f32.mrb[52].mxu1 }
 0xbc8   : > { %v14126_v34 = vadd.f32 %v17642_v50, %v21116_v41  ;;  %v13967_v7 = vpop.f32.mrb[53].mxu1 }
 0xbc9   : > { %v14124_v3 = vadd.f32 %v21116_v41, %v13967_v7  ;;  %v17643_v37 = vpop.f32.mrb[54].mxu1 }
 0xbca   : > { %v14158_v10 = vmax.f32 %v14126_v34, 0.0  ;;  %v14127_v26 = vadd.f32 %v17643_v37, %v21116_v41  ;;  %v13970_v23 = vpop.f32.mrb[55].mxu1 }
 0xbcb   : > { %v14156_v33 = vmax.f32 %v14124_v3, 0.0  ;;  %v14125_v2 = vadd.f32 %v21116_v41, %v13970_v23 }
 0xbcc   : > { %14190 = vst [vmem:[%s21126_s27 + $0xd0] sm:$0xff] %v14158_v10  ;;  %v14159_v49 = vmax.f32 %v14127_v26, 0.0 }
 0xbcd   : > { %14188 = vst [vmem:[%s21126_s27 + $0xc0] sm:$0xff] %v14156_v33  ;;  %v14157_v20 = vmax.f32 %v14125_v2, 0.0 }
 0xbce   : > { %14191 = vst [vmem:[%s21126_s27 + $0xd8] sm:$0xff] %v14159_v49 }
 0xbcf   : > { %14189 = vst [vmem:[%s21126_s27 + $0xc8] sm:$0xff] %v14157_v20  ;;  %v17646_v1 = vpop.f32.mrb[56].mxu1 }
 0xbd0   : > { %v14130_v18 = vadd.f32 %v17646_v1, %v21116_v41  ;;  %v13983_v4 = vpop.f32.mrb[57].mxu1 }
 0xbd1   : > { %v14128_v42 = vadd.f32 %v21116_v41, %v13983_v4  ;;  %v17647_v55 = vpop.f32.mrb[58].mxu1 }
 0xbd2   : > { %v14162_v28 = vmax.f32 %v14130_v18, 0.0  ;;  %v14131_v24 = vadd.f32 %v17647_v55, %v21116_v41  ;;  %v13986_v17 = vpop.f32.mrb[59].mxu1 }
 0xbd3   : > { %v14160_v62 = vmax.f32 %v14128_v42, 0.0  ;;  %v14129_v12 = vadd.f32 %v21116_v41, %v13986_v17 }
 0xbd4   : > { %14194 = vst [vmem:[%s21126_s27 + $0xf0] sm:$0xff] %v14162_v28  ;;  %v14163_v21 = vmax.f32 %v14131_v24, 0.0 }
 0xbd5   : > { %14192 = vst [vmem:[%s21126_s27 + $0xe0] sm:$0xff] %v14160_v62  ;;  %v14161_v61 = vmax.f32 %v14129_v12, 0.0 }
 0xbd6   : > { %14195 = vst [vmem:[%s21126_s27 + $0xf8] sm:$0xff] %v14163_v21 }
 0xbd7   : > { %14193 = vst [vmem:[%s21126_s27 + $0xe8] sm:$0xff] %v14161_v61 }
 0xbd8 PF: > { %s14_s15 = sadd.s32 1, %s18932_s15  }
 0xbd9   : > { %p11_p4 = scmp.ge.s32.totalorder %s14_s15, 4  }
 0xbdb   :  { %13 = sbr.rel (!%p11_p4) target bundleno = 1 (0x1), region = 109 }

</bundles_post_ra>
